<compile_context>
chip_gen: v5e
topology: v5e:2x2
jax: 0.10.0
libtpu: 0.0.40
codegen_flags: <defaults>
</compile_context>

<pallas_src>
import functools
import math

import jax
import jax.numpy as jnp
from jax.experimental import pallas as pl
from jax.experimental.pallas import tpu as pltpu


def _elu(x):
    # nn.ELU(alpha=1.0); clamp exp argument so the untaken branch stays finite.
    return jnp.where(x > 0, x, jnp.exp(jnp.minimum(x, 0.0)) - 1.0)


def fused_datcnet_kernel(xp_ref, wt_ref, wc_ref, wtcn_ref, eca_ref, wh_ref,
                         aff_ref, pool_ref, out_ref, *, kg, ktcn, t_len, bblk):
    T, K, Bb = t_len, ktcn, bblk
    NT = Bb * T
    Cp = xp_ref.shape[1]            # channels padded to a full bf16 sublane tile
    Rt = wt_ref.shape[0]            # 2 * C * F1
    C2 = wc_ref.shape[0]            # 2 * F1
    NCLS, _, L = wh_ref.shape       # classes, channels, pooled length (T // 8)

    def aff(off, n):                # packed per-row (scale, shift) columns
        return aff_ref[off:off + n, 0:1], aff_ref[off:off + n, 1:2]

    # ---- fused global+local SingleScaleBlocks: 2 MXU matmuls total ----------
    # shared bf16 im2col: row k*Cp + c, col b*T + t  ->  x[b, c, t + k - kg//2]
    im = jnp.concatenate(
        [jnp.concatenate([xp_ref[b, :, pl.ds(k, T)] for k in range(kg)], axis=0)
         for b in range(Bb)], axis=1)                       # (kg*Cp, Bb*T) bf16
    a_t, b_t = aff(0, Rt)
    ht = jnp.dot(wt_ref[...], im, preferred_element_type=jnp.float32)
    ht = _elu(ht * a_t + b_t)                               # conv_time + BN + ELU
    a_c, b_c = aff(Rt, C2)
    xc = jnp.dot(wc_ref[...], ht.astype(jnp.bfloat16),
                 preferred_element_type=jnp.float32)
    xc = _elu(xc * a_c + b_c)                               # == cat(global, local)

    # ---- ECA: per-example GAP -> banded channel mix -> sigmoid gate ---------
    mean_all = jnp.concatenate(
        [jnp.mean(xc[:, b * T:(b + 1) * T], axis=1, keepdims=True)
         for b in range(Bb)], axis=1)                       # (C2, Bb)
    gate = 1.0 / (1.0 + jnp.exp(-jnp.dot(eca_ref[...], mean_all,
                                         preferred_element_type=jnp.float32)))
    h = jnp.concatenate(
        [xc[:, b * T:(b + 1) * T] * gate[:, b:b + 1] for b in range(Bb)],
        axis=1)                                             # (C2, Bb*T) f32

    # ---- TCN: 2 TemporalBlocks; causal dilated conv = roll + mask + matmul --
    t_in_ex = jnp.tile(jax.lax.broadcasted_iota(jnp.int32, (C2, T), 1), (1, Bb))

    def causal_conv(hin, dil, w, a, b):
        taps = []
        for k in range(K):
            s = (K - 1 - k) * dil                           # right (causal) shift
            if s == 0:
                taps.append(hin.astype(jnp.bfloat16))
            else:
                rolled = pltpu.roll(hin, shift=s, axis=1)
                taps.append(jnp.where(t_in_ex >= s, rolled, 0.0)
                            .astype(jnp.bfloat16))
        imt = jnp.concatenate(taps, axis=0)                 # (K*C2, Bb*T) bf16
        z = jnp.dot(w, imt, preferred_element_type=jnp.float32)
        return _elu(z * a + b)                              # bias+BN + ELU

    o_tcn = Rt + C2
    for j, dil in enumerate((1, 2)):
        a1, b1 = aff(o_tcn + (2 * j) * C2, C2)
        a2, b2 = aff(o_tcn + (2 * j + 1) * C2, C2)
        w1 = wtcn_ref[(2 * j) * C2:(2 * j + 1) * C2, :]
        w2 = wtcn_ref[(2 * j + 1) * C2:(2 * j + 2) * C2, :]
        hm = causal_conv(h, dil, w1, a1, b1)
        ho = causal_conv(hm, dil, w2, a2, b2)   # NOTE: bn1 reused after conv2 (ref bug)
        h = _elu(ho + h)                        # identity residual + final ELU

    # ---- head: AvgPool2d((1,8)) as MXU matmul, then compact FC --------------
    # TODO(synk): Dropout(p=0.25 / p=0.5) layers are identity in eval mode.
    pooled = jnp.dot(h.astype(jnp.bfloat16), pool_ref[...],
                     preferred_element_type=jnp.float32)    # (C2, Bb*L)
    bh = aff_ref[o_tcn + 4 * C2:o_tcn + 4 * C2 + NCLS, 0:1]  # (NCLS, 1)
    cols = []
    for b in range(Bb):
        pb = pooled[:, b * L:(b + 1) * L]                   # (C2, L)
        acc = jnp.sum(wh_ref[...] * pb[None, :, :], axis=2)  # (NCLS, C2)
        cols.append(jnp.sum(acc, axis=1, keepdims=True))    # (NCLS, 1)
    out_ref[0] = jnp.concatenate(cols, axis=1) + bh         # (NCLS, Bb)


# ---------------------------------------------------------------------------
# Host wrapper: one fused pallas_call over the (blocked) batch.
# ---------------------------------------------------------------------------
def datcnet_forward(x, params, bblk=None):
    """x: (B, C, T) f32 -> logits (B, num_classes) f32."""
    B, C, T = x.shape
    kg, ktcn, cpad = params["kg"], params["ktcn"], params["cpad"]
    pad_g = kg // 2
    assert T % 8 == 0 and (ktcn - 1) * 2 < T
    if bblk is None:
        # Bblk*T matmul columns; 2*128 fills the 256-wide MXU on v6e/v7x.
        bblk = min(B, 2)
    nb = -(-B // bblk)
    Bp = nb * bblk
    tpad = 128 * (-(-(T + 2 * pad_g) // 128))   # lane-dense padded length

    # One tiny host-side pad + bf16 cast of the raw input; all intermediates
    # stay on chip.
    xp = jnp.zeros((Bp, cpad, tpad), jnp.bfloat16)
    xp = xp.at[:B, :C, pad_g:pad_g + T].set(x.astype(jnp.bfloat16))

    # exact 0/1 pooling matrix: AvgPool2d((1,8)) with the 1/8 folded into wh
    L = T // 8
    p1 = jnp.repeat(jnp.eye(L, dtype=jnp.bfloat16), 8, axis=0)      # (T, L)
    pool = jnp.kron(jnp.eye(bblk, dtype=jnp.bfloat16), p1)          # (Bb*T, Bb*L)

    weights = [params["wt"], params["wc"], params["wtcn"],
               params["eca"], params["wh"], params["affine"], pool]
    ncls = params["wh"].shape[0]

    def rep_spec(a):
        nd = a.ndim
        return pl.BlockSpec(a.shape, lambda i, _nd=nd: (0,) * _nd)  # replicated

    kern = functools.partial(fused_datcnet_kernel,
                             kg=kg, ktcn=ktcn, t_len=T, bblk=bblk)
    out = pl.pallas_call(
        kern,
        out_shape=jax.ShapeDtypeStruct((nb, ncls, bblk), jnp.float32),
        grid=(nb,),
        in_specs=[pl.BlockSpec((bblk, cpad, tpad), lambda i: (i, 0, 0))]
                 + [rep_spec(w) for w in weights],
        out_specs=pl.BlockSpec((1, ncls, bblk), lambda i: (i, 0, 0)),
        compiler_params=pltpu.CompilerParams(
            dimension_semantics=("parallel",)),
    )(xp, *weights)
    return out.transpose(0, 2, 1).reshape(Bp, ncls)[:B]


# ---------------------------------------------------------------------------
# Deterministic parameter construction (eval-mode BN folded to scale/shift).
# ---------------------------------------------------------------------------
def init_params(key, C, T, F1, Kg, Kl, Ktcn, num_classes):
    assert Kg % 2 == 1 and Kl % 2 == 1 and Kl <= Kg
    assert T % 8 == 0
    F2 = 2 * F1
    L = T // 8
    Cp = 16 * ((C + 15) // 16)      # pad channels to a full bf16 sublane tile
    pad_g = Kg // 2
    keys = iter(jax.random.split(key, 64))

    def nrm(shape, scale=0.1):
        return scale * jax.random.normal(next(keys), shape, dtype=jnp.float32)

    def bn(n):
        gamma = 1.0 + nrm((n,))
        beta = nrm((n,))
        mean = nrm((n,))
        var = 0.5 + jax.random.uniform(next(keys), (n,), dtype=jnp.float32)
        return gamma, beta, mean, var

    def fold(gamma, beta, mean, var, conv_bias):   # eval-mode BN -> scale/shift
        s = gamma / jnp.sqrt(var + 1e-5)
        return s, beta + (conv_bias - mean) * s

    chan_sel = jnp.eye(C, Cp, dtype=jnp.float32)   # real -> padded channels

    def scale_block(kw):
        wt = nrm((F1, 1, 1, kw))                   # Conv2d(1, F1, (1, kw))
        a_t, b_t = fold(*bn(F1), nrm((F1,)))
        wc = nrm((F1, F1, C, 1))                   # Conv2d(F1, F1, (C, 1))
        a_c, b_c = fold(*bn(F1), nrm((F1,)))
        # conv_time as matrix: row c*F1+f, col k*Cp+c'
        wt_big = jnp.einsum("fk,cd->cfkd", wt[:, 0, 0, :],
                            chan_sel).reshape(C * F1, kw * Cp)
        # conv_chan flattened: row f_out, col c*F1+f_in
        wc_flat = jnp.transpose(wc[:, :, :, 0], (0, 2, 1)).reshape(F1, C * F1)
        tile_f = lambda v: jnp.tile(v.reshape(1, F1), (C, 1)).reshape(C * F1)
        return wt_big, wc_flat, tile_f(a_t), tile_f(b_t), a_c, b_c

    gt, gcf, gat, gbt, gac, gbc = scale_block(Kg)
    lt, lcf, lat, lbt, lac, lbc = scale_block(Kl)

    # Fuse both blocks: embed the local kl taps inside the global kg-tap window
    dk = pad_g - Kl // 2
    lt_kg = jnp.zeros((C * F1, Kg * Cp), jnp.float32)
    lt_kg = lt_kg.at[:, dk * Cp:(dk + Kl) * Cp].set(lt)
    wt_all = jnp.concatenate([gt, lt_kg], axis=0)            # (2*C*F1, Kg*Cp)
    wc_all = jnp.zeros((F2, 2 * C * F1), jnp.float32)
    wc_all = wc_all.at[:F1, :C * F1].set(gcf).at[F1:, C * F1:].set(lcf)

    params = {"kg": Kg, "kl": Kl, "ktcn": Ktcn, "cpad": Cp,
              "wt": wt_all.astype(jnp.bfloat16),
              "wc": wc_all.astype(jnp.bfloat16)}

    # ECA attention: channel kernel-size rule from the module, banded matrix.
    C2 = F2
    ks = int(abs((math.log(C2, 2) + 1) / 2))
    if ks % 2 == 0:
        ks += 1
    w_eca = nrm((ks,))
    M = jnp.zeros((C2, C2), jnp.float32)
    for j in range(ks):
        M = M + w_eca[j] * jnp.eye(C2, k=j - ks // 2, dtype=jnp.float32)
    params["eca"] = M

    # TCN: two TemporalBlocks; bn1 folded after BOTH convs (bn2 unused in ref).
    flat = lambda w: jnp.transpose(w, (0, 2, 1)).reshape(F2, Ktcn * F2)
    tcn_w, tcn_ab = [], []
    for _ in range(2):
        w1, b1c = nrm((F2, F2, Ktcn)), nrm((F2,))
        g1, be1, m1, v1 = bn(F2)
        w2, b2c = nrm((F2, F2, Ktcn)), nrm((F2,))
        tcn_w += [flat(w1), flat(w2)]
        tcn_ab += [fold(g1, be1, m1, v1, b1c), fold(g1, be1, m1, v1, b2c)]
    params["wtcn"] = jnp.concatenate(tcn_w, axis=0).astype(jnp.bfloat16)

    # head: AvgPool(1,8)+flatten+Linear as compact (ncls, F2, L) weight (/8 folded)
    Wfc = nrm((num_classes, F2 * L))
    bfc = nrm((num_classes,))
    params["wh"] = Wfc.reshape(num_classes, F2, L) / 8.0

    # pack every per-row (scale, shift) pair + fc bias into one f32 operand
    rows = [jnp.stack([jnp.concatenate([gat, lat]),
                       jnp.concatenate([gbt, lbt])], axis=1),
            jnp.stack([jnp.concatenate([gac, lac]),
                       jnp.concatenate([gbc, lbc])], axis=1)]
    rows += [jnp.stack([a, b], axis=1) for (a, b) in tcn_ab]
    rows += [jnp.stack([bfc, jnp.zeros_like(bfc)], axis=1)]
    params["affine"] = jnp.concatenate(rows, axis=0)         # (2CF1+5*C2+ncls, 2)
    return params


if __name__ == "__main__":
    # Small shapes consistent with the module (T=128 keeps tiles lane-dense).
    B, C, T = 2, 4, 128           # batch, EEG channels, signal_length
    F1, Kg, Kl, Ktcn, NCLS = 8, 15, 7, 4, 4
    key = jax.random.PRNGKey(0)
    kx, kp = jax.random.split(key)
    x = jax.random.normal(kx, (B, C, T), dtype=jnp.float32)
    params = init_params(kp, C, T, F1, Kg, Kl, Ktcn, NCLS)
    out = datcnet_forward(x, params)
    out = jax.block_until_ready(out)
    assert out.shape == (B, NCLS), out.shape
    assert bool(jnp.all(jnp.isfinite(out)))
    print("KERNEL_OK")
</pallas_src>

<mosaic_0001>
module attributes {stable_mosaic.version = 11 : i64} {
  func.func @fused_datcnet_kernel(%arg0: i32, %arg1: memref<2x16x256xbf16, #tpu.memory_space<vmem>>, %arg2: memref<64x240xbf16, #tpu.memory_space<vmem>>, %arg3: memref<16x64xbf16, #tpu.memory_space<vmem>>, %arg4: memref<64x64xbf16, #tpu.memory_space<vmem>>, %arg5: memref<16x16xf32, #tpu.memory_space<vmem>>, %arg6: memref<4x16x16xf32, #tpu.memory_space<vmem>>, %arg7: memref<148x2xf32, #tpu.memory_space<vmem>>, %arg8: memref<256x32xbf16, #tpu.memory_space<vmem>>, %arg9: memref<1x4x2xf32, #tpu.memory_space<vmem>>) attributes {dimension_semantics = [#tpu.dimension_semantics<parallel>], iteration_bounds = array<i64: 1>, scalar_prefetch = 0 : i64, scratch_operands = 0 : i64, tpu.core_type = #tpu.core_type<tc>, window_params = [{transform_indices = @transform_0, window_bounds = array<i64: 2, 16, 256>}, {pipeline_mode = #tpu.pipeline_mode<synchronous>, transform_indices = @transform_1, window_bounds = array<i64: 64, 240>}, {pipeline_mode = #tpu.pipeline_mode<synchronous>, transform_indices = @transform_2, window_bounds = array<i64: 16, 64>}, {pipeline_mode = #tpu.pipeline_mode<synchronous>, transform_indices = @transform_3, window_bounds = array<i64: 64, 64>}, {pipeline_mode = #tpu.pipeline_mode<synchronous>, transform_indices = @transform_4, window_bounds = array<i64: 16, 16>}, {pipeline_mode = #tpu.pipeline_mode<synchronous>, transform_indices = @transform_5, window_bounds = array<i64: 4, 16, 16>}, {pipeline_mode = #tpu.pipeline_mode<synchronous>, transform_indices = @transform_6, window_bounds = array<i64: 148, 2>}, {pipeline_mode = #tpu.pipeline_mode<synchronous>, transform_indices = @transform_7, window_bounds = array<i64: 256, 32>}, {transform_indices = @transform_8, window_bounds = array<i64: 1, 4, 2>}]} {
    %c0 = arith.constant 0 : index
    %c0_0 = arith.constant 0 : index
    %c0_1 = arith.constant 0 : index
    %0 = vector.load %arg1[%c0, %c0_0, %c0_1] : memref<2x16x256xbf16, #tpu.memory_space<vmem>>, vector<1x16x128xbf16>
    %1 = vector.shape_cast %0 : vector<1x16x128xbf16> to vector<16x128xbf16>
    %c0_2 = arith.constant 0 : index
    %c0_3 = arith.constant 0 : index
    %c1 = arith.constant 1 : index
    %2 = vector.load %arg1[%c0_2, %c0_3, %c1] : memref<2x16x256xbf16, #tpu.memory_space<vmem>>, vector<1x16x128xbf16>
    %3 = vector.shape_cast %2 : vector<1x16x128xbf16> to vector<16x128xbf16>
    %c0_4 = arith.constant 0 : index
    %c0_5 = arith.constant 0 : index
    %c2 = arith.constant 2 : index
    %4 = vector.load %arg1[%c0_4, %c0_5, %c2] : memref<2x16x256xbf16, #tpu.memory_space<vmem>>, vector<1x16x128xbf16>
    %5 = vector.shape_cast %4 : vector<1x16x128xbf16> to vector<16x128xbf16>
    %c0_6 = arith.constant 0 : index
    %c0_7 = arith.constant 0 : index
    %c3 = arith.constant 3 : index
    %6 = vector.load %arg1[%c0_6, %c0_7, %c3] : memref<2x16x256xbf16, #tpu.memory_space<vmem>>, vector<1x16x128xbf16>
    %7 = vector.shape_cast %6 : vector<1x16x128xbf16> to vector<16x128xbf16>
    %c0_8 = arith.constant 0 : index
    %c0_9 = arith.constant 0 : index
    %c4 = arith.constant 4 : index
    %8 = vector.load %arg1[%c0_8, %c0_9, %c4] : memref<2x16x256xbf16, #tpu.memory_space<vmem>>, vector<1x16x128xbf16>
    %9 = vector.shape_cast %8 : vector<1x16x128xbf16> to vector<16x128xbf16>
    %c0_10 = arith.constant 0 : index
    %c0_11 = arith.constant 0 : index
    %c5 = arith.constant 5 : index
    %10 = vector.load %arg1[%c0_10, %c0_11, %c5] : memref<2x16x256xbf16, #tpu.memory_space<vmem>>, vector<1x16x128xbf16>
    %11 = vector.shape_cast %10 : vector<1x16x128xbf16> to vector<16x128xbf16>
    %c0_12 = arith.constant 0 : index
    %c0_13 = arith.constant 0 : index
    %c6 = arith.constant 6 : index
    %12 = vector.load %arg1[%c0_12, %c0_13, %c6] : memref<2x16x256xbf16, #tpu.memory_space<vmem>>, vector<1x16x128xbf16>
    %13 = vector.shape_cast %12 : vector<1x16x128xbf16> to vector<16x128xbf16>
    %c0_14 = arith.constant 0 : index
    %c0_15 = arith.constant 0 : index
    %c7 = arith.constant 7 : index
    %14 = vector.load %arg1[%c0_14, %c0_15, %c7] : memref<2x16x256xbf16, #tpu.memory_space<vmem>>, vector<1x16x128xbf16>
    %15 = vector.shape_cast %14 : vector<1x16x128xbf16> to vector<16x128xbf16>
    %c0_16 = arith.constant 0 : index
    %c0_17 = arith.constant 0 : index
    %c8 = arith.constant 8 : index
    %16 = vector.load %arg1[%c0_16, %c0_17, %c8] : memref<2x16x256xbf16, #tpu.memory_space<vmem>>, vector<1x16x128xbf16>
    %17 = vector.shape_cast %16 : vector<1x16x128xbf16> to vector<16x128xbf16>
    %c0_18 = arith.constant 0 : index
    %c0_19 = arith.constant 0 : index
    %c9 = arith.constant 9 : index
    %18 = vector.load %arg1[%c0_18, %c0_19, %c9] : memref<2x16x256xbf16, #tpu.memory_space<vmem>>, vector<1x16x128xbf16>
    %19 = vector.shape_cast %18 : vector<1x16x128xbf16> to vector<16x128xbf16>
    %c0_20 = arith.constant 0 : index
    %c0_21 = arith.constant 0 : index
    %c10 = arith.constant 10 : index
    %20 = vector.load %arg1[%c0_20, %c0_21, %c10] : memref<2x16x256xbf16, #tpu.memory_space<vmem>>, vector<1x16x128xbf16>
    %21 = vector.shape_cast %20 : vector<1x16x128xbf16> to vector<16x128xbf16>
    %c0_22 = arith.constant 0 : index
    %c0_23 = arith.constant 0 : index
    %c11 = arith.constant 11 : index
    %22 = vector.load %arg1[%c0_22, %c0_23, %c11] : memref<2x16x256xbf16, #tpu.memory_space<vmem>>, vector<1x16x128xbf16>
    %23 = vector.shape_cast %22 : vector<1x16x128xbf16> to vector<16x128xbf16>
    %c0_24 = arith.constant 0 : index
    %c0_25 = arith.constant 0 : index
    %c12 = arith.constant 12 : index
    %24 = vector.load %arg1[%c0_24, %c0_25, %c12] : memref<2x16x256xbf16, #tpu.memory_space<vmem>>, vector<1x16x128xbf16>
    %25 = vector.shape_cast %24 : vector<1x16x128xbf16> to vector<16x128xbf16>
    %c0_26 = arith.constant 0 : index
    %c0_27 = arith.constant 0 : index
    %c13 = arith.constant 13 : index
    %26 = vector.load %arg1[%c0_26, %c0_27, %c13] : memref<2x16x256xbf16, #tpu.memory_space<vmem>>, vector<1x16x128xbf16>
    %27 = vector.shape_cast %26 : vector<1x16x128xbf16> to vector<16x128xbf16>
    %c0_28 = arith.constant 0 : index
    %c0_29 = arith.constant 0 : index
    %c14 = arith.constant 14 : index
    %28 = vector.load %arg1[%c0_28, %c0_29, %c14] : memref<2x16x256xbf16, #tpu.memory_space<vmem>>, vector<1x16x128xbf16>
    %29 = vector.shape_cast %28 : vector<1x16x128xbf16> to vector<16x128xbf16>
    %30 = tpu.concatenate %1, %3, %5, %7, %9, %11, %13, %15, %17, %19, %21, %23, %25, %27, %29 in 0 : vector<16x128xbf16>, vector<16x128xbf16>, vector<16x128xbf16>, vector<16x128xbf16>, vector<16x128xbf16>, vector<16x128xbf16>, vector<16x128xbf16>, vector<16x128xbf16>, vector<16x128xbf16>, vector<16x128xbf16>, vector<16x128xbf16>, vector<16x128xbf16>, vector<16x128xbf16>, vector<16x128xbf16>, vector<16x128xbf16> -> vector<240x128xbf16>
    %c1_30 = arith.constant 1 : index
    %c0_31 = arith.constant 0 : index
    %c0_32 = arith.constant 0 : index
    %31 = vector.load %arg1[%c1_30, %c0_31, %c0_32] : memref<2x16x256xbf16, #tpu.memory_space<vmem>>, vector<1x16x128xbf16>
    %32 = vector.shape_cast %31 : vector<1x16x128xbf16> to vector<16x128xbf16>
    %c1_33 = arith.constant 1 : index
    %c0_34 = arith.constant 0 : index
    %c1_35 = arith.constant 1 : index
    %33 = vector.load %arg1[%c1_33, %c0_34, %c1_35] : memref<2x16x256xbf16, #tpu.memory_space<vmem>>, vector<1x16x128xbf16>
    %34 = vector.shape_cast %33 : vector<1x16x128xbf16> to vector<16x128xbf16>
    %c1_36 = arith.constant 1 : index
    %c0_37 = arith.constant 0 : index
    %c2_38 = arith.constant 2 : index
    %35 = vector.load %arg1[%c1_36, %c0_37, %c2_38] : memref<2x16x256xbf16, #tpu.memory_space<vmem>>, vector<1x16x128xbf16>
    %36 = vector.shape_cast %35 : vector<1x16x128xbf16> to vector<16x128xbf16>
    %c1_39 = arith.constant 1 : index
    %c0_40 = arith.constant 0 : index
    %c3_41 = arith.constant 3 : index
    %37 = vector.load %arg1[%c1_39, %c0_40, %c3_41] : memref<2x16x256xbf16, #tpu.memory_space<vmem>>, vector<1x16x128xbf16>
    %38 = vector.shape_cast %37 : vector<1x16x128xbf16> to vector<16x128xbf16>
    %c1_42 = arith.constant 1 : index
    %c0_43 = arith.constant 0 : index
    %c4_44 = arith.constant 4 : index
    %39 = vector.load %arg1[%c1_42, %c0_43, %c4_44] : memref<2x16x256xbf16, #tpu.memory_space<vmem>>, vector<1x16x128xbf16>
    %40 = vector.shape_cast %39 : vector<1x16x128xbf16> to vector<16x128xbf16>
    %c1_45 = arith.constant 1 : index
    %c0_46 = arith.constant 0 : index
    %c5_47 = arith.constant 5 : index
    %41 = vector.load %arg1[%c1_45, %c0_46, %c5_47] : memref<2x16x256xbf16, #tpu.memory_space<vmem>>, vector<1x16x128xbf16>
    %42 = vector.shape_cast %41 : vector<1x16x128xbf16> to vector<16x128xbf16>
    %c1_48 = arith.constant 1 : index
    %c0_49 = arith.constant 0 : index
    %c6_50 = arith.constant 6 : index
    %43 = vector.load %arg1[%c1_48, %c0_49, %c6_50] : memref<2x16x256xbf16, #tpu.memory_space<vmem>>, vector<1x16x128xbf16>
    %44 = vector.shape_cast %43 : vector<1x16x128xbf16> to vector<16x128xbf16>
    %c1_51 = arith.constant 1 : index
    %c0_52 = arith.constant 0 : index
    %c7_53 = arith.constant 7 : index
    %45 = vector.load %arg1[%c1_51, %c0_52, %c7_53] : memref<2x16x256xbf16, #tpu.memory_space<vmem>>, vector<1x16x128xbf16>
    %46 = vector.shape_cast %45 : vector<1x16x128xbf16> to vector<16x128xbf16>
    %c1_54 = arith.constant 1 : index
    %c0_55 = arith.constant 0 : index
    %c8_56 = arith.constant 8 : index
    %47 = vector.load %arg1[%c1_54, %c0_55, %c8_56] : memref<2x16x256xbf16, #tpu.memory_space<vmem>>, vector<1x16x128xbf16>
    %48 = vector.shape_cast %47 : vector<1x16x128xbf16> to vector<16x128xbf16>
    %c1_57 = arith.constant 1 : index
    %c0_58 = arith.constant 0 : index
    %c9_59 = arith.constant 9 : index
    %49 = vector.load %arg1[%c1_57, %c0_58, %c9_59] : memref<2x16x256xbf16, #tpu.memory_space<vmem>>, vector<1x16x128xbf16>
    %50 = vector.shape_cast %49 : vector<1x16x128xbf16> to vector<16x128xbf16>
    %c1_60 = arith.constant 1 : index
    %c0_61 = arith.constant 0 : index
    %c10_62 = arith.constant 10 : index
    %51 = vector.load %arg1[%c1_60, %c0_61, %c10_62] : memref<2x16x256xbf16, #tpu.memory_space<vmem>>, vector<1x16x128xbf16>
    %52 = vector.shape_cast %51 : vector<1x16x128xbf16> to vector<16x128xbf16>
    %c1_63 = arith.constant 1 : index
    %c0_64 = arith.constant 0 : index
    %c11_65 = arith.constant 11 : index
    %53 = vector.load %arg1[%c1_63, %c0_64, %c11_65] : memref<2x16x256xbf16, #tpu.memory_space<vmem>>, vector<1x16x128xbf16>
    %54 = vector.shape_cast %53 : vector<1x16x128xbf16> to vector<16x128xbf16>
    %c1_66 = arith.constant 1 : index
    %c0_67 = arith.constant 0 : index
    %c12_68 = arith.constant 12 : index
    %55 = vector.load %arg1[%c1_66, %c0_67, %c12_68] : memref<2x16x256xbf16, #tpu.memory_space<vmem>>, vector<1x16x128xbf16>
    %56 = vector.shape_cast %55 : vector<1x16x128xbf16> to vector<16x128xbf16>
    %c1_69 = arith.constant 1 : index
    %c0_70 = arith.constant 0 : index
    %c13_71 = arith.constant 13 : index
    %57 = vector.load %arg1[%c1_69, %c0_70, %c13_71] : memref<2x16x256xbf16, #tpu.memory_space<vmem>>, vector<1x16x128xbf16>
    %58 = vector.shape_cast %57 : vector<1x16x128xbf16> to vector<16x128xbf16>
    %c1_72 = arith.constant 1 : index
    %c0_73 = arith.constant 0 : index
    %c14_74 = arith.constant 14 : index
    %59 = vector.load %arg1[%c1_72, %c0_73, %c14_74] : memref<2x16x256xbf16, #tpu.memory_space<vmem>>, vector<1x16x128xbf16>
    %60 = vector.shape_cast %59 : vector<1x16x128xbf16> to vector<16x128xbf16>
    %61 = tpu.concatenate %32, %34, %36, %38, %40, %42, %44, %46, %48, %50, %52, %54, %56, %58, %60 in 0 : vector<16x128xbf16>, vector<16x128xbf16>, vector<16x128xbf16>, vector<16x128xbf16>, vector<16x128xbf16>, vector<16x128xbf16>, vector<16x128xbf16>, vector<16x128xbf16>, vector<16x128xbf16>, vector<16x128xbf16>, vector<16x128xbf16>, vector<16x128xbf16>, vector<16x128xbf16>, vector<16x128xbf16>, vector<16x128xbf16> -> vector<240x128xbf16>
    %62 = tpu.concatenate %30, %61 in 1 : vector<240x128xbf16>, vector<240x128xbf16> -> vector<240x256xbf16>
    %c0_75 = arith.constant 0 : index
    %c0_76 = arith.constant 0 : index
    %63 = vector.load %arg7[%c0_75, %c0_76] : memref<148x2xf32, #tpu.memory_space<vmem>>, vector<64x1xf32>
    %c0_77 = arith.constant 0 : index
    %c1_78 = arith.constant 1 : index
    %64 = vector.load %arg7[%c0_77, %c1_78] : memref<148x2xf32, #tpu.memory_space<vmem>>, vector<64x1xf32>
    %c0_79 = arith.constant 0 : index
    %c0_80 = arith.constant 0 : index
    %65 = vector.load %arg2[%c0_79, %c0_80] : memref<64x240xbf16, #tpu.memory_space<vmem>>, vector<64x240xbf16>
    %cst = arith.constant dense<0.000000e+00> : vector<64x256xf32>
    %66 = tpu.matmul %65, %62, %cst {dimension_numbers = #tpu.dot_dimension_numbers<[1], [0], [0], [1], [0, 0, 1, 1], [], []>} : vector<64x240xbf16>, vector<240x256xbf16>, vector<64x256xf32> -> vector<64x256xf32>
    %67 = vector.broadcast %63 : vector<64x1xf32> to vector<64x256xf32>
    %68 = arith.mulf %66, %67 : vector<64x256xf32>
    %69 = vector.broadcast %64 : vector<64x1xf32> to vector<64x256xf32>
    %70 = arith.addf %68, %69 : vector<64x256xf32>
    %cst_81 = arith.constant 0.000000e+00 : f32
    %71 = vector.broadcast %cst_81 : f32 to vector<64x256xf32>
    %72 = arith.cmpf ogt, %70, %71 : vector<64x256xf32>
    %cst_82 = arith.constant 0.000000e+00 : f32
    %73 = vector.broadcast %cst_82 : f32 to vector<64x256xf32>
    %74 = arith.minimumf %70, %73 : vector<64x256xf32>
    %75 = math.exp %74 : vector<64x256xf32>
    %cst_83 = arith.constant 1.000000e+00 : f32
    %76 = vector.broadcast %cst_83 : f32 to vector<64x256xf32>
    %77 = arith.subf %75, %76 : vector<64x256xf32>
    %78 = arith.select %72, %70, %77 : vector<64x256xi1>, vector<64x256xf32>
    %c64 = arith.constant 64 : index
    %c0_84 = arith.constant 0 : index
    %79 = vector.load %arg7[%c64, %c0_84] : memref<148x2xf32, #tpu.memory_space<vmem>>, vector<16x1xf32>
    %c64_85 = arith.constant 64 : index
    %c1_86 = arith.constant 1 : index
    %80 = vector.load %arg7[%c64_85, %c1_86] : memref<148x2xf32, #tpu.memory_space<vmem>>, vector<16x1xf32>
    %c0_87 = arith.constant 0 : index
    %c0_88 = arith.constant 0 : index
    %81 = vector.load %arg3[%c0_87, %c0_88] : memref<16x64xbf16, #tpu.memory_space<vmem>>, vector<16x64xbf16>
    %82 = arith.truncf %78 : vector<64x256xf32> to vector<64x256xbf16>
    %cst_89 = arith.constant dense<0.000000e+00> : vector<16x256xf32>
    %83 = tpu.matmul %81, %82, %cst_89 {dimension_numbers = #tpu.dot_dimension_numbers<[1], [0], [0], [1], [0, 0, 1, 1], [], []>} : vector<16x64xbf16>, vector<64x256xbf16>, vector<16x256xf32> -> vector<16x256xf32>
    %84 = vector.broadcast %79 : vector<16x1xf32> to vector<16x256xf32>
    %85 = arith.mulf %83, %84 : vector<16x256xf32>
    %86 = vector.broadcast %80 : vector<16x1xf32> to vector<16x256xf32>
    %87 = arith.addf %85, %86 : vector<16x256xf32>
    %cst_90 = arith.constant 0.000000e+00 : f32
    %88 = vector.broadcast %cst_90 : f32 to vector<16x256xf32>
    %89 = arith.cmpf ogt, %87, %88 : vector<16x256xf32>
    %cst_91 = arith.constant 0.000000e+00 : f32
    %90 = vector.broadcast %cst_91 : f32 to vector<16x256xf32>
    %91 = arith.minimumf %87, %90 : vector<16x256xf32>
    %92 = math.exp %91 : vector<16x256xf32>
    %cst_92 = arith.constant 1.000000e+00 : f32
    %93 = vector.broadcast %cst_92 : f32 to vector<16x256xf32>
    %94 = arith.subf %92, %93 : vector<16x256xf32>
    %95 = arith.select %89, %87, %94 : vector<16x256xi1>, vector<16x256xf32>
    %96 = vector.extract_strided_slice %95 {offsets = [0, 0], sizes = [16, 128], strides = [1, 1]} : vector<16x256xf32> to vector<16x128xf32>
    %cst_93 = arith.constant dense<0.000000e+00> : vector<16xf32>
    %97 = vector.multi_reduction <add>, %96, %cst_93 [1] : vector<16x128xf32> to vector<16xf32>
    %98 = vector.shape_cast %97 : vector<16xf32> to vector<16x1xf32>
    %cst_94 = arith.constant 1.280000e+02 : f32
    %99 = vector.broadcast %cst_94 : f32 to vector<16x1xf32>
    %100 = arith.divf %98, %99 : vector<16x1xf32>
    %101 = vector.extract_strided_slice %95 {offsets = [0, 128], sizes = [16, 128], strides = [1, 1]} : vector<16x256xf32> to vector<16x128xf32>
    %cst_95 = arith.constant dense<0.000000e+00> : vector<16xf32>
    %102 = vector.multi_reduction <add>, %101, %cst_95 [1] : vector<16x128xf32> to vector<16xf32>
    %103 = vector.shape_cast %102 : vector<16xf32> to vector<16x1xf32>
    %cst_96 = arith.constant 1.280000e+02 : f32
    %104 = vector.broadcast %cst_96 : f32 to vector<16x1xf32>
    %105 = arith.divf %103, %104 : vector<16x1xf32>
    %106 = tpu.concatenate %100, %105 in 1 : vector<16x1xf32>, vector<16x1xf32> -> vector<16x2xf32>
    %c0_97 = arith.constant 0 : index
    %c0_98 = arith.constant 0 : index
    %107 = vector.load %arg5[%c0_97, %c0_98] : memref<16x16xf32, #tpu.memory_space<vmem>>, vector<16x16xf32>
    %cst_99 = arith.constant dense<0.000000e+00> : vector<16x2xf32>
    %108 = tpu.matmul %107, %106, %cst_99 {dimension_numbers = #tpu.dot_dimension_numbers<[1], [0], [0], [1], [0, 0, 1, 1], [], []>} : vector<16x16xf32>, vector<16x2xf32>, vector<16x2xf32> -> vector<16x2xf32>
    %cst_100 = arith.constant 0.000000e+00 : f32
    %109 = vector.broadcast %cst_100 : f32 to vector<16x2xf32>
    %110 = arith.subf %109, %108 : vector<16x2xf32>
    %111 = math.exp %110 : vector<16x2xf32>
    %cst_101 = arith.constant 1.000000e+00 : f32
    %112 = vector.broadcast %cst_101 : f32 to vector<16x2xf32>
    %113 = arith.addf %112, %111 : vector<16x2xf32>
    %cst_102 = arith.constant 1.000000e+00 : f32
    %114 = vector.broadcast %cst_102 : f32 to vector<16x2xf32>
    %115 = arith.divf %114, %113 : vector<16x2xf32>
    %116 = vector.extract_strided_slice %95 {offsets = [0, 0], sizes = [16, 128], strides = [1, 1]} : vector<16x256xf32> to vector<16x128xf32>
    %117 = vector.extract_strided_slice %115 {offsets = [0, 0], sizes = [16, 1], strides = [1, 1]} : vector<16x2xf32> to vector<16x1xf32>
    %118 = vector.broadcast %117 : vector<16x1xf32> to vector<16x128xf32>
    %119 = arith.mulf %116, %118 : vector<16x128xf32>
    %120 = vector.extract_strided_slice %95 {offsets = [0, 128], sizes = [16, 128], strides = [1, 1]} : vector<16x256xf32> to vector<16x128xf32>
    %121 = vector.extract_strided_slice %115 {offsets = [0, 1], sizes = [16, 1], strides = [1, 1]} : vector<16x2xf32> to vector<16x1xf32>
    %122 = vector.broadcast %121 : vector<16x1xf32> to vector<16x128xf32>
    %123 = arith.mulf %120, %122 : vector<16x128xf32>
    %124 = tpu.concatenate %119, %123 in 1 : vector<16x128xf32>, vector<16x128xf32> -> vector<16x256xf32>
    %125 = tpu.iota {dimensions = array<i32: 1>} : vector<16x128xi32>
    %126 = tpu.concatenate %125, %125 in 1 : vector<16x128xi32>, vector<16x128xi32> -> vector<16x256xi32>
    %c80 = arith.constant 80 : index
    %c0_103 = arith.constant 0 : index
    %127 = vector.load %arg7[%c80, %c0_103] : memref<148x2xf32, #tpu.memory_space<vmem>>, vector<16x1xf32>
    %c80_104 = arith.constant 80 : index
    %c1_105 = arith.constant 1 : index
    %128 = vector.load %arg7[%c80_104, %c1_105] : memref<148x2xf32, #tpu.memory_space<vmem>>, vector<16x1xf32>
    %c96 = arith.constant 96 : index
    %c0_106 = arith.constant 0 : index
    %129 = vector.load %arg7[%c96, %c0_106] : memref<148x2xf32, #tpu.memory_space<vmem>>, vector<16x1xf32>
    %c96_107 = arith.constant 96 : index
    %c1_108 = arith.constant 1 : index
    %130 = vector.load %arg7[%c96_107, %c1_108] : memref<148x2xf32, #tpu.memory_space<vmem>>, vector<16x1xf32>
    %c0_109 = arith.constant 0 : index
    %c0_110 = arith.constant 0 : index
    %131 = vector.load %arg4[%c0_109, %c0_110] : memref<64x64xbf16, #tpu.memory_space<vmem>>, vector<16x64xbf16>
    %c16 = arith.constant 16 : index
    %c0_111 = arith.constant 0 : index
    %132 = vector.load %arg4[%c16, %c0_111] : memref<64x64xbf16, #tpu.memory_space<vmem>>, vector<16x64xbf16>
    %c3_i32 = arith.constant 3 : i32
    %133 = tpu.dynamic_rotate %124 by %c3_i32 dim 1 : vector<16x256xf32>, i32 -> vector<16x256xf32>
    %c3_i32_112 = arith.constant 3 : i32
    %134 = vector.broadcast %c3_i32_112 : i32 to vector<16x256xi32>
    %135 = arith.cmpi sge, %126, %134 : vector<16x256xi32>
    %cst_113 = arith.constant 0.000000e+00 : f32
    %136 = vector.broadcast %cst_113 : f32 to vector<16x256xf32>
    %137 = arith.select %135, %133, %136 : vector<16x256xi1>, vector<16x256xf32>
    %138 = arith.truncf %137 : vector<16x256xf32> to vector<16x256xbf16>
    %c2_i32 = arith.constant 2 : i32
    %139 = tpu.dynamic_rotate %124 by %c2_i32 dim 1 : vector<16x256xf32>, i32 -> vector<16x256xf32>
    %c2_i32_114 = arith.constant 2 : i32
    %140 = vector.broadcast %c2_i32_114 : i32 to vector<16x256xi32>
    %141 = arith.cmpi sge, %126, %140 : vector<16x256xi32>
    %cst_115 = arith.constant 0.000000e+00 : f32
    %142 = vector.broadcast %cst_115 : f32 to vector<16x256xf32>
    %143 = arith.select %141, %139, %142 : vector<16x256xi1>, vector<16x256xf32>
    %144 = arith.truncf %143 : vector<16x256xf32> to vector<16x256xbf16>
    %c1_i32 = arith.constant 1 : i32
    %145 = tpu.dynamic_rotate %124 by %c1_i32 dim 1 : vector<16x256xf32>, i32 -> vector<16x256xf32>
    %c1_i32_116 = arith.constant 1 : i32
    %146 = vector.broadcast %c1_i32_116 : i32 to vector<16x256xi32>
    %147 = arith.cmpi sge, %126, %146 : vector<16x256xi32>
    %cst_117 = arith.constant 0.000000e+00 : f32
    %148 = vector.broadcast %cst_117 : f32 to vector<16x256xf32>
    %149 = arith.select %147, %145, %148 : vector<16x256xi1>, vector<16x256xf32>
    %150 = arith.truncf %149 : vector<16x256xf32> to vector<16x256xbf16>
    %151 = arith.truncf %124 : vector<16x256xf32> to vector<16x256xbf16>
    %152 = tpu.concatenate %138, %144, %150, %151 in 0 : vector<16x256xbf16>, vector<16x256xbf16>, vector<16x256xbf16>, vector<16x256xbf16> -> vector<64x256xbf16>
    %cst_118 = arith.constant dense<0.000000e+00> : vector<16x256xf32>
    %153 = tpu.matmul %131, %152, %cst_118 {dimension_numbers = #tpu.dot_dimension_numbers<[1], [0], [0], [1], [0, 0, 1, 1], [], []>} : vector<16x64xbf16>, vector<64x256xbf16>, vector<16x256xf32> -> vector<16x256xf32>
    %154 = vector.broadcast %127 : vector<16x1xf32> to vector<16x256xf32>
    %155 = arith.mulf %153, %154 : vector<16x256xf32>
    %156 = vector.broadcast %128 : vector<16x1xf32> to vector<16x256xf32>
    %157 = arith.addf %155, %156 : vector<16x256xf32>
    %cst_119 = arith.constant 0.000000e+00 : f32
    %158 = vector.broadcast %cst_119 : f32 to vector<16x256xf32>
    %159 = arith.cmpf ogt, %157, %158 : vector<16x256xf32>
    %cst_120 = arith.constant 0.000000e+00 : f32
    %160 = vector.broadcast %cst_120 : f32 to vector<16x256xf32>
    %161 = arith.minimumf %157, %160 : vector<16x256xf32>
    %162 = math.exp %161 : vector<16x256xf32>
    %cst_121 = arith.constant 1.000000e+00 : f32
    %163 = vector.broadcast %cst_121 : f32 to vector<16x256xf32>
    %164 = arith.subf %162, %163 : vector<16x256xf32>
    %165 = arith.select %159, %157, %164 : vector<16x256xi1>, vector<16x256xf32>
    %c3_i32_122 = arith.constant 3 : i32
    %166 = tpu.dynamic_rotate %165 by %c3_i32_122 dim 1 : vector<16x256xf32>, i32 -> vector<16x256xf32>
    %c3_i32_123 = arith.constant 3 : i32
    %167 = vector.broadcast %c3_i32_123 : i32 to vector<16x256xi32>
    %168 = arith.cmpi sge, %126, %167 : vector<16x256xi32>
    %cst_124 = arith.constant 0.000000e+00 : f32
    %169 = vector.broadcast %cst_124 : f32 to vector<16x256xf32>
    %170 = arith.select %168, %166, %169 : vector<16x256xi1>, vector<16x256xf32>
    %171 = arith.truncf %170 : vector<16x256xf32> to vector<16x256xbf16>
    %c2_i32_125 = arith.constant 2 : i32
    %172 = tpu.dynamic_rotate %165 by %c2_i32_125 dim 1 : vector<16x256xf32>, i32 -> vector<16x256xf32>
    %c2_i32_126 = arith.constant 2 : i32
    %173 = vector.broadcast %c2_i32_126 : i32 to vector<16x256xi32>
    %174 = arith.cmpi sge, %126, %173 : vector<16x256xi32>
    %cst_127 = arith.constant 0.000000e+00 : f32
    %175 = vector.broadcast %cst_127 : f32 to vector<16x256xf32>
    %176 = arith.select %174, %172, %175 : vector<16x256xi1>, vector<16x256xf32>
    %177 = arith.truncf %176 : vector<16x256xf32> to vector<16x256xbf16>
    %c1_i32_128 = arith.constant 1 : i32
    %178 = tpu.dynamic_rotate %165 by %c1_i32_128 dim 1 : vector<16x256xf32>, i32 -> vector<16x256xf32>
    %c1_i32_129 = arith.constant 1 : i32
    %179 = vector.broadcast %c1_i32_129 : i32 to vector<16x256xi32>
    %180 = arith.cmpi sge, %126, %179 : vector<16x256xi32>
    %cst_130 = arith.constant 0.000000e+00 : f32
    %181 = vector.broadcast %cst_130 : f32 to vector<16x256xf32>
    %182 = arith.select %180, %178, %181 : vector<16x256xi1>, vector<16x256xf32>
    %183 = arith.truncf %182 : vector<16x256xf32> to vector<16x256xbf16>
    %184 = arith.truncf %165 : vector<16x256xf32> to vector<16x256xbf16>
    %185 = tpu.concatenate %171, %177, %183, %184 in 0 : vector<16x256xbf16>, vector<16x256xbf16>, vector<16x256xbf16>, vector<16x256xbf16> -> vector<64x256xbf16>
    %cst_131 = arith.constant dense<0.000000e+00> : vector<16x256xf32>
    %186 = tpu.matmul %132, %185, %cst_131 {dimension_numbers = #tpu.dot_dimension_numbers<[1], [0], [0], [1], [0, 0, 1, 1], [], []>} : vector<16x64xbf16>, vector<64x256xbf16>, vector<16x256xf32> -> vector<16x256xf32>
    %187 = vector.broadcast %129 : vector<16x1xf32> to vector<16x256xf32>
    %188 = arith.mulf %186, %187 : vector<16x256xf32>
    %189 = vector.broadcast %130 : vector<16x1xf32> to vector<16x256xf32>
    %190 = arith.addf %188, %189 : vector<16x256xf32>
    %cst_132 = arith.constant 0.000000e+00 : f32
    %191 = vector.broadcast %cst_132 : f32 to vector<16x256xf32>
    %192 = arith.cmpf ogt, %190, %191 : vector<16x256xf32>
    %cst_133 = arith.constant 0.000000e+00 : f32
    %193 = vector.broadcast %cst_133 : f32 to vector<16x256xf32>
    %194 = arith.minimumf %190, %193 : vector<16x256xf32>
    %195 = math.exp %194 : vector<16x256xf32>
    %cst_134 = arith.constant 1.000000e+00 : f32
    %196 = vector.broadcast %cst_134 : f32 to vector<16x256xf32>
    %197 = arith.subf %195, %196 : vector<16x256xf32>
    %198 = arith.select %192, %190, %197 : vector<16x256xi1>, vector<16x256xf32>
    %199 = arith.addf %198, %124 : vector<16x256xf32>
    %cst_135 = arith.constant 0.000000e+00 : f32
    %200 = vector.broadcast %cst_135 : f32 to vector<16x256xf32>
    %201 = arith.cmpf ogt, %199, %200 : vector<16x256xf32>
    %cst_136 = arith.constant 0.000000e+00 : f32
    %202 = vector.broadcast %cst_136 : f32 to vector<16x256xf32>
    %203 = arith.minimumf %199, %202 : vector<16x256xf32>
    %204 = math.exp %203 : vector<16x256xf32>
    %cst_137 = arith.constant 1.000000e+00 : f32
    %205 = vector.broadcast %cst_137 : f32 to vector<16x256xf32>
    %206 = arith.subf %204, %205 : vector<16x256xf32>
    %207 = arith.select %201, %199, %206 : vector<16x256xi1>, vector<16x256xf32>
    %c112 = arith.constant 112 : index
    %c0_138 = arith.constant 0 : index
    %208 = vector.load %arg7[%c112, %c0_138] : memref<148x2xf32, #tpu.memory_space<vmem>>, vector<16x1xf32>
    %c112_139 = arith.constant 112 : index
    %c1_140 = arith.constant 1 : index
    %209 = vector.load %arg7[%c112_139, %c1_140] : memref<148x2xf32, #tpu.memory_space<vmem>>, vector<16x1xf32>
    %c128 = arith.constant 128 : index
    %c0_141 = arith.constant 0 : index
    %210 = vector.load %arg7[%c128, %c0_141] : memref<148x2xf32, #tpu.memory_space<vmem>>, vector<16x1xf32>
    %c128_142 = arith.constant 128 : index
    %c1_143 = arith.constant 1 : index
    %211 = vector.load %arg7[%c128_142, %c1_143] : memref<148x2xf32, #tpu.memory_space<vmem>>, vector<16x1xf32>
    %c32 = arith.constant 32 : index
    %c0_144 = arith.constant 0 : index
    %212 = vector.load %arg4[%c32, %c0_144] : memref<64x64xbf16, #tpu.memory_space<vmem>>, vector<16x64xbf16>
    %c48 = arith.constant 48 : index
    %c0_145 = arith.constant 0 : index
    %213 = vector.load %arg4[%c48, %c0_145] : memref<64x64xbf16, #tpu.memory_space<vmem>>, vector<16x64xbf16>
    %c6_i32 = arith.constant 6 : i32
    %214 = tpu.dynamic_rotate %207 by %c6_i32 dim 1 : vector<16x256xf32>, i32 -> vector<16x256xf32>
    %c6_i32_146 = arith.constant 6 : i32
    %215 = vector.broadcast %c6_i32_146 : i32 to vector<16x256xi32>
    %216 = arith.cmpi sge, %126, %215 : vector<16x256xi32>
    %cst_147 = arith.constant 0.000000e+00 : f32
    %217 = vector.broadcast %cst_147 : f32 to vector<16x256xf32>
    %218 = arith.select %216, %214, %217 : vector<16x256xi1>, vector<16x256xf32>
    %219 = arith.truncf %218 : vector<16x256xf32> to vector<16x256xbf16>
    %c4_i32 = arith.constant 4 : i32
    %220 = tpu.dynamic_rotate %207 by %c4_i32 dim 1 : vector<16x256xf32>, i32 -> vector<16x256xf32>
    %c4_i32_148 = arith.constant 4 : i32
    %221 = vector.broadcast %c4_i32_148 : i32 to vector<16x256xi32>
    %222 = arith.cmpi sge, %126, %221 : vector<16x256xi32>
    %cst_149 = arith.constant 0.000000e+00 : f32
    %223 = vector.broadcast %cst_149 : f32 to vector<16x256xf32>
    %224 = arith.select %222, %220, %223 : vector<16x256xi1>, vector<16x256xf32>
    %225 = arith.truncf %224 : vector<16x256xf32> to vector<16x256xbf16>
    %c2_i32_150 = arith.constant 2 : i32
    %226 = tpu.dynamic_rotate %207 by %c2_i32_150 dim 1 : vector<16x256xf32>, i32 -> vector<16x256xf32>
    %c2_i32_151 = arith.constant 2 : i32
    %227 = vector.broadcast %c2_i32_151 : i32 to vector<16x256xi32>
    %228 = arith.cmpi sge, %126, %227 : vector<16x256xi32>
    %cst_152 = arith.constant 0.000000e+00 : f32
    %229 = vector.broadcast %cst_152 : f32 to vector<16x256xf32>
    %230 = arith.select %228, %226, %229 : vector<16x256xi1>, vector<16x256xf32>
    %231 = arith.truncf %230 : vector<16x256xf32> to vector<16x256xbf16>
    %232 = arith.truncf %207 : vector<16x256xf32> to vector<16x256xbf16>
    %233 = tpu.concatenate %219, %225, %231, %232 in 0 : vector<16x256xbf16>, vector<16x256xbf16>, vector<16x256xbf16>, vector<16x256xbf16> -> vector<64x256xbf16>
    %cst_153 = arith.constant dense<0.000000e+00> : vector<16x256xf32>
    %234 = tpu.matmul %212, %233, %cst_153 {dimension_numbers = #tpu.dot_dimension_numbers<[1], [0], [0], [1], [0, 0, 1, 1], [], []>} : vector<16x64xbf16>, vector<64x256xbf16>, vector<16x256xf32> -> vector<16x256xf32>
    %235 = vector.broadcast %208 : vector<16x1xf32> to vector<16x256xf32>
    %236 = arith.mulf %234, %235 : vector<16x256xf32>
    %237 = vector.broadcast %209 : vector<16x1xf32> to vector<16x256xf32>
    %238 = arith.addf %236, %237 : vector<16x256xf32>
    %cst_154 = arith.constant 0.000000e+00 : f32
    %239 = vector.broadcast %cst_154 : f32 to vector<16x256xf32>
    %240 = arith.cmpf ogt, %238, %239 : vector<16x256xf32>
    %cst_155 = arith.constant 0.000000e+00 : f32
    %241 = vector.broadcast %cst_155 : f32 to vector<16x256xf32>
    %242 = arith.minimumf %238, %241 : vector<16x256xf32>
    %243 = math.exp %242 : vector<16x256xf32>
    %cst_156 = arith.constant 1.000000e+00 : f32
    %244 = vector.broadcast %cst_156 : f32 to vector<16x256xf32>
    %245 = arith.subf %243, %244 : vector<16x256xf32>
    %246 = arith.select %240, %238, %245 : vector<16x256xi1>, vector<16x256xf32>
    %c6_i32_157 = arith.constant 6 : i32
    %247 = tpu.dynamic_rotate %246 by %c6_i32_157 dim 1 : vector<16x256xf32>, i32 -> vector<16x256xf32>
    %c6_i32_158 = arith.constant 6 : i32
    %248 = vector.broadcast %c6_i32_158 : i32 to vector<16x256xi32>
    %249 = arith.cmpi sge, %126, %248 : vector<16x256xi32>
    %cst_159 = arith.constant 0.000000e+00 : f32
    %250 = vector.broadcast %cst_159 : f32 to vector<16x256xf32>
    %251 = arith.select %249, %247, %250 : vector<16x256xi1>, vector<16x256xf32>
    %252 = arith.truncf %251 : vector<16x256xf32> to vector<16x256xbf16>
    %c4_i32_160 = arith.constant 4 : i32
    %253 = tpu.dynamic_rotate %246 by %c4_i32_160 dim 1 : vector<16x256xf32>, i32 -> vector<16x256xf32>
    %c4_i32_161 = arith.constant 4 : i32
    %254 = vector.broadcast %c4_i32_161 : i32 to vector<16x256xi32>
    %255 = arith.cmpi sge, %126, %254 : vector<16x256xi32>
    %cst_162 = arith.constant 0.000000e+00 : f32
    %256 = vector.broadcast %cst_162 : f32 to vector<16x256xf32>
    %257 = arith.select %255, %253, %256 : vector<16x256xi1>, vector<16x256xf32>
    %258 = arith.truncf %257 : vector<16x256xf32> to vector<16x256xbf16>
    %c2_i32_163 = arith.constant 2 : i32
    %259 = tpu.dynamic_rotate %246 by %c2_i32_163 dim 1 : vector<16x256xf32>, i32 -> vector<16x256xf32>
    %c2_i32_164 = arith.constant 2 : i32
    %260 = vector.broadcast %c2_i32_164 : i32 to vector<16x256xi32>
    %261 = arith.cmpi sge, %126, %260 : vector<16x256xi32>
    %cst_165 = arith.constant 0.000000e+00 : f32
    %262 = vector.broadcast %cst_165 : f32 to vector<16x256xf32>
    %263 = arith.select %261, %259, %262 : vector<16x256xi1>, vector<16x256xf32>
    %264 = arith.truncf %263 : vector<16x256xf32> to vector<16x256xbf16>
    %265 = arith.truncf %246 : vector<16x256xf32> to vector<16x256xbf16>
    %266 = tpu.concatenate %252, %258, %264, %265 in 0 : vector<16x256xbf16>, vector<16x256xbf16>, vector<16x256xbf16>, vector<16x256xbf16> -> vector<64x256xbf16>
    %cst_166 = arith.constant dense<0.000000e+00> : vector<16x256xf32>
    %267 = tpu.matmul %213, %266, %cst_166 {dimension_numbers = #tpu.dot_dimension_numbers<[1], [0], [0], [1], [0, 0, 1, 1], [], []>} : vector<16x64xbf16>, vector<64x256xbf16>, vector<16x256xf32> -> vector<16x256xf32>
    %268 = vector.broadcast %210 : vector<16x1xf32> to vector<16x256xf32>
    %269 = arith.mulf %267, %268 : vector<16x256xf32>
    %270 = vector.broadcast %211 : vector<16x1xf32> to vector<16x256xf32>
    %271 = arith.addf %269, %270 : vector<16x256xf32>
    %cst_167 = arith.constant 0.000000e+00 : f32
    %272 = vector.broadcast %cst_167 : f32 to vector<16x256xf32>
    %273 = arith.cmpf ogt, %271, %272 : vector<16x256xf32>
    %cst_168 = arith.constant 0.000000e+00 : f32
    %274 = vector.broadcast %cst_168 : f32 to vector<16x256xf32>
    %275 = arith.minimumf %271, %274 : vector<16x256xf32>
    %276 = math.exp %275 : vector<16x256xf32>
    %cst_169 = arith.constant 1.000000e+00 : f32
    %277 = vector.broadcast %cst_169 : f32 to vector<16x256xf32>
    %278 = arith.subf %276, %277 : vector<16x256xf32>
    %279 = arith.select %273, %271, %278 : vector<16x256xi1>, vector<16x256xf32>
    %280 = arith.addf %279, %207 : vector<16x256xf32>
    %cst_170 = arith.constant 0.000000e+00 : f32
    %281 = vector.broadcast %cst_170 : f32 to vector<16x256xf32>
    %282 = arith.cmpf ogt, %280, %281 : vector<16x256xf32>
    %cst_171 = arith.constant 0.000000e+00 : f32
    %283 = vector.broadcast %cst_171 : f32 to vector<16x256xf32>
    %284 = arith.minimumf %280, %283 : vector<16x256xf32>
    %285 = math.exp %284 : vector<16x256xf32>
    %cst_172 = arith.constant 1.000000e+00 : f32
    %286 = vector.broadcast %cst_172 : f32 to vector<16x256xf32>
    %287 = arith.subf %285, %286 : vector<16x256xf32>
    %288 = arith.select %282, %280, %287 : vector<16x256xi1>, vector<16x256xf32>
    %289 = arith.truncf %288 : vector<16x256xf32> to vector<16x256xbf16>
    %c0_173 = arith.constant 0 : index
    %c0_174 = arith.constant 0 : index
    %290 = vector.load %arg8[%c0_173, %c0_174] : memref<256x32xbf16, #tpu.memory_space<vmem>>, vector<256x32xbf16>
    %cst_175 = arith.constant dense<0.000000e+00> : vector<16x32xf32>
    %291 = tpu.matmul %289, %290, %cst_175 {dimension_numbers = #tpu.dot_dimension_numbers<[1], [0], [0], [1], [0, 0, 1, 1], [], []>} : vector<16x256xbf16>, vector<256x32xbf16>, vector<16x32xf32> -> vector<16x32xf32>
    %c144 = arith.constant 144 : index
    %c0_176 = arith.constant 0 : index
    %292 = vector.load %arg7[%c144, %c0_176] : memref<148x2xf32, #tpu.memory_space<vmem>>, vector<4x1xf32>
    %293 = vector.extract_strided_slice %291 {offsets = [0, 0], sizes = [16, 16], strides = [1, 1]} : vector<16x32xf32> to vector<16x16xf32>
    %c0_177 = arith.constant 0 : index
    %c0_178 = arith.constant 0 : index
    %c0_179 = arith.constant 0 : index
    %294 = vector.load %arg6[%c0_177, %c0_178, %c0_179] : memref<4x16x16xf32, #tpu.memory_space<vmem>>, vector<4x16x16xf32>
    %295 = vector.shape_cast %293 : vector<16x16xf32> to vector<1x16x16xf32>
    %296 = vector.broadcast %295 : vector<1x16x16xf32> to vector<4x16x16xf32>
    %297 = arith.mulf %294, %296 : vector<4x16x16xf32>
    %cst_180 = arith.constant dense<0.000000e+00> : vector<4x16xf32>
    %298 = vector.multi_reduction <add>, %297, %cst_180 [2] : vector<4x16x16xf32> to vector<4x16xf32>
    %cst_181 = arith.constant dense<0.000000e+00> : vector<4xf32>
    %299 = vector.multi_reduction <add>, %298, %cst_181 [1] : vector<4x16xf32> to vector<4xf32>
    %300 = vector.shape_cast %299 : vector<4xf32> to vector<4x1xf32>
    %301 = vector.extract_strided_slice %291 {offsets = [0, 16], sizes = [16, 16], strides = [1, 1]} : vector<16x32xf32> to vector<16x16xf32>
    %c0_182 = arith.constant 0 : index
    %c0_183 = arith.constant 0 : index
    %c0_184 = arith.constant 0 : index
    %302 = vector.load %arg6[%c0_182, %c0_183, %c0_184] : memref<4x16x16xf32, #tpu.memory_space<vmem>>, vector<4x16x16xf32>
    %303 = vector.shape_cast %301 : vector<16x16xf32> to vector<1x16x16xf32>
    %304 = vector.broadcast %303 : vector<1x16x16xf32> to vector<4x16x16xf32>
    %305 = arith.mulf %302, %304 : vector<4x16x16xf32>
    %cst_185 = arith.constant dense<0.000000e+00> : vector<4x16xf32>
    %306 = vector.multi_reduction <add>, %305, %cst_185 [2] : vector<4x16x16xf32> to vector<4x16xf32>
    %cst_186 = arith.constant dense<0.000000e+00> : vector<4xf32>
    %307 = vector.multi_reduction <add>, %306, %cst_186 [1] : vector<4x16xf32> to vector<4xf32>
    %308 = vector.shape_cast %307 : vector<4xf32> to vector<4x1xf32>
    %309 = tpu.concatenate %300, %308 in 1 : vector<4x1xf32>, vector<4x1xf32> -> vector<4x2xf32>
    %310 = vector.broadcast %292 : vector<4x1xf32> to vector<4x2xf32>
    %311 = arith.addf %309, %310 : vector<4x2xf32>
    %c0_187 = arith.constant 0 : index
    %c0_188 = arith.constant 0 : index
    %c0_189 = arith.constant 0 : index
    %312 = vector.load %arg9[%c0_187, %c0_188, %c0_189] : memref<1x4x2xf32, #tpu.memory_space<vmem>>, vector<1x4x2xf32>
    %313 = vector.shape_cast %312 : vector<1x4x2xf32> to vector<4x2xf32>
    %314 = vector.shape_cast %311 : vector<4x2xf32> to vector<1x4x2xf32>
    tpu.vector_store %arg9[%c0_187, %c0_188, %c0_189], %314 {strides = array<i32>} : memref<1x4x2xf32, #tpu.memory_space<vmem>>, vector<1x4x2xf32>,
    return
  }
  func.func @transform_0(%arg0: i32) -> (i32, i32, i32) {
    %c0_i32 = arith.constant 0 : i32
    %c0_i32_0 = arith.constant 0 : i32
    %c0_i32_1 = arith.constant 0 : i32
    return %arg0, %c0_i32, %c0_i32_0 : i32, i32, i32
  }
  func.func @transform_1(%arg0: i32) -> (i32, i32) {
    %c0_i32 = arith.constant 0 : i32
    %c0_i32_0 = arith.constant 0 : i32
    %c0_i32_1 = arith.constant 0 : i32
    return %c0_i32, %c0_i32_0 : i32, i32
  }
  func.func @transform_2(%arg0: i32) -> (i32, i32) {
    %c0_i32 = arith.constant 0 : i32
    %c0_i32_0 = arith.constant 0 : i32
    %c0_i32_1 = arith.constant 0 : i32
    return %c0_i32, %c0_i32_0 : i32, i32
  }
  func.func @transform_3(%arg0: i32) -> (i32, i32) {
    %c0_i32 = arith.constant 0 : i32
    %c0_i32_0 = arith.constant 0 : i32
    %c0_i32_1 = arith.constant 0 : i32
    return %c0_i32, %c0_i32_0 : i32, i32
  }
  func.func @transform_4(%arg0: i32) -> (i32, i32) {
    %c0_i32 = arith.constant 0 : i32
    %c0_i32_0 = arith.constant 0 : i32
    %c0_i32_1 = arith.constant 0 : i32
    return %c0_i32, %c0_i32_0 : i32, i32
  }
  func.func @transform_5(%arg0: i32) -> (i32, i32, i32) {
    %c0_i32 = arith.constant 0 : i32
    %c0_i32_0 = arith.constant 0 : i32
    %c0_i32_1 = arith.constant 0 : i32
    %c0_i32_2 = arith.constant 0 : i32
    return %c0_i32, %c0_i32_0, %c0_i32_1 : i32, i32, i32
  }
  func.func @transform_6(%arg0: i32) -> (i32, i32) {
    %c0_i32 = arith.constant 0 : i32
    %c0_i32_0 = arith.constant 0 : i32
    %c0_i32_1 = arith.constant 0 : i32
    return %c0_i32, %c0_i32_0 : i32, i32
  }
  func.func @transform_7(%arg0: i32) -> (i32, i32) {
    %c0_i32 = arith.constant 0 : i32
    %c0_i32_0 = arith.constant 0 : i32
    %c0_i32_1 = arith.constant 0 : i32
    return %c0_i32, %c0_i32_0 : i32, i32
  }
  func.func @transform_8(%arg0: i32) -> (i32, i32, i32) {
    %c0_i32 = arith.constant 0 : i32
    %c0_i32_0 = arith.constant 0 : i32
    %c0_i32_1 = arith.constant 0 : i32
    return %arg0, %c0_i32, %c0_i32_0 : i32, i32, i32
  }
}

</mosaic_0001>

<bundles_post_ra>
// kernel: tpu_custom_call.1
= control target key start
LH: loop header
LB: loop body
LE: loop exit
PB: predicated region body
PF: predicated region fallthrough
CT: control target
= control target key end

     0   :  { %s2482_s9 = smov 122   ;;  %s2483_s10 = smov 121   ;;  %vm143_vm0 = vcmask 932864   ;;  %vm94_vm1 = vcmask 990208   ;;  %vm87_vm2 = vcmask 998400   ;;  %vm80_vm3 = vcmask 1006592   ;;  %s3443_s0 = inlined_call_operand.vmem [shape: bf16[2,16,256], index: 0, kind: input, shape index: {}]   ;;  %s3444_s6 = inlined_call_operand.vmem [shape: f32[148,2], index: 6, kind: input, shape index: {}]   ;;  %s3445_s1 = inlined_call_operand.vmem [shape: bf16[64,240], index: 1, kind: input, shape index: {}]   ;;  %s3446_s2 = inlined_call_operand.vmem [shape: bf16[16,64], index: 2, kind: input, shape index: {}]   ;;  %s3447_s4 = inlined_call_operand.vmem [shape: f32[16,16], index: 4, kind: input, shape index: {}]   ;;  %s3448_s3 = inlined_call_operand.vmem [shape: bf16[64,64], index: 3, kind: input, shape index: {}]   ;;  %s3449_s7 = inlined_call_operand.vmem [shape: bf16[256,32], index: 7, kind: input, shape index: {}]   ;;  %s3450_s5 = inlined_call_operand.vmem [shape: f32[4,16,16], index: 5, kind: input, shape index: {}]   ;;  %s3451_s8 = inlined_call_operand.vmem [shape: f32[1,4,2], index: 8, kind: output, shape index: {}]  }
   0x1   :  { %v1973_v0 = vld [vmem:[%s3443_s0] sm:$0xf]  ;;  %v2177_v1 = vld [vmem:[%s3443_s0 + $0x4] sm:$0xf0]  ;;  %v2176_v3 = vld [vmem:[%s3443_s0 + $0x4] sm:$0xf] }
   0x2   :  { %v2556_v2 = vor.u32 %v2177_v1, %v1973_v0  ;;  %v1975_v4 = vld [vmem:[%s3443_s0 + $0x8] sm:$0xf0]  ;;  %s2484_s15 = smov 114   ;;  %s2485_s16 = smov 123   ;;  %v1989_v6 = vld [vmem:[%s3443_s0 + $0x10] sm:$0xf] }
   0x3   :  { %v2568_v5 = vor.u32 %v2176_v3, %v1975_v4  ;;  %v2180_v7 = vld [vmem:[%s3443_s0 + $0x14] sm:$0xf0]  ;;  %s2486_s21 = smov 115   ;;  %v2179_v8 = vld [vmem:[%s3443_s0 + $0x14] sm:$0xf]  ;;  %s2487_s26 = smov 124  }
   0x4   :  { %83 = vrot.lane.b32.xlu1 %v2556_v2, %s2482_s9  ;;  %90 = vrot.lane.b32.xlu0 %v2556_v2, %s2483_s10  ;;  %v1991_v9 = vld [vmem:[%s3443_s0 + $0x18] sm:$0xf0]  ;;  %v2592_v10 = vor.u32 %v2180_v7, %v1989_v6  ;;  %s2488_s27 = smov 116   ;;  %s2489_s28 = smov 125   ;;  %vm136_vm4 = vcmask 941056   ;;  %vm73_vm5 = vcmask 1014784  }
   0x5   :  { %139 = vrot.lane.b32.xlu2 %v2556_v2, %s2484_s15  ;;  %v2594_v11 = vor.u32 %v2179_v8, %v1991_v9  ;;  %s2490_s29 = smov 117   ;;  %s2491_s30 = smov 126   ;;  %vm129_vm6 = vcmask 949248   ;;  %vm66_vm7 = vcmask 1022976   ;;  %vm122_vm8 = vcmask 957440   ;;  %v255_v54 = vld [vmem:[%s3444_s6 + $0x30] sm:$0xff] }
   0x6   :  { %s2494_s11 = smov 119   ;;  %s2495_s12 = smov 120   ;;  %v2496_v55 = vmov 1   ;;  %vm59_vm9 = vcmask 1031168   ;;  %v2497_v61 = vmov 0   ;;  %vm115_vm10 = vcmask 965632  }
   0x7   :  { %2235 = vset.pattern.permute.xlu1 %v2496_v55  ;;  %2234 = vset.pattern.permute.xlu0 %v2497_v61  ;;  %v253_v0 = vld [vmem:[%s3444_s6 + $0x20] sm:$0xff]  ;;  %v254_v6 = vld [vmem:[%s3444_s6 + $0x28] sm:$0xff]  ;;  %vm52_vm11 = vcmask 1039360   ;;  %vm108_vm12 = vcmask 973824   ;;  %vm101_vm13 = vcmask 982016   ;;  %vm301_vm14 = vcmask 916480  }
   0x8   :  { %2233 = vset.pattern.permute.xlu2 %v2497_v61  ;;  %s2502_s23 = smov 4   ;;  %s2503_s24 = smov 6  }
   0x9   :  { %s2504_s18 = smov 112  }
   0xc   :  { %85 = vrot.lane.b32.xlu1 %v2568_v5, %s2482_s9  ;;  %92 = vrot.lane.b32.xlu0 %v2568_v5, %s2483_s10 }
   0xd   :  { %141 = vrot.lane.b32.xlu2 %v2568_v5, %s2484_s15 }
  0x14   :  { %78 = vrot.lane.b32.xlu1 %v2568_v5, %s2485_s16  ;;  %76 = vrot.lane.b32.xlu0 %v2556_v2, %s2485_s16 }
  0x15   :  { %132 = vrot.lane.b32.xlu2 %v2556_v2, %s2486_s21 }
  0x1c   :  { %201 = vrot.lane.b32.xlu1 %v2592_v10, %s2483_s10  ;;  %134 = vrot.lane.b32.xlu0 %v2568_v5, %s2486_s21 }
  0x1d   :  { %203 = vrot.lane.b32.xlu2 %v2594_v11, %s2483_s10  ;;  %s2493_s10 = smov 127  }
  0x24   :  { %71 = vrot.lane.b32.xlu1 %v2568_v5, %s2487_s26  ;;  %69 = vrot.lane.b32.xlu0 %v2556_v2, %s2487_s26 }
  0x25   :  { %125 = vrot.lane.b32.xlu2 %v2556_v2, %s2488_s27 }
  0x2c   :  { %195 = vrot.lane.b32.xlu1 %v2592_v10, %s2482_s9  ;;  %127 = vrot.lane.b32.xlu0 %v2568_v5, %s2488_s27 }
  0x2d   :  { %197 = vrot.lane.b32.xlu2 %v2594_v11, %s2482_s9  ;;  %s2492_s9 = smov 118  }
  0x34   :  { %245 = vrot.lane.b32.xlu1 %v2594_v11, %s2484_s15  ;;  %243 = vrot.lane.b32.xlu0 %v2592_v10, %s2484_s15 }
  0x35   :  { %62 = vrot.lane.b32.xlu2 %v2556_v2, %s2489_s28 }
  0x3c   :  { %118 = vrot.lane.b32.xlu1 %v2556_v2, %s2490_s29  ;;  %64 = vrot.lane.b32.xlu0 %v2568_v5, %s2489_s28 }
  0x3d   :  { %120 = vrot.lane.b32.xlu2 %v2568_v5, %s2490_s29 }
  0x44   :  { %191 = vrot.lane.b32.xlu1 %v2594_v11, %s2485_s16  ;;  %189 = vrot.lane.b32.xlu0 %v2592_v10, %s2485_s16 }
  0x45   :  { %237 = vrot.lane.b32.xlu2 %v2592_v10, %s2486_s21 }
  0x4c   :  { %55 = vrot.lane.b32.xlu1 %v2556_v2, %s2491_s30  ;;  %239 = vrot.lane.b32.xlu0 %v2594_v11, %s2486_s21 }
  0x4d   :  { %57 = vrot.lane.b32.xlu2 %v2568_v5, %s2491_s30 }
  0x54   :  { %113 = vrot.lane.b32.xlu1 %v2568_v5, %s2492_s9  ;;  %111 = vrot.lane.b32.xlu0 %v2556_v2, %s2492_s9 }
  0x55   :  { %183 = vrot.lane.b32.xlu2 %v2592_v10, %s2487_s26 }
  0x5c   :  { %231 = vrot.lane.b32.xlu1 %v2592_v10, %s2488_s27  ;;  %185 = vrot.lane.b32.xlu0 %v2594_v11, %s2487_s26 }
  0x5d   :  { %233 = vrot.lane.b32.xlu2 %v2594_v11, %s2488_s27 }
  0x5f   :  { %v140_v12 = vpop.permute.xlu2 %139 }
  0x64   :  { %50 = vrot.lane.b32.xlu1 %v2568_v5, %s2493_s10  ;;  %48 = vrot.lane.b32.xlu0 %v2556_v2, %s2493_s10 }
  0x65   :  { %104 = vrot.lane.b32.xlu2 %v2556_v2, %s2494_s11 }
  0x67   :  { %v142_v13 = vpop.permute.xlu2 %141 }
  0x68   :  { %v144_v14 = vsel %vm143_vm0, %v140_v12, %v142_v13 }
  0x69   :  { %344 = vmatpush.bf16.msra.mxu1 %v144_v14 }
  0x6c   :  { %177 = vrot.lane.b32.xlu1 %v2592_v10, %s2489_s28  ;;  %106 = vrot.lane.b32.xlu0 %v2568_v5, %s2494_s11 }
  0x6d   :  { %179 = vrot.lane.b32.xlu2 %v2594_v11, %s2489_s28 }
  0x6f   :  { %v133_v15 = vpop.permute.xlu2 %132 }
  0x74   :  { %227 = vrot.lane.b32.xlu1 %v2594_v11, %s2490_s29  ;;  %225 = vrot.lane.b32.xlu0 %v2592_v10, %s2490_s29 }
  0x75   :  { %97 = vrot.lane.b32.xlu2 %v2556_v2, %s2495_s12  ;;  %v256_v2 = vld [vmem:[%s3444_s6 + $0x38] sm:$0xff] }
  0x76   :  { %v84_v16 = vpop.permute.xlu1 %83  ;;  %v91_v17 = vpop.permute.xlu0 %90 }
  0x77   :  { %v204_v18 = vpop.permute.xlu2 %203 }
  0x7c   :  { %171 = vrot.lane.b32.xlu1 %v2592_v10, %s2491_s30  ;;  %99 = vrot.lane.b32.xlu0 %v2568_v5, %s2495_s12 }
  0x7d   :  { %173 = vrot.lane.b32.xlu2 %v2594_v11, %s2491_s30 }
  0x7e   :  { %v86_v19 = vpop.permute.xlu1 %85  ;;  %v93_v20 = vpop.permute.xlu0 %92 }
  0x7f   :  { %v95_v21 = vsel %vm94_vm1, %v91_v17, %v93_v20  ;;  %v126_v22 = vpop.permute.xlu2 %125  ;;  %v88_v23 = vsel %vm87_vm2, %v84_v16, %v86_v19  ;;  %v1997_v16 = vld [vmem:[%s3445_s1] sm:$0xf]  ;;  %v2182_v17 = vld [vmem:[%s3445_s1 + $0x4] sm:$0xf0] }
  0x80   :  { %314 = vmatpush.bf16.msra.mxu0 %v95_v21  ;;  %v2733_v19 = vor.u32 %v2182_v17, %v1997_v16 }
  0x84   :  { %221 = vrot.lane.b32.xlu1 %v2594_v11, %s2492_s9  ;;  %219 = vrot.lane.b32.xlu0 %v2592_v10, %s2492_s9 }
  0x85   :  { %315 = vmatpush.bf16.msra.mxu0 %v88_v23  ;;  %165 = vrot.lane.b32.xlu2 %v2592_v10, %s2493_s10 }
  0x86   :  { %v79_v24 = vpop.permute.xlu1 %78  ;;  %v77_v25 = vpop.permute.xlu0 %76 }
  0x87   :  { %v81_v26 = vsel %vm80_vm3, %v77_v25, %v79_v24  ;;  %v198_v27 = vpop.permute.xlu2 %197  ;;  %v249_v25 = vld [vmem:[%s3444_s6] sm:$0xff] }
  0x89   :  { %316 = vmatpush.bf16.msra.mxu0 %v81_v26 }
  0x8c   :  { %213 = vrot.lane.b32.xlu1 %v2592_v10, %s2494_s11  ;;  %167 = vrot.lane.b32.xlu0 %v2594_v11, %s2493_s10  ;;  %s2500_s10 = smov 2  }
  0x8d   :  { %215 = vrot.lane.b32.xlu2 %v2594_v11, %s2494_s11  ;;  %s2501_s11 = smov 3  }
  0x8e   :  { %v202_v28 = vpop.permute.xlu1 %201  ;;  %v135_v29 = vpop.permute.xlu0 %134 }
  0x8f   :  { %v137_v30 = vsel %vm136_vm4, %v133_v15, %v135_v29  ;;  %v205_v31 = vsel %vm94_vm1, %v202_v28, %v204_v18  ;;  %v63_v32 = vpop.permute.xlu2 %62  ;;  %v252_v18 = vld [vmem:[%s3444_s6 + $0x18] sm:$0xff] }
  0x90   :  { %345 = vmatpush.bf16.msra.mxu1 %v137_v30  ;;  %372 = vmatpush.bf16.msra.mxu2 %v205_v31  ;;  %v2005_v30 = vld [vmem:[%s3445_s1 + $0x10] sm:$0xf]  ;;  %v2184_v31 = vld [vmem:[%s3445_s1 + $0x14] sm:$0xf0] }
  0x94   :  { %209 = vrot.lane.b32.xlu1 %v2594_v11, %s2495_s12  ;;  %207 = vrot.lane.b32.xlu0 %v2592_v10, %s2495_s12  ;;  %v1969_v10 = vld [vmem:[%s3443_s0] sm:$0xf]  ;;  %v2175_v11 = vld [vmem:[%s3443_s0 + $0x4] sm:$0xf0] }
  0x95   :  { %462 = vperm.xlu2 %2233, %v255_v54   ;;  %v1970_v15 = vor.u32 %v2175_v11, %v1969_v10 }
  0x96   :  { %v72_v33 = vpop.permute.xlu1 %71  ;;  %v70_v34 = vpop.permute.xlu0 %69 }
  0x97   :  { %v74_v35 = vsel %vm73_vm5, %v70_v34, %v72_v33  ;;  %v121_v36 = vpop.permute.xlu2 %120  ;;  %v2006_v33 = vor.u32 %v2184_v31, %v2005_v30  ;;  %v251_v34 = vld [vmem:[%s3444_s6 + $0x10] sm:$0xff] }
  0x98   :  { %317 = vmatpush.bf16.msra.mxu0 %v74_v35  ;;  %v2181_v35 = vld [vmem:[%s3445_s1 + $0x4] sm:$0xf] }
  0x9c   :  { %511 = vperm.xlu1 %2235, %v255_v54   ;;  %467 = vperm.xlu0 %2234, %v256_v2  }
  0x9d   :  { %2236 = vset.pattern.permute.xlu2 %v2496_v55 }
  0x9e   :  { %v196_v37 = vpop.permute.xlu1 %195  ;;  %v128_v38 = vpop.permute.xlu0 %127  ;;  %515 = vperm.xlu2 %2236, %v256_v2   ;;  %v2188_v2 = vld [vmem:[%s3445_s1 + $0x34] sm:$0xf0] }
  0x9f   :  { %v130_v39 = vsel %vm129_vm6, %v126_v22, %v128_v38  ;;  %v199_v40 = vsel %vm87_vm2, %v196_v37, %v198_v27  ;;  %v238_v41 = vpop.permute.xlu2 %237 }
  0xa0   :  { %346 = vmatpush.bf16.msra.mxu1 %v130_v39  ;;  %373 = vmatpush.bf16.msra.mxu2 %v199_v40 }
  0xa4   :  { %2237 = vset.pattern.permute.xlu1 %v2497_v61  ;;  %2239 = vset.pattern.permute.xlu0 %v2496_v55 }
  0xa5   :  { %452 = vperm.xlu1 %2237, %v253_v0   ;;  %503 = vperm.xlu0 %2239, %v253_v0  }
  0xa6   :  { %v246_v42 = vpop.permute.xlu1 %245  ;;  %v244_v43 = vpop.permute.xlu0 %243  ;;  %2238 = vset.pattern.permute.xlu2 %v2497_v61 }
  0xa7   :  { %v247_v44 = vsel %vm143_vm0, %v244_v43, %v246_v42  ;;  %v58_v45 = vpop.permute.xlu2 %57  ;;  %457 = vperm.xlu2 %2238, %v254_v6  }
  0xa8   :  { %402 = vmatpush.bf16.msra.mxu3 %v247_v44 }
  0xad   :  { %2240 = vset.pattern.permute.xlu1 %v2496_v55  ;;  %499 = vperm.xlu0 %2239, %v252_v18  }
  0xae   :  { %v119_v46 = vpop.permute.xlu1 %118  ;;  %v65_v47 = vpop.permute.xlu0 %64  ;;  %507 = vperm.xlu1 %2240, %v254_v6  }
  0xaf   :  { %v67_v48 = vsel %vm66_vm7, %v63_v32, %v65_v47  ;;  %v123_v49 = vsel %vm122_vm8, %v119_v46, %v121_v36  ;;  %v184_v50 = vpop.permute.xlu2 %183  ;;  %v250_v32 = vld [vmem:[%s3444_s6 + $0x8] sm:$0xff]  ;;  %442 = vperm.xlu2 %2238, %v251_v34   ;;  %v2013_v46 = vld [vmem:[%s3445_s1 + $0x20] sm:$0xf] }
  0xb0   :  { %318 = vmatpush.bf16.msra.mxu0 %v67_v48  ;;  %347 = vmatpush.bf16.msra.mxu1 %v123_v49  ;;  %v1999_v36 = vld [vmem:[%s3445_s1 + $0x8] sm:$0xf0]  ;;  %v2186_v47 = vld [vmem:[%s3445_s1 + $0x24] sm:$0xf0] }
  0xb1   :  { %v2014_v48 = vor.u32 %v2186_v47, %v2013_v46 }
  0xb5   :  { %487 = vperm.xlu0 %2239, %v249_v25  }
  0xb6   :  { %v192_v51 = vpop.permute.xlu1 %191  ;;  %v190_v52 = vpop.permute.xlu0 %189  ;;  %2241 = vset.pattern.permute.xlu1 %v2497_v61 }
  0xb7   :  { %v193_v53 = vsel %vm80_vm3, %v190_v52, %v192_v51  ;;  %v234_v60 = vpop.permute.xlu2 %233  ;;  %447 = vperm.xlu1 %2241, %v252_v18   ;;  %2242 = vset.pattern.permute.xlu2 %v2496_v55  ;;  %v2007_v51 = vld [vmem:[%s3445_s1 + $0x18] sm:$0xf0]  ;;  %v1985_v52 = vld [vmem:[%s3443_s0 + $0x10] sm:$0xf] }
  0xb8   :  { %374 = vmatpush.bf16.msra.mxu2 %v193_v53  ;;  %495 = vperm.xlu2 %2242, %v251_v34   ;;  %v2178_v53 = vld [vmem:[%s3443_s0 + $0x14] sm:$0xf0] }
  0xbd   :  { %2245 = vset.pattern.permute.xlu0 %v2497_v61 }
  0xbe   :  { %v56_v56 = vpop.permute.xlu1 %55  ;;  %v240_v57 = vpop.permute.xlu0 %239 }
  0xbf   :  { %v60_v58 = vsel %vm59_vm9, %v56_v56, %v58_v45  ;;  %v241_v59 = vsel %vm136_vm4, %v238_v41, %v240_v57  ;;  %v105_v3 = vpop.permute.xlu2 %104  ;;  %432 = vperm.xlu1 %2241, %v249_v25   ;;  %v2002_v41 = vor.u32 %v2181_v35, %v1999_v36 }
  0xc0   :  { %319 = vmatpush.bf16.msra.mxu0 %v60_v58  ;;  %403 = vmatpush.bf16.msra.mxu3 %v241_v59 }
  0xc1   :  { %2243 = vset.pattern.permute.xlu2 %v2497_v61 }
  0xc2   :  { %437 = vperm.xlu2 %2243, %v250_v32  }
  0xc6   :  { %v114_v62 = vpop.permute.xlu1 %113  ;;  %v112_v63 = vpop.permute.xlu0 %111 }
  0xc7   :  { %v116_v1 = vsel %vm115_vm10, %v112_v63, %v114_v62  ;;  %v180_v9 = vpop.permute.xlu2 %179  ;;  %2244 = vset.pattern.permute.xlu1 %v2496_v55 }
  0xc8   :  { %348 = vmatpush.bf16.msra.mxu1 %v116_v1  ;;  %491 = vperm.xlu1 %2244, %v250_v32   ;;  %v2021_v1 = vld [vmem:[%s3445_s1 + $0x30] sm:$0xf] }
  0xce   :  { %v232_v4 = vpop.permute.xlu1 %231  ;;  %v186_v5 = vpop.permute.xlu0 %185 }
  0xcf   :  { %v187_v7 = vsel %vm73_vm5, %v184_v50, %v186_v5  ;;  %v235_v8 = vsel %vm129_vm6, %v232_v4, %v234_v60  ;;  %v98_v20 = vpop.permute.xlu2 %97  ;;  %v2183_v50 = vld [vmem:[%s3445_s1 + $0x14] sm:$0xf]  ;;  %v1986_v60 = vor.u32 %v2178_v53, %v1985_v52  ;;  %v2185_v4 = vld [vmem:[%s3445_s1 + $0x24] sm:$0xf]  ;;  %v2015_v5 = vld [vmem:[%s3445_s1 + $0x28] sm:$0xf0] }
  0xd0   :  { %375 = vmatpush.bf16.msra.mxu2 %v187_v7  ;;  %404 = vmatpush.bf16.msra.mxu3 %v235_v8  ;;  %v2010_v59 = vor.u32 %v2183_v50, %v2007_v51  ;;  %v2018_v6 = vor.u32 %v2185_v4, %v2015_v5  ;;  %v631_v7 = vld [vmem:[%s3444_s6 + $0x48] sm:$0xff]  ;;  %v2187_v8 = vld [vmem:[%s3445_s1 + $0x34] sm:$0xf] }
  0xd1   :  { %698 = vperm.xlu1 %2244, %v631_v7   ;;  %686 = vperm.xlu2 %2243, %v631_v7  }
  0xd6   :  { %v51_v12 = vpop.permute.xlu1 %50  ;;  %v49_v13 = vpop.permute.xlu0 %48 }
  0xd7   :  { %v53_v14 = vsel %vm52_vm11, %v49_v13, %v51_v12  ;;  %v174_v29 = vpop.permute.xlu2 %173 }
  0xd8   :  { %320 = vmatpush.bf16.msra.mxu0 %v53_v14 }
  0xd9   :  { %2246 = vset.pattern.permute.xlu2 %v2496_v55  ;;  %2247 = vset.pattern.permute.xlu1 %v2497_v61 }
  0xdc   :  { %321 = vmatpush.bf16.msra.mxu0 %v1970_v15 }
  0xde   :  { %v178_v21 = vpop.permute.xlu1 %177  ;;  %v107_v22 = vpop.permute.xlu0 %106 }
  0xdf   :  { %v109_v23 = vsel %vm108_vm12, %v105_v3, %v107_v22  ;;  %v181_v24 = vsel %vm66_vm7, %v178_v21, %v180_v9  ;;  %322 = vmatmul.bf16.vlgmr.msra.gmra.mxu0 %v2733_v19  ;;  %v166_v42 = vpop.permute.xlu2 %165  ;;  %v2022_v3 = vor.u32 %v2188_v2, %v2021_v1  ;;  %v2023_v9 = vld [vmem:[%s3445_s1 + $0x38] sm:$0xf0]  ;;  %vm647_vm7 = vcmask 523264  }
  0xe0   :  { %349 = vmatpush.bf16.msra.mxu1 %v109_v23  ;;  %376 = vmatpush.bf16.msra.mxu2 %v181_v24  ;;  %v2026_v10 = vor.u32 %v2187_v8, %v2023_v9 }
  0xe6   :  { %v228_v26 = vpop.permute.xlu1 %227  ;;  %v226_v27 = vpop.permute.xlu0 %225 }
  0xe7   :  { %v229_v28 = vsel %vm122_vm8, %v226_v27, %v228_v26  ;;  %v216_v49 = vpop.permute.xlu2 %215 }
  0xe8   :  { %405 = vmatpush.bf16.msra.mxu3 %v229_v28 }
  0xee   :  { %v172_v37 = vpop.permute.xlu1 %171  ;;  %v100_v38 = vpop.permute.xlu0 %99 }
  0xef   :  { %v102_v39 = vsel %vm101_vm13, %v98_v20, %v100_v38  ;;  %v175_v40 = vsel %vm59_vm9, %v172_v37, %v174_v29  ;;  %327 = vmatmul.bf16.gmra.mxu0 %v2006_v33  ;;  %v2820_v14 = vpop.permute.xlu2 %462 }
  0xf0   :  { %350 = vmatpush.bf16.msra.mxu1 %v102_v39  ;;  %377 = vmatpush.bf16.msra.mxu2 %v175_v40 }
  0xf3   :  { %2027 = vmatmul.msk.bf16.vlgmr.msra.gmra.mxu1 %vm301_vm14, %v2002_v41 }
  0xf6   :  { %v222_v43 = vpop.permute.xlu1 %221  ;;  %v220_v44 = vpop.permute.xlu0 %219 }
  0xf7   :  { %v223_v45 = vsel %vm115_vm10, %v220_v44, %v222_v43 }
  0xf8   :  { %406 = vmatpush.bf16.msra.mxu3 %v223_v45 }
  0xfe   :  { %v214_v54 = vpop.permute.xlu1 %213  ;;  %v168_v56 = vpop.permute.xlu0 %167 }
  0xff   :  { %v169_v57 = vsel %vm52_vm11, %v166_v42, %v168_v56  ;;  %v217_v58 = vsel %vm108_vm12, %v214_v54, %v216_v49  ;;  %332 = vmatmul.bf16.gmra.mxu0 %v2014_v48 }
 0x100   :  { %378 = vmatpush.bf16.msra.mxu2 %v169_v57  ;;  %407 = vmatpush.bf16.msra.mxu3 %v217_v58 }
 0x103   :  { %2028 = vmatmul.msk.bf16.gmra.mxu1 %vm301_vm14, %v2010_v59 }
 0x104   :  { %379 = vmatpush.bf16.msra.mxu2 %v1986_v60 }
 0x106   :  { %v210_v62 = vpop.permute.xlu1 %209  ;;  %v208_v63 = vpop.permute.xlu0 %207 }
 0x107   :  { %380 = vmatmul.bf16.vlgmr.msra.gmra.mxu2 %v2733_v19  ;;  %v211_v0 = vsel %vm101_vm13, %v208_v63, %v210_v62  ;;  %v2824_v19 = vpop.permute.xlu2 %515 }
 0x108   :  { %408 = vmatpush.bf16.msra.mxu3 %v211_v0 }
 0x10b   :  { %2031 = vmatmul.msk.bf16.vlgmr.msra.gmra.mxu3 %vm301_vm14, %v2002_v41 }
 0x10e   :  { %v2822_v17 = vpop.permute.xlu1 %511  ;;  %v2832_v28 = vpop.permute.xlu0 %467 }
 0x10f   :  { %337 = vmatmul.bf16.gmra.mxu0 %v2022_v3  ;;  %v2828_v23 = vpop.permute.xlu2 %457 }
 0x113   :  { %2029 = vmatmul.msk.bf16.gmra.mxu1 %vm301_vm14, %v2018_v6 }
 0x117   :  { %385 = vmatmul.bf16.gmra.mxu2 %v2006_v33  ;;  %v2826_v21 = vpop.permute.xlu1 %452  ;;  %v2834_v30 = vpop.permute.xlu2 %442 }
 0x118   :  { %v2844_v37 = vpop.permute.xlu0 %503 }
 0x11b   :  { %2032 = vmatmul.msk.bf16.gmra.mxu3 %vm301_vm14, %v2010_v59 }
 0x11f   :  { %v2846_v39 = vpop.permute.xlu2 %495 }
 0x120   :  { %v2830_v26 = vpop.permute.xlu1 %507  ;;  %v2854_v47 = vpop.permute.xlu0 %499 }
 0x123   :  { %2030 = vmatmul.msk.bf16.gmra.mxu1 %vm301_vm14, %v2026_v10 }
 0x127   :  { %390 = vmatmul.bf16.gmra.mxu2 %v2014_v48  ;;  %v2860_v54 = vpop.permute.xlu2 %437 }
 0x129   :  { %v2840_v35 = vpop.permute.xlu1 %447 }
 0x12b   :  { %2033 = vmatmul.msk.bf16.gmra.mxu3 %vm301_vm14, %v2018_v6 }
 0x131   :  { %v2850_v42 = vpop.permute.xlu1 %432 }
 0x137   :  { %395 = vmatmul.bf16.gmra.mxu2 %v2022_v3 }
 0x13a   :  { %v2874_v2 = vpop.permute.xlu1 %491 }
 0x13b   :  { %2034 = vmatmul.msk.bf16.gmra.mxu3 %vm301_vm14, %v2026_v10 }
 0x15c   :  { %v323_v11 = vpop.f32.mrf.mxu0 }
 0x164   :  { %v325_v12 = vpop.f32.mrf.mxu0 }
 0x16c   :  { %v328_v16 = vpop.f32.mrf.mxu0 }
 0x170   :  { %v352_v13 = vpop.f32.mrf.mxu1 }
 0x171   :  { %v353_v15 = vadd.f32 %v352_v13, %v323_v11  ;;  %v2886_v13 = vpop.permute.xlu0 %487 }
 0x173   :  { %v470_v9 = vmul.f32 %v2850_v42, %v353_v15 }
 0x174   :  { %v330_v20 = vpop.f32.mrf.mxu0 }
 0x175   :  { %v2895_v15 = vadd.f32 %v2886_v13, %v470_v9 }
 0x177   :  { %vm534_vm5 = vcmp.gt.f32.partialorder %v2895_v15, 0.0 }
 0x178   :  { %v354_v18 = vpop.f32.mrf.mxu1 }
 0x179   :  { %v355_v51 = vadd.f32 %v354_v18, %v325_v12 }
 0x17b   :  { %v472_v62 = vmul.f32 %v2860_v54, %v355_v51 }
 0x17c   :  { %v333_v25 = vpop.f32.mrf.mxu0 }
 0x17d   :  { %v2883_v10 = vadd.f32 %v2874_v2, %v472_v62 }
 0x17f   :  { %vm536_vm6 = vcmp.gt.f32.partialorder %v2883_v10, 0.0 }
 0x180   :  { %v357_v22 = vpop.f32.mrf.mxu1 }
 0x181   :  { %v358_v56 = vadd.f32 %v357_v22, %v328_v16 }
 0x183   :  { %v474_v3 = vmul.f32 %v2834_v30, %v358_v56 }
 0x184   :  { %v335_v34 = vpop.f32.mrf.mxu0 }
 0x185   :  { %v2889_v16 = vadd.f32 %v2846_v39, %v474_v3 }
 0x187   :  { %vm538_vm3 = vcmp.gt.f32.partialorder %v2889_v16, 0.0 }
 0x188   :  { %v359_v24 = vpop.f32.mrf.mxu1 }
 0x189   :  { %v360_v48 = vadd.f32 %v359_v24, %v330_v20 }
 0x18a   :  { %v381_v27 = vpop.f32.mrf.mxu2 }
 0x18b   :  { %v476_v58 = vmul.f32 %v2840_v35, %v360_v48 }
 0x18c   :  { %v338_v41 = vpop.f32.mrf.mxu0 }
 0x18d   :  { %v2878_v6 = vadd.f32 %v2854_v47, %v476_v58 }
 0x18e   :  { %v410_v29 = vpop.f32.mrf.mxu3 }
 0x18f   :  { %v2836_v31 = vadd.f32 %v410_v29, %v381_v27  ;;  %v556_v22 = vmin.f32 %v2878_v6, 0.0  ;;  %v552_v27 = vmin.f32 %v2883_v10, 0.0  ;;  %vm540_vm4 = vcmp.gt.f32.partialorder %v2878_v6, 0.0 }
 0x190   :  { %v362_v32 = vpop.f32.mrf.mxu1 }
 0x191   :  { %v363_v44 = vadd.f32 %v362_v32, %v333_v25 }
 0x192   :  { %v2838_v33 = vpop.f32.mrf.mxu2 }
 0x193   :  { %v478_v52 = vmul.f32 %v2826_v21, %v363_v44  ;;  %v550_v44 = vmin.f32 %v2895_v15, 0.0 }
 0x194   :  { %v340_v1 = vpop.f32.mrf.mxu0 }
 0x195   :  { %v2870_v63 = vadd.f32 %v2844_v37, %v478_v52  ;;  %v566_v51 = vmul.f32 1.442695, %v550_v44 }
 0x196   :  { %v2842_v36 = vpop.f32.mrf.mxu3 }
 0x197   :  { %v558_v11 = vmin.f32 %v2870_v63, 0.0  ;;  %vm542_vm1 = vcmp.gt.f32.partialorder %v2870_v63, 0.0 }
 0x198   :  { %v364_v38 = vpop.f32.mrf.mxu1 }
 0x199   :  { %v365_v43 = vadd.f32 %v364_v38, %v335_v34  ;;  %v582_v32 = vmul.f32 1.442695, %v558_v11  ;;  %v554_v34 = vmin.f32 %v2889_v16, 0.0 }
 0x19a   :  { %v2848_v40 = vpop.f32.mrf.mxu2 }
 0x19b   :  { %v480_v49 = vmul.f32 %v2828_v23, %v365_v43  ;;  %v578_v43 = vmul.f32 1.442695, %v556_v22 }
 0x19d   :  { %v2865_v59 = vadd.f32 %v2830_v26, %v480_v49  ;;  %v574_v49 = vmul.f32 1.442695, %v554_v34 }
 0x19e   :  { %v2852_v45 = vpop.f32.mrf.mxu3 }
 0x19f   :  { %v560_v7 = vmin.f32 %v2865_v59, 0.0  ;;  %vm544_vm2 = vcmp.gt.f32.partialorder %v2865_v59, 0.0 }
 0x1a0   :  { %v367_v46 = vpop.f32.mrf.mxu1 }
 0x1a1   :  { %v368_v50 = vadd.f32 %v367_v46, %v338_v41  ;;  %v586_v25 = vmul.f32 1.442695, %v560_v7  ;;  %v570_v46 = vmul.f32 1.442695, %v552_v27  ;;  %v630_v27 = vld [vmem:[%s3444_s6 + $0x40] sm:$0xff] }
 0x1a2   :  { %v2858_v53 = vpop.f32.mrf.mxu2  ;;  %681 = vperm.xlu0 %2245, %v630_v27   ;;  %694 = vperm.xlu2 %2246, %v630_v27  }
 0x1a3   :  { %v482_v57 = vmul.f32 %v2820_v14, %v368_v50 }
 0x1a5   :  { %v530_v60 = vadd.f32 %v2822_v17, %v482_v57 }
 0x1a6   :  { %v2872_v0 = vpop.f32.mrf.mxu3 }
 0x1a7   :  { %v562_v4 = vmin.f32 %v530_v60, 0.0  ;;  %vm546_vm15 = vcmp.gt.f32.partialorder %v530_v60, 0.0 }
 0x1a8   :  { %v369_v5 = vpop.f32.mrf.mxu1 }
 0x1a9   :  { %v370_v8 = vadd.f32 %v369_v5, %v340_v1  ;;  %v590_v20 = vmul.f32 1.442695, %v562_v4 }
 0x1aa   :  { %v391_v12 = vpop.f32.mrf.mxu2  ;;  %2249 = vset.pattern.permute.xlu0 %v2496_v55  ;;  %2248 = vset.pattern.permute.xlu2 %v2497_v61 }
 0x1ab   :  { %v484_v18 = vmul.f32 %v2832_v28, %v370_v8  ;;  %2384 = vpow2.f32 %v590_v20 }
 0x1ac   :  { %2386 = vpow2.f32 %v586_v25 }
 0x1ad   :  { %v532_v24 = vadd.f32 %v2824_v19, %v484_v18  ;;  %2388 = vpow2.f32 %v582_v32 }
 0x1ae   :  { %v420_v29 = vpop.f32.mrf.mxu3 }
 0x1af   :  { %v564_v38 = vmin.f32 %v532_v24, 0.0  ;;  %vm548_vm0 = vcmp.gt.f32.partialorder %v532_v24, 0.0  ;;  %v421_v8 = vadd.f32 %v420_v29, %v391_v12 }
 0x1b1   :  { %v594_v41 = vmul.f32 1.442695, %v564_v38  ;;  %v2385_v50 = vpop.eup %2384 }
 0x1b2   :  { %v393_v48 = vpop.f32.mrf.mxu2  ;;  %v2387_v56 = vpop.eup %2386  ;;  %v2047_v58 = vadd.f32 -1.0, %v2385_v50 }
 0x1b3   :  { %2390 = vpow2.f32 %v594_v41  ;;  %v2389_v57 = vpop.eup %2388  ;;  %v2045_v3 = vadd.f32 -1.0, %v2387_v56  ;;  %v479_v41 = vmul.f32 %v2826_v21, %v421_v8 }
 0x1b4   :  { %2392 = vpow2.f32 %v578_v43  ;;  %v626_v11 = vsel %vm546_vm15, %v530_v60, %v2047_v58  ;;  %v2043_v20 = vadd.f32 -1.0, %v2389_v57  ;;  %v418_v60 = vadd.f32 %v2872_v0, %v2858_v53 }
 0x1b5   :  { %2394 = vpow2.f32 %v570_v46  ;;  %v624_v34 = vsel %vm544_vm2, %v2865_v59, %v2045_v3  ;;  %v416_v59 = vadd.f32 %v2852_v45, %v2848_v40 }
 0x1b6   :  { %v422_v52 = vpop.f32.mrf.mxu3  ;;  %2396 = vpow2.f32 %v574_v49  ;;  %v622_v43 = vsel %vm542_vm1, %v2870_v63, %v2043_v20  ;;  %v477_v0 = vmul.f32 %v2840_v35, %v418_v60 }
 0x1b7   :  { %2398 = vpow2.f32 %v566_v51  ;;  %v423_v5 = vadd.f32 %v422_v52, %v393_v48  ;;  %v638_v49 = vpack.c.bf16 %v624_v34, %v622_v43 }
 0x1b9   :  { %v2391_v62 = vpop.eup %2390  ;;  %v481_v12 = vmul.f32 %v2828_v23, %v423_v5  ;;  %v413_v23 = vadd.f32 %v2842_v36, %v2838_v33  ;;  %v475_v33 = vmul.f32 %v2834_v30, %v416_v59 }
 0x1ba   :  { %v2049_v1 = vadd.f32 -1.0, %v2391_v62  ;;  %v2393_v4 = vpop.eup %2392  ;;  %v396_v9 = vpop.f32.mrf.mxu2  ;;  %v2954_v62 = vld [vmem:[%s3446_s2] sm:$0xff] }
 0x1bb   :  { %v2395_v7 = vpop.eup %2394  ;;  %v2041_v38 = vadd.f32 -1.0, %v2393_v4  ;;  %v2921_v21 = vadd.f32 %v2830_v26, %v481_v12  ;;  %v473_v36 = vmul.f32 %v2860_v54, %v413_v23  ;;  %v471_v54 = vmul.f32 %v2850_v42, %v2836_v31 }
 0x1bc   :  { %v628_v18 = vsel %vm548_vm0, %v532_v24, %v2049_v1  ;;  %v2397_v22 = vpop.eup %2396  ;;  %v2037_v46 = vadd.f32 -1.0, %v2395_v7  ;;  %v523_v56 = vadd.f32 %v2846_v39, %v475_v33 }
 0x1bd   :  { %v640_v25 = vpack.c.bf16 %v628_v18, %v626_v11  ;;  %v2399_v29 = vpop.eup %2398  ;;  %v2039_v44 = vadd.f32 -1.0, %v2397_v22  ;;  %v620_v53 = vsel %vm540_vm4, %v2878_v6, %v2041_v38  ;;  %v561_v50 = vmin.f32 %v2921_v21, 0.0 }
 0x1be   :  { %v425_v32 = vpop.f32.mrf.mxu3  ;;  %v2035_v40 = vadd.f32 -1.0, %v2399_v29  ;;  %v519_v39 = vadd.f32 %v2886_v13, %v471_v54  ;;  %v555_v42 = vmin.f32 %v523_v56, 0.0  ;;  %vm545_vm10 = vcmp.gt.f32.partialorder %v2921_v21, 0.0 }
 0x1bf   :  { %v426_v24 = vadd.f32 %v425_v32, %v396_v9  ;;  %655 = vmatpush.bf16.msrb.mxu3 %v640_v25  ;;  %v618_v45 = vsel %vm538_vm3, %v2889_v16, %v2039_v44  ;;  %v2941_v16 = vadd.f32 %v2854_v47, %v477_v0  ;;  %v521_v47 = vadd.f32 %v2874_v2, %v473_v36 }
 0x1c0   :  { %v636_v35 = vpack.c.bf16 %v620_v53, %v618_v45  ;;  %v614_v30 = vsel %vm534_vm5, %v2895_v15, %v2035_v40  ;;  %v588_v1 = vmul.f32 1.442695, %v561_v50  ;;  %v551_v7 = vmin.f32 %v519_v39, 0.0 }
 0x1c1   :  { %v483_v48 = vmul.f32 %v2820_v14, %v426_v24  ;;  %v2927_v14 = vadd.f32 %v2844_v37, %v479_v41  ;;  %v557_v15 = vmin.f32 %v2941_v16, 0.0  ;;  %v553_v2 = vmin.f32 %v521_v47, 0.0 }
 0x1c2   :  { %v398_v6 = vpop.f32.mrf.mxu2  ;;  %v576_v8 = vmul.f32 1.442695, %v555_v42  ;;  %v568_v18 = vmul.f32 1.442695, %v551_v7  ;;  %vm541_vm12 = vcmp.gt.f32.partialorder %v2941_v16, 0.0  ;;  %vm539_vm13 = vcmp.gt.f32.partialorder %v523_v56, 0.0 }
 0x1c3   :  { %v2924_v63 = vadd.f32 %v2822_v17, %v483_v48  ;;  %656 = vmatpush.bf16.msrb.mxu3 %v638_v49  ;;  %v616_v17 = vsel %vm536_vm6, %v2883_v10, %v2037_v46  ;;  %v559_v52 = vmin.f32 %v2927_v14, 0.0  ;;  %v580_v4 = vmul.f32 1.442695, %v557_v15 }
 0x1c4   :  { %v634_v10 = vpack.c.bf16 %v616_v17, %v614_v30  ;;  %v572_v9 = vmul.f32 1.442695, %v553_v2  ;;  %vm543_vm11 = vcmp.gt.f32.partialorder %v2927_v14, 0.0  ;;  %vm537_vm14 = vcmp.gt.f32.partialorder %v521_v47, 0.0 }
 0x1c5   :  { %v563_v26 = vmin.f32 %v2924_v63, 0.0  ;;  %v584_v31 = vmul.f32 1.442695, %v559_v52  ;;  %vm547_vm8 = vcmp.gt.f32.partialorder %v2924_v63, 0.0  ;;  %vm535_vm15 = vcmp.gt.f32.partialorder %v519_v39, 0.0 }
 0x1c6   :  { %v427_v37 = vpop.f32.mrf.mxu3  ;;  %vm748_vm5 = vcmask 7168   ;;  %vm753_vm6 = vcmask 130048  }
 0x1c7   :  { %v428_v51 = vadd.f32 %v427_v37, %v398_v6  ;;  %657 = vmatpush.bf16.msrb.mxu3 %v636_v35  ;;  %v592_v57 = vmul.f32 1.442695, %v563_v26 }
 0x1c9   :  { %v485_v58 = vmul.f32 %v2832_v28, %v428_v51  ;;  %2400 = vpow2.f32 %v592_v57  ;;  %v699_v51 = vpop.permute.xlu1 %698 }
 0x1ca   :  { %2402 = vpow2.f32 %v588_v1 }
 0x1cb   :  { %v533_v3 = vadd.f32 %v2824_v19, %v485_v58  ;;  %658 = vmatpush.bf16.msrb.mxu3 %v634_v10  ;;  %2404 = vpow2.f32 %v584_v31 }
 0x1cd   :  { %v565_v28 = vmin.f32 %v533_v3, 0.0  ;;  %vm549_vm9 = vcmp.gt.f32.partialorder %v533_v3, 0.0 }
 0x1ce   :  { %2055 = vmatmul.msk.bf16.vlgmr.msrb.gmra.mxu3 %vm647_vm7, %v2954_v62 }
 0x1cf   :  { %v596_v5 = vmul.f32 1.442695, %v565_v28  ;;  %v2401_v19 = vpop.eup %2400 }
 0x1d0   :  { %v2403_v11 = vpop.eup %2402  ;;  %v2048_v20 = vadd.f32 -1.0, %v2401_v19 }
 0x1d1   :  { %2406 = vpow2.f32 %v596_v5  ;;  %v2405_v13 = vpop.eup %2404  ;;  %v2046_v27 = vadd.f32 -1.0, %v2403_v11 }
 0x1d2   :  { %2408 = vpow2.f32 %v580_v4  ;;  %v627_v34 = vsel %vm547_vm8, %v2924_v63, %v2048_v20  ;;  %v2044_v60 = vadd.f32 -1.0, %v2405_v13  ;;  %v2498_v13 = vmov 128.0  }
 0x1d3   :  { %2410 = vpow2.f32 %v576_v8  ;;  %v625_v29 = vsel %vm545_vm10, %v2921_v21, %v2046_v27 }
 0x1d4   :  { %2412 = vpow2.f32 %v572_v9  ;;  %v623_v44 = vsel %vm543_vm11, %v2927_v14, %v2044_v60  ;;  %v687_v14 = vpop.permute.xlu2 %686 }
 0x1d5   :  { %2414 = vpow2.f32 %v568_v18  ;;  %v639_v48 = vpack.c.bf16 %v625_v29, %v623_v44 }
 0x1d7   :  { %v2407_v22 = vpop.eup %2406 }
 0x1d8   :  { %v2050_v25 = vadd.f32 -1.0, %v2407_v22  ;;  %v2409_v32 = vpop.eup %2408 }
 0x1d9   :  { %v2411_v12 = vpop.eup %2410  ;;  %v2042_v41 = vadd.f32 -1.0, %v2409_v32 }
 0x1da   :  { %v629_v38 = vsel %vm549_vm9, %v533_v3, %v2050_v25  ;;  %v2413_v43 = vpop.eup %2412  ;;  %v2040_v46 = vadd.f32 -1.0, %v2411_v12 }
 0x1db   :  { %v641_v24 = vpack.c.bf16 %v629_v38, %v627_v34  ;;  %v2415_v59 = vpop.eup %2414  ;;  %v621_v49 = vsel %vm541_vm12, %v2941_v16, %v2042_v41  ;;  %v2038_v23 = vadd.f32 -1.0, %v2413_v43 }
 0x1dc   :  { %v619_v53 = vsel %vm539_vm13, %v523_v56, %v2040_v46  ;;  %v2036_v0 = vadd.f32 -1.0, %v2415_v59  ;;  %v751_v59 = vld [vmem:[%s3447_s4] sm:$0xff] }
 0x1dd   :  { %669 = vmatpush.bf16.msra.mxu3 %v641_v24  ;;  %v637_v21 = vpack.c.bf16 %v621_v49, %v619_v53  ;;  %v617_v63 = vsel %vm537_vm14, %v521_v47, %v2038_v23  ;;  %v752_v49 = vld [vmem:[%s3447_s4 + $0x8] sm:$0xff]  ;;  %s2499_s4 = smov 1  }
 0x1de   :  { %v615_v40 = vsel %vm535_vm15, %v519_v39, %v2036_v0 }
 0x1df   :  { %v635_v45 = vpack.c.bf16 %v617_v63, %v615_v40 }
 0x1e1   :  { %670 = vmatpush.bf16.msra.mxu3 %v639_v48 }
 0x1e5   :  { %671 = vmatpush.bf16.msra.mxu3 %v637_v21 }
 0x1e9   :  { %672 = vmatpush.bf16.msra.mxu3 %v635_v45 }
 0x1ec   :  { %2056 = vmatmul.msk.bf16.vlgmr.msra.gmra.mxu3 %vm647_vm7, %v2954_v62 }
 0x1fc   :  { %v695_v35 = vpop.permute.xlu2 %694 }
 0x214   :  { %v682_v33 = vpop.permute.xlu0 %681 }
 0x251   :  { %v660_v26 = vpop.f32.mrf.mxu3 }
 0x252   :  { %v689_v17 = vmul.f32 %v682_v33, %v660_v26 }
 0x254   :  { %v701_v36 = vadd.f32 %v695_v35, %v689_v17 }
 0x256   :  { %v709_v6 = vmin.f32 %v701_v36, 0.0  ;;  %vm705_vm0 = vcmp.gt.f32.partialorder %v701_v36, 0.0 }
 0x258   :  { %v713_v37 = vmul.f32 1.442695, %v709_v6 }
 0x259   :  { %v662_v16 = vpop.f32.mrf.mxu3 }
 0x25a   :  { %v691_v50 = vmul.f32 %v687_v14, %v662_v16  ;;  %2416 = vpow2.f32 %v713_v37 }
 0x25c   :  { %v703_v30 = vadd.f32 %v699_v51, %v691_v50 }
 0x25e   :  { %v711_v52 = vmin.f32 %v703_v30, 0.0  ;;  %vm707_vm1 = vcmp.gt.f32.partialorder %v703_v30, 0.0 }
 0x260   :  { %v2417_v10 = vpop.eup %2416  ;;  %v717_v54 = vmul.f32 1.442695, %v711_v52 }
 0x261   :  { %v2057_v56 = vadd.f32 -1.0, %v2417_v10 }
 0x262   :  { %2418 = vpow2.f32 %v717_v54 }
 0x263   :  { %v2971_v57 = vsel %vm705_vm0, %v701_v36, %v2057_v56 }
 0x264   :  { %729 = vadd.xlane.f32.xlu0 %v2971_v57 }
 0x268   :  { %v2419_v58 = vpop.eup %2418 }
 0x269   :  { %v2059_v47 = vadd.f32 -1.0, %v2419_v58 }
 0x26b   :  { %v2974_v62 = vsel %vm707_vm1, %v703_v30, %v2059_v47 }
 0x26c   :  { %731 = vadd.xlane.f32.xlu1 %v2974_v62 }
 0x26f   :  { %v674_v15 = vpop.f32.mrf.mxu3 }
 0x270   :  { %v690_v1 = vmul.f32 %v682_v33, %v674_v15 }
 0x272   :  { %v702_v31 = vadd.f32 %v695_v35, %v690_v1 }
 0x274   :  { %v710_v28 = vmin.f32 %v702_v31, 0.0  ;;  %vm706_vm3 = vcmp.gt.f32.partialorder %v702_v31, 0.0 }
 0x276   :  { %v715_v5 = vmul.f32 1.442695, %v710_v28 }
 0x277   :  { %v676_v3 = vpop.f32.mrf.mxu3 }
 0x278   :  { %v692_v39 = vmul.f32 %v687_v14, %v676_v3 }
 0x27a   :  { %v704_v42 = vadd.f32 %v699_v51, %v692_v39 }
 0x27c   :  { %v712_v2 = vmin.f32 %v704_v42, 0.0  ;;  %vm708_vm2 = vcmp.gt.f32.partialorder %v704_v42, 0.0 }
 0x27e   :  { %v719_v4 = vmul.f32 1.442695, %v712_v2 }
 0x280   :  { %2420 = vpow2.f32 %v719_v4 }
 0x281   :  { %2422 = vpow2.f32 %v715_v5 }
 0x282   :  { %2424 = vrcp.f32 %v2498_v13 }
 0x286   :  { %v2421_v7 = vpop.eup %2420 }
 0x287   :  { %v2060_v8 = vadd.f32 -1.0, %v2421_v7  ;;  %v2423_v9 = vpop.eup %2422 }
 0x288   :  { %v2058_v11 = vadd.f32 -1.0, %v2423_v9  ;;  %v2425_v20 = vpop.eup %2424 }
 0x289   :  { %v2977_v19 = vsel %vm708_vm2, %v704_v42, %v2060_v8  ;;  %v734_v22 = vmul.f32 128.0, %v2425_v20  ;;  %vm738_vm4 = vweird.f32 %v2425_v20 }
 0x28a   :  { %744 = vadd.xlane.f32.xlu2 %v2977_v19  ;;  %v2980_v18 = vsel %vm706_vm3, %v702_v31, %v2058_v11 }
 0x28b   :  { %v735_v25 = vsub.f32 1.0, %v734_v22 }
 0x28d   :  { %v736_v27 = vmul.f32 %v2425_v20, %v735_v25 }
 0x28f   :  { %v737_v32 = vadd.f32 %v2425_v20, %v736_v27 }
 0x291   :  { %v739_v38 = vsel %vm738_vm4, %v2425_v20, %v737_v32  ;;  %v845_v32 = vld [vmem:[%s3444_s6 + $0x50] sm:$0xff] }
 0x292   :  { %742 = vadd.xlane.f32.xlu2 %v2980_v18 }
 0x2d7   :  { %v730_v41 = vpop.xlane.xlu0 %729 }
 0x2d8   :  { %v740_v44 = vmul.f32 %v739_v38, %v730_v41 }
 0x2df   :  { %v732_v34 = vpop.xlane.xlu1 %731 }
 0x2e0   :  { %v741_v12 = vmul.f32 %v739_v38, %v732_v34  ;;  %v846_v34 = vld [vmem:[%s3444_s6 + $0x58] sm:$0xff] }
 0x2fd   :  { %v745_v60 = vpop.xlane.xlu2 %744 }
 0x2fe   :  { %v747_v24 = vmul.f32 %v745_v60, %v739_v38 }
 0x300   :  { %v750_v29 = vsel %vm748_vm5, %v741_v12, %v747_v24  ;;  %v843_v12 = vlaneseq }
 0x301   :  { %774 = vmatpush.msrb.mxu0 %v750_v29 }
 0x302   :  { %v3029_v24 = vand.u32 127, %v843_v12 }
 0x304   :  { %vm861_vm0 = vcmp.lt.s32.totalorder %v3029_v24, 3  ;;  %vm901_vm1 = vcmp.lt.s32.totalorder %v3029_v24, 1  ;;  %vm906_vm2 = vcmp.ge.s32.totalorder %v3029_v24, 1  ;;  %vm866_vm3 = vcmp.ge.s32.totalorder %v3029_v24, 3 }
 0x305   :  { %v743_v43 = vpop.xlane.xlu2 %742  ;;  %vm881_vm4 = vcmp.lt.s32.totalorder %v3029_v24, 2 }
 0x306   :  { %v746_v46 = vmul.f32 %v743_v43, %v739_v38 }
 0x308   :  { %v749_v48 = vsel %vm748_vm5, %v740_v44, %v746_v46 }
 0x309   :  { %775 = vmatpush.msrb.mxu0 %v749_v48 }
 0x30a   :  { %2061 = vmatmul.msk.f32.vlgmr.msrb.gmra.mxu0 %vm753_vm6, %v751_v59 }
 0x312   :  { %2062 = vmatmul.msk.f32.gmra.mxu0 %vm753_vm6, %v752_v49 }
 0x387   :  { %v777_v23 = vpop.f32.mrf.mxu0 }
 0x388   :  { %v783_v53 = vsub.f32 0.0, %v777_v23 }
 0x38a   :  { %v785_v0 = vmul.f32 1.442695, %v783_v53 }
 0x38c   :  { %2426 = vpow2.f32 %v785_v0 }
 0x38f   :  { %v780_v21 = vpop.f32.mrf.mxu0 }
 0x390   :  { %v784_v63 = vsub.f32 0.0, %v780_v21 }
 0x392   :  { %v2427_v40 = vpop.eup %2426  ;;  %v787_v45 = vmul.f32 1.442695, %v784_v63 }
 0x393   :  { %v789_v14 = vadd.f32 1.0, %v2427_v40 }
 0x394   :  { %2428 = vpow2.f32 %v787_v45 }
 0x395   :  { %2430 = vrcp.f32 %v789_v14  ;;  %v802_v6 = vand.u32 2147483648, %v789_v14  ;;  %v800_v16 = vand.u32 2147483647, %v789_v14  ;;  %vm796_vm9 = vweird.f32 %v789_v14 }
 0x397   :  { %v803_v30 = vor.u32 1.1754944e-38, %v802_v6  ;;  %vm801_vm11 = vcmp.eq.f32.partialorder %v800_v16, 8.507059e+37 }
 0x39a   :  { %v2429_v33 = vpop.eup %2428 }
 0x39b   :  { %v2431_v26 = vpop.eup %2430  ;;  %v790_v35 = vadd.f32 1.0, %v2429_v33 }
 0x39c   :  { %v792_v17 = vmul.f32 %v2431_v26, %v789_v14  ;;  %vm797_vm8 = vweird.f32 %v2431_v26 }
 0x39d   :  { %2432 = vrcp.f32 %v790_v35  ;;  %vm798_vm10 = vmor %vm796_vm9, %vm797_vm8  ;;  %v817_v58 = vand.u32 2147483648, %v790_v35  ;;  %v815_v15 = vand.u32 2147483647, %v790_v35  ;;  %vm811_vm13 = vweird.f32 %v790_v35 }
 0x39e   :  { %v793_v36 = vsub.f32 1.0, %v792_v17  ;;  %vm886_vm8 = vcmp.ge.s32.totalorder %v3029_v24, 2 }
 0x39f   :  { %v818_v3 = vor.u32 1.1754944e-38, %v817_v58  ;;  %vm816_vm15 = vcmp.eq.f32.partialorder %v815_v15, 8.507059e+37 }
 0x3a0   :  { %v794_v37 = vmul.f32 %v2431_v26, %v793_v36 }
 0x3a2   :  { %v795_v50 = vadd.f32 %v2431_v26, %v794_v37 }
 0x3a3   :  { %v2433_v51 = vpop.eup %2432 }
 0x3a4   :  { %v799_v52 = vsel %vm798_vm10, %v2431_v26, %v795_v50  ;;  %v807_v10 = vmul.f32 %v2433_v51, %v790_v35  ;;  %vm812_vm12 = vweird.f32 %v2433_v51 }
 0x3a5   :  { %v804_v54 = vsel %vm801_vm11, %v803_v30, %v799_v52  ;;  %vm813_vm14 = vmor %vm811_vm13, %vm812_vm12 }
 0x3a6   :  { %834 = vperm.xlu0 %2249, %v804_v54   ;;  %823 = vperm.xlu1 %2247, %v804_v54   ;;  %v808_v56 = vsub.f32 1.0, %v807_v10 }
 0x3a8   :  { %v809_v47 = vmul.f32 %v2433_v51, %v808_v56 }
 0x3aa   :  { %v810_v1 = vadd.f32 %v2433_v51, %v809_v47 }
 0x3ac   :  { %v814_v31 = vsel %vm813_vm14, %v2433_v51, %v810_v1 }
 0x3ad   :  { %v819_v39 = vsel %vm816_vm15, %v818_v3, %v814_v31 }
 0x3ae   :  { %2250 = vset.pattern.permute.xlu1 %v2496_v55  ;;  %828 = vperm.xlu2 %2248, %v819_v39  }
 0x3af   :  { %838 = vperm.xlu1 %2250, %v819_v39  }
 0x3b7   :  { %2281 = vset.pattern.permute.xlu1 %v2497_v61 }
 0x408   :  { %v829_v42 = vpop.permute.xlu2 %828 }
 0x409   :  { %v2996_v2 = vmul.f32 %v829_v42, %v2974_v62 }
 0x418   :  { %v824_v28 = vpop.permute.xlu1 %823  ;;  %v835_v5 = vpop.permute.xlu0 %834 }
 0x419   :  { %v2999_v4 = vmul.f32 %v824_v28, %v2971_v57  ;;  %v3005_v8 = vmul.f32 %v835_v5, %v2980_v18 }
 0x41b   :  { %v2251_v7 = vpack.i.bf16 %v2996_v2, %v2999_v4  ;;  %v913_v62 = vpack.c.bf16 %v3005_v8, %v2999_v4 }
 0x41d   :  { %2252 = vrot.lane.b32.xlu2 %v2251_v7, %s2499_s4  ;;  %v947_v18 = vunpack.c.l.b16 %v913_v62  ;;  %v948_v20 = vunpack.c.h.b16 %v913_v62 }
 0x421   :  { %v839_v9 = vpop.permute.xlu1 %838 }
 0x422   :  { %v3008_v11 = vmul.f32 %v839_v9, %v2977_v19 }
 0x424   :  { %v2276_v57 = vpack.i.bf16 %v3008_v11, %v3005_v8  ;;  %v914_v13 = vpack.c.bf16 %v3008_v11, %v2996_v2 }
 0x425   :  { %2262 = vrot.lane.b32.xlu2 %v2251_v7, %s2500_s10 }
 0x426   :  { %2277 = vrot.lane.b32.xlu0 %v2276_v57, %s2501_s11  ;;  %2257 = vrot.lane.b32.xlu1 %v2276_v57, %s2499_s4  ;;  %v949_v19 = vunpack.c.l.b16 %v914_v13  ;;  %v950_v22 = vunpack.c.h.b16 %v914_v13 }
 0x428   :  { %v951_v25 = vpack.c.b16 %v949_v19, %v947_v18  ;;  %v952_v27 = vpack.c.b16 %v950_v22, %v948_v20 }
 0x42a   :  { %967 = vmatpush.bf16.msrb.mxu2 %v951_v25  ;;  %981 = vmatpush.bf16.msrb.mxu1 %v952_v27 }
 0x42d   :  { %2272 = vrot.lane.b32.xlu2 %v2251_v7, %s2501_s11 }
 0x42e   :  { %1006 = vperm.xlu0 %2249, %v845_v32   ;;  %2267 = vrot.lane.b32.xlu1 %v2276_v57, %s2500_s10 }
 0x435   :  { %998 = vperm.xlu2 %2248, %v846_v34  }
 0x436   :  { %993 = vperm.xlu1 %2281, %v845_v32   ;;  %2313 = vset.pattern.permute.xlu0 %v2497_v61 }
 0x43e   :  { %2282 = vset.pattern.permute.xlu1 %v2496_v55 }
 0x43f   :  { %1010 = vperm.xlu1 %2282, %v846_v34  }
 0x477   :  { %v2253_v38 = vpop.permute.xlu2 %2252 }
 0x478   :  { %v2255_v41 = vunpack.i.h.bf16 %v2253_v38  ;;  %v2254_v23 = vunpack.i.l.bf16 %v2253_v38 }
 0x47f   :  { %v2263_v60 = vpop.permute.xlu2 %2262 }
 0x480   :  { %v2265_v0 = vunpack.i.h.bf16 %v2263_v60  ;;  %v2264_v37 = vunpack.i.l.bf16 %v2263_v60 }
 0x487   :  { %v2273_v29 = vpop.permute.xlu2 %2272 }
 0x488   :  { %v2274_v46 = vunpack.i.l.bf16 %v2273_v29  ;;  %v2275_v21 = vunpack.i.h.bf16 %v2273_v29 }
 0x498   :  { %v2278_v43 = vpop.permute.xlu0 %2277  ;;  %v2258_v44 = vpop.permute.xlu1 %2257 }
 0x499   :  { %v2279_v59 = vunpack.i.l.bf16 %v2278_v43  ;;  %v2260_v48 = vunpack.i.h.bf16 %v2258_v44  ;;  %v2259_v49 = vunpack.i.l.bf16 %v2258_v44  ;;  %v2280_v53 = vunpack.i.h.bf16 %v2278_v43 }
 0x49b   :  { %v862_v63 = vsel %vm861_vm0, %v2274_v46, %v2279_v59  ;;  %v864_v40 = vsel %vm861_vm0, %v2279_v59, %v2274_v46  ;;  %v902_v45 = vsel %vm901_vm1, %v2254_v23, %v2259_v49  ;;  %v903_v14 = vsel %vm901_vm1, %v2255_v41, %v2260_v48 }
 0x49c   :  { %v904_v33 = vsel %vm901_vm1, %v2259_v49, %v2254_v23  ;;  %v905_v26 = vsel %vm901_vm1, %v2260_v48, %v2255_v41  ;;  %v908_v17 = vsel %vm906_vm2, %v902_v45, 0.0  ;;  %v910_v6 = vsel %vm906_vm2, %v903_v14, 0.0  ;;  %v2190_v49 = vld [vmem:[%s3448_s3] sm:$0xff]  ;;  %v999_v14 = vpop.permute.xlu2 %998 }
 0x49d   :  { %v907_v35 = vsel %vm906_vm2, %v904_v33, 0.0  ;;  %v909_v36 = vsel %vm906_vm2, %v905_v26, 0.0  ;;  %v865_v16 = vsel %vm861_vm0, %v2280_v53, %v2275_v21  ;;  %v863_v30 = vsel %vm861_vm0, %v2275_v21, %v2280_v53 }
 0x49e   :  { %v911_v50 = vpack.c.bf16 %v908_v17, %v907_v35  ;;  %v912_v51 = vpack.c.bf16 %v910_v6, %v909_v36  ;;  %v867_v52 = vsel %vm866_vm3, %v864_v40, 0.0  ;;  %v868_v10 = vsel %vm866_vm3, %v862_v63, 0.0 }
 0x49f   :  { %v869_v31 = vsel %vm866_vm3, %v865_v16, 0.0  ;;  %v870_v28 = vsel %vm866_vm3, %v863_v30, 0.0  ;;  %v871_v5 = vpack.c.bf16 %v868_v10, %v867_v52 }
 0x4a0   :  { %v2268_v54 = vpop.permute.xlu1 %2267  ;;  %v937_v56 = vunpack.c.l.b16 %v911_v50  ;;  %v939_v58 = vunpack.c.l.b16 %v912_v51  ;;  %v938_v47 = vunpack.c.h.b16 %v911_v50  ;;  %v940_v15 = vunpack.c.h.b16 %v912_v51  ;;  %v1007_v21 = vpop.permute.xlu0 %1006 }
 0x4a1   :  { %v2270_v1 = vunpack.i.h.bf16 %v2268_v54  ;;  %v2269_v3 = vunpack.i.l.bf16 %v2268_v54  ;;  %v872_v27 = vpack.c.bf16 %v870_v28, %v869_v31  ;;  %v917_v12 = vunpack.c.l.b16 %v871_v5 }
 0x4a2   :  { %v941_v39 = vpack.c.b16 %v939_v58, %v937_v56  ;;  %v942_v42 = vpack.c.b16 %v940_v15, %v938_v47  ;;  %v918_v29 = vunpack.c.h.b16 %v871_v5 }
 0x4a3   :  { %v882_v7 = vsel %vm881_vm4, %v2264_v37, %v2269_v3  ;;  %v883_v9 = vsel %vm881_vm4, %v2265_v0, %v2270_v1  ;;  %v884_v62 = vsel %vm881_vm4, %v2269_v3, %v2264_v37  ;;  %v885_v57 = vsel %vm881_vm4, %v2270_v1, %v2265_v0 }
 0x4a4   :  { %968 = vmatpush.bf16.msrb.mxu2 %v941_v39  ;;  %982 = vmatpush.bf16.msrb.mxu1 %v942_v42  ;;  %v887_v13 = vsel %vm886_vm8, %v884_v62, 0.0  ;;  %v888_v18 = vsel %vm886_vm8, %v882_v7, 0.0  ;;  %v889_v19 = vsel %vm886_vm8, %v885_v57, 0.0  ;;  %v890_v20 = vsel %vm886_vm8, %v883_v9, 0.0 }
 0x4a5   :  { %v891_v22 = vpack.c.bf16 %v888_v18, %v887_v13  ;;  %v892_v25 = vpack.c.bf16 %v890_v20, %v889_v19  ;;  %v919_v44 = vunpack.c.l.b16 %v872_v27  ;;  %v920_v46 = vunpack.c.h.b16 %v872_v27 }
 0x4a7   :  { %v927_v32 = vunpack.c.l.b16 %v891_v22  ;;  %v929_v34 = vunpack.c.l.b16 %v892_v25  ;;  %v928_v38 = vunpack.c.h.b16 %v891_v22  ;;  %v930_v60 = vunpack.c.h.b16 %v892_v25 }
 0x4a8   :  { %v921_v59 = vpack.c.b16 %v919_v44, %v917_v12  ;;  %v922_v48 = vpack.c.b16 %v920_v46, %v918_v29  ;;  %v994_v23 = vpop.permute.xlu1 %993  ;;  %v848_v12 = vld [vmem:[%s3444_s6 + $0x68] sm:$0xff] }
 0x4a9   :  { %v931_v41 = vpack.c.b16 %v929_v34, %v927_v32  ;;  %v932_v43 = vpack.c.b16 %v930_v60, %v928_v38  ;;  %v847_v38 = vld [vmem:[%s3444_s6 + $0x60] sm:$0xff] }
 0x4ab   :  { %969 = vmatpush.bf16.msrb.mxu2 %v931_v41  ;;  %983 = vmatpush.bf16.msrb.mxu1 %v932_v43 }
 0x4af   :  { %970 = vmatpush.bf16.msrb.mxu2 %v921_v59  ;;  %984 = vmatpush.bf16.msrb.mxu1 %v922_v48 }
 0x4b1   :  { %v1011_v35 = vpop.permute.xlu1 %1010 }
 0x4b2   :  { %2067 = vmatmul.msk.bf16.vlgmr.msrb.gmra.mxu2 %vm647_vm7, %v2190_v49  ;;  %2068 = vmatmul.msk.bf16.vlgmr.msrb.gmra.mxu1 %vm647_vm7, %v2190_v49 }
 0x52f   :  { %v986_v53 = vpop.f32.mrf.mxu1 }
 0x530   :  { %v1002_v0 = vmul.f32 %v994_v23, %v986_v53 }
 0x532   :  { %v1014_v63 = vadd.f32 %v1007_v21, %v1002_v0 }
 0x534   :  { %v1022_v40 = vmin.f32 %v1014_v63, 0.0  ;;  %vm1018_vm9 = vcmp.gt.f32.partialorder %v1014_v63, 0.0 }
 0x535   :  { %v972_v45 = vpop.f32.mrf.mxu2 }
 0x536   :  { %v1001_v33 = vmul.f32 %v994_v23, %v972_v45  ;;  %v1027_v17 = vmul.f32 1.442695, %v1022_v40 }
 0x537   :  { %v988_v26 = vpop.f32.mrf.mxu1 }
 0x538   :  { %v1013_v36 = vadd.f32 %v1007_v21, %v1001_v33  ;;  %v1004_v6 = vmul.f32 %v999_v14, %v988_v26  ;;  %2434 = vpow2.f32 %v1027_v17 }
 0x53a   :  { %v1021_v37 = vmin.f32 %v1013_v36, 0.0  ;;  %v1016_v16 = vadd.f32 %v1011_v35, %v1004_v6  ;;  %vm1017_vm11 = vcmp.gt.f32.partialorder %v1013_v36, 0.0 }
 0x53c   :  { %v1025_v50 = vmul.f32 1.442695, %v1021_v37  ;;  %v1024_v51 = vmin.f32 %v1016_v16, 0.0  ;;  %vm1020_vm10 = vcmp.gt.f32.partialorder %v1016_v16, 0.0 }
 0x53d   :  { %v974_v30 = vpop.f32.mrf.mxu2 }
 0x53e   :  { %2436 = vpow2.f32 %v1025_v50  ;;  %v1031_v52 = vmul.f32 1.442695, %v1024_v51  ;;  %v1003_v10 = vmul.f32 %v999_v14, %v974_v30  ;;  %v2435_v56 = vpop.eup %2434 }
 0x53f   :  { %v2070_v1 = vadd.f32 -1.0, %v2435_v56 }
 0x540   :  { %2438 = vpow2.f32 %v1031_v52  ;;  %v1015_v54 = vadd.f32 %v1011_v35, %v1003_v10 }
 0x541   :  { %v1038_v42 = vsel %vm1018_vm9, %v1014_v63, %v2070_v1 }
 0x542   :  { %v1023_v58 = vmin.f32 %v1015_v54, 0.0  ;;  %vm1019_vm12 = vcmp.gt.f32.partialorder %v1015_v54, 0.0 }
 0x544   :  { %v2437_v47 = vpop.eup %2436  ;;  %v1029_v15 = vmul.f32 1.442695, %v1023_v58 }
 0x545   :  { %v2069_v31 = vadd.f32 -1.0, %v2437_v47 }
 0x546   :  { %v2439_v3 = vpop.eup %2438  ;;  %2440 = vpow2.f32 %v1029_v15 }
 0x547   :  { %v2072_v39 = vadd.f32 -1.0, %v2439_v3  ;;  %v1037_v5 = vsel %vm1017_vm11, %v1013_v36, %v2069_v31  ;;  %vm1272_vm11 = vcmp.ge.s32.totalorder %v3029_v24, 6 }
 0x548   :  { %v1095_v62 = vpack.c.bf16 %v1038_v42, %v1037_v5 }
 0x549   :  { %v1040_v28 = vsel %vm1020_vm10, %v1016_v16, %v2072_v39  ;;  %vm1267_vm10 = vcmp.lt.s32.totalorder %v3029_v24, 6 }
 0x54a   :  { %v2283_v7 = vpack.i.bf16 %v1040_v28, %v1038_v42  ;;  %v1129_v20 = vunpack.c.l.b16 %v1095_v62  ;;  %v1130_v25 = vunpack.c.h.b16 %v1095_v62 }
 0x54c   :  { %v2441_v9 = vpop.eup %2440  ;;  %2284 = vrot.lane.b32.xlu0 %v2283_v7, %s2499_s4 }
 0x54d   :  { %v2071_v57 = vadd.f32 -1.0, %v2441_v9 }
 0x54f   :  { %v1039_v13 = vsel %vm1019_vm12, %v1015_v54, %v2071_v57  ;;  %vm1287_vm12 = vcmp.lt.s32.totalorder %v3029_v24, 4 }
 0x550   :  { %v1096_v18 = vpack.c.bf16 %v1040_v28, %v1039_v13  ;;  %v2298_v19 = vpack.i.bf16 %v1039_v13, %v1037_v5 }
 0x552   :  { %2299 = vrot.lane.b32.xlu1 %v2298_v19, %s2500_s10  ;;  %2289 = vrot.lane.b32.xlu2 %v2298_v19, %s2499_s4  ;;  %v1131_v22 = vunpack.c.l.b16 %v1096_v18  ;;  %v1132_v27 = vunpack.c.h.b16 %v1096_v18 }
 0x554   :  { %2304 = vrot.lane.b32.xlu0 %v2298_v19, %s2501_s11  ;;  %v1133_v32 = vpack.c.b16 %v1131_v22, %v1129_v20  ;;  %v1134_v34 = vpack.c.b16 %v1132_v27, %v1130_v25 }
 0x556   :  { %1149 = vmatpush.bf16.msrb.mxu3 %v1133_v32  ;;  %1163 = vmatpush.bf16.msra.mxu0 %v1134_v34 }
 0x55a   :  { %2309 = vrot.lane.b32.xlu1 %v2283_v7, %s2501_s11  ;;  %2294 = vrot.lane.b32.xlu2 %v2283_v7, %s2500_s10 }
 0x55c   :  { %1180 = vperm.xlu0 %2313, %v848_v12  }
 0x562   :  { %1188 = vperm.xlu1 %2282, %v847_v38   ;;  %1175 = vperm.xlu2 %2248, %v847_v38  }
 0x564   :  { %2347 = vset.pattern.permute.xlu0 %v2496_v55 }
 0x56a   :  { %2314 = vset.pattern.permute.xlu2 %v2496_v55  ;;  %2345 = vset.pattern.permute.xlu1 %v2497_v61 }
 0x56b   :  { %1192 = vperm.xlu2 %2314, %v848_v12  }
 0x573   :  { %2346 = vset.pattern.permute.xlu2 %v2497_v61 }
 0x5ac   :  { %v2290_v60 = vpop.permute.xlu2 %2289 }
 0x5ad   :  { %v2292_v41 = vunpack.i.h.bf16 %v2290_v60  ;;  %v2291_v43 = vunpack.i.l.bf16 %v2290_v60 }
 0x5b4   :  { %v2295_v59 = vpop.permute.xlu2 %2294 }
 0x5b5   :  { %v2297_v33 = vunpack.i.h.bf16 %v2295_v59  ;;  %v2296_v26 = vunpack.i.l.bf16 %v2295_v59 }
 0x5be   :  { %v2285_v29 = vpop.permute.xlu0 %2284 }
 0x5bf   :  { %v2287_v44 = vunpack.i.h.bf16 %v2285_v29  ;;  %v2286_v46 = vunpack.i.l.bf16 %v2285_v29 }
 0x5c1   :  { %v1085_v48 = vsel %vm901_vm1, %v2291_v43, %v2286_v46  ;;  %v1086_v49 = vsel %vm901_vm1, %v2292_v41, %v2287_v44  ;;  %v1087_v23 = vsel %vm901_vm1, %v2286_v46, %v2291_v43  ;;  %v1088_v53 = vsel %vm901_vm1, %v2287_v44, %v2292_v41 }
 0x5c2   :  { %v1089_v0 = vsel %vm906_vm2, %v1087_v23, 0.0  ;;  %v1090_v21 = vsel %vm906_vm2, %v1085_v48, 0.0  ;;  %v1091_v63 = vsel %vm906_vm2, %v1088_v53, 0.0  ;;  %v1092_v40 = vsel %vm906_vm2, %v1086_v49, 0.0  ;;  %v2191_v23 = vld [vmem:[%s3448_s3 + $0x8] sm:$0xff]  ;;  %v1176_v53 = vpop.permute.xlu2 %1175 }
 0x5c3   :  { %v1093_v45 = vpack.c.bf16 %v1090_v21, %v1089_v0  ;;  %v1094_v14 = vpack.c.bf16 %v1092_v40, %v1091_v63 }
 0x5c4   :  { %v2300_v35 = vpop.permute.xlu1 %2299 }
 0x5c5   :  { %v2302_v17 = vunpack.i.h.bf16 %v2300_v35  ;;  %v2301_v36 = vunpack.i.l.bf16 %v2300_v35  ;;  %v1119_v6 = vunpack.c.l.b16 %v1093_v45  ;;  %v1121_v37 = vunpack.c.l.b16 %v1094_v14 }
 0x5c6   :  { %v1120_v16 = vunpack.c.h.b16 %v1093_v45  ;;  %v1122_v50 = vunpack.c.h.b16 %v1094_v14  ;;  %v2305_v3 = vpop.permute.xlu0 %2304 }
 0x5c7   :  { %v1067_v51 = vsel %vm881_vm4, %v2301_v36, %v2296_v26  ;;  %v1068_v30 = vsel %vm881_vm4, %v2302_v17, %v2297_v33  ;;  %v1069_v52 = vsel %vm881_vm4, %v2296_v26, %v2301_v36  ;;  %v1070_v10 = vsel %vm881_vm4, %v2297_v33, %v2302_v17 }
 0x5c8   :  { %v1071_v54 = vsel %vm886_vm8, %v1069_v52, 0.0  ;;  %v1072_v56 = vsel %vm886_vm8, %v1067_v51, 0.0  ;;  %v1073_v58 = vsel %vm886_vm8, %v1070_v10, 0.0  ;;  %v1074_v47 = vsel %vm886_vm8, %v1068_v30, 0.0 }
 0x5c9   :  { %v1123_v15 = vpack.c.b16 %v1121_v37, %v1119_v6  ;;  %v1124_v1 = vpack.c.b16 %v1122_v50, %v1120_v16  ;;  %v1075_v31 = vpack.c.bf16 %v1072_v56, %v1071_v54  ;;  %v1076_v39 = vpack.c.bf16 %v1074_v47, %v1073_v58 }
 0x5ca   :  { %v2307_v62 = vunpack.i.h.bf16 %v2305_v3  ;;  %v2306_v57 = vunpack.i.l.bf16 %v2305_v3  ;;  %v1193_v36 = vpop.permute.xlu2 %1192 }
 0x5cb   :  { %1150 = vmatpush.bf16.msrb.mxu3 %v1123_v15  ;;  %1164 = vmatpush.bf16.msra.mxu0 %v1124_v1  ;;  %v1109_v28 = vunpack.c.l.b16 %v1075_v31  ;;  %v1111_v5 = vunpack.c.l.b16 %v1076_v39  ;;  %v1110_v7 = vunpack.c.h.b16 %v1075_v31  ;;  %v1112_v9 = vunpack.c.h.b16 %v1076_v39 }
 0x5cc   :  { %v2310_v42 = vpop.permute.xlu1 %2309 }
 0x5cd   :  { %v2312_v13 = vunpack.i.h.bf16 %v2310_v42  ;;  %v2311_v18 = vunpack.i.l.bf16 %v2310_v42  ;;  %v1113_v19 = vpack.c.b16 %v1111_v5, %v1109_v28  ;;  %v1114_v20 = vpack.c.b16 %v1112_v9, %v1110_v7 }
 0x5ce   :  { %v1181_v33 = vpop.permute.xlu0 %1180 }
 0x5cf   :  { %v1050_v22 = vsel %vm861_vm0, %v2307_v62, %v2312_v13  ;;  %v1052_v25 = vsel %vm861_vm0, %v2312_v13, %v2307_v62  ;;  %v1049_v27 = vsel %vm861_vm0, %v2306_v57, %v2311_v18  ;;  %v1051_v32 = vsel %vm861_vm0, %v2311_v18, %v2306_v57  ;;  %1151 = vmatpush.bf16.msrb.mxu3 %v1113_v19 }
 0x5d0   :  { %v1055_v34 = vsel %vm866_vm3, %v1052_v25, 0.0  ;;  %v1056_v38 = vsel %vm866_vm3, %v1050_v22, 0.0  ;;  %v1053_v60 = vsel %vm866_vm3, %v1051_v32, 0.0  ;;  %v1054_v12 = vsel %vm866_vm3, %v1049_v27, 0.0  ;;  %1165 = vmatpush.bf16.msra.mxu0 %v1114_v20 }
 0x5d1   :  { %v1057_v29 = vpack.c.bf16 %v1054_v12, %v1053_v60  ;;  %v1058_v41 = vpack.c.bf16 %v1056_v38, %v1055_v34 }
 0x5d3   :  { %v1099_v43 = vunpack.c.l.b16 %v1057_v29  ;;  %v1101_v44 = vunpack.c.l.b16 %v1058_v41  ;;  %v1100_v46 = vunpack.c.h.b16 %v1057_v29  ;;  %v1102_v59 = vunpack.c.h.b16 %v1058_v41 }
 0x5d4   :  { %v1189_v63 = vpop.permute.xlu1 %1188 }
 0x5d5   :  { %v1103_v48 = vpack.c.b16 %v1101_v44, %v1099_v43  ;;  %v1104_v49 = vpack.c.b16 %v1102_v59, %v1100_v46 }
 0x5d7   :  { %1152 = vmatpush.bf16.msrb.mxu3 %v1103_v48  ;;  %1166 = vmatpush.bf16.msra.mxu0 %v1104_v49 }
 0x5da   :  { %2077 = vmatmul.msk.bf16.vlgmr.msrb.gmra.mxu3 %vm647_vm7, %v2191_v23  ;;  %2078 = vmatmul.msk.bf16.vlgmr.msra.gmra.mxu0 %vm647_vm7, %v2191_v23 }
 0x657   :  { %v1168_v0 = vpop.f32.mrf.mxu0 }
 0x658   :  { %v1184_v21 = vmul.f32 %v1176_v53, %v1168_v0 }
 0x65a   :  { %v1196_v40 = vadd.f32 %v1189_v63, %v1184_v21 }
 0x65c   :  { %v1204_v45 = vmin.f32 %v1196_v40, 0.0  ;;  %vm1200_vm13 = vcmp.gt.f32.partialorder %v1196_v40, 0.0 }
 0x65d   :  { %v1154_v14 = vpop.f32.mrf.mxu3 }
 0x65e   :  { %v1209_v26 = vmul.f32 1.442695, %v1204_v45  ;;  %v1183_v35 = vmul.f32 %v1176_v53, %v1154_v14 }
 0x65f   :  { %v1170_v17 = vpop.f32.mrf.mxu0 }
 0x660   :  { %2442 = vpow2.f32 %v1209_v26  ;;  %v1195_v6 = vadd.f32 %v1189_v63, %v1183_v35  ;;  %v1186_v37 = vmul.f32 %v1181_v33, %v1170_v17  ;;  %v1251_v17 = vld [vmem:[%s3444_s6 + $0x70] sm:$0xff] }
 0x662   :  { %v1203_v16 = vmin.f32 %v1195_v6, 0.0  ;;  %v1198_v50 = vadd.f32 %v1193_v36, %v1186_v37  ;;  %vm1199_vm14 = vcmp.gt.f32.partialorder %v1195_v6, 0.0 }
 0x664   :  { %v1207_v51 = vmul.f32 1.442695, %v1203_v16  ;;  %v1206_v30 = vmin.f32 %v1198_v50, 0.0  ;;  %vm1202_vm15 = vcmp.gt.f32.partialorder %v1198_v50, 0.0 }
 0x665   :  { %v1156_v52 = vpop.f32.mrf.mxu3 }
 0x666   :  { %v2443_v10 = vpop.eup %2442  ;;  %2444 = vpow2.f32 %v1207_v51  ;;  %v1213_v54 = vmul.f32 1.442695, %v1206_v30  ;;  %v1185_v56 = vmul.f32 %v1181_v33, %v1156_v52 }
 0x667   :  { %v2080_v58 = vadd.f32 -1.0, %v2443_v10 }
 0x668   :  { %2446 = vpow2.f32 %v1213_v54  ;;  %v1197_v47 = vadd.f32 %v1193_v36, %v1185_v56  ;;  %v1252_v36 = vld [vmem:[%s3444_s6 + $0x78] sm:$0xff] }
 0x669   :  { %v1220_v15 = vsel %vm1200_vm13, %v1196_v40, %v2080_v58  ;;  %vm1292_vm13 = vcmp.ge.s32.totalorder %v3029_v24, 4 }
 0x66a   :  { %v1224_v1 = vadd.f32 %v1220_v15, %v3005_v8  ;;  %v1205_v3 = vmin.f32 %v1197_v47, 0.0  ;;  %vm1201_vm0 = vcmp.gt.f32.partialorder %v1197_v47, 0.0 }
 0x66c   :  { %v2445_v31 = vpop.eup %2444  ;;  %v1232_v39 = vmin.f32 %v1224_v1, 0.0  ;;  %v1211_v42 = vmul.f32 1.442695, %v1205_v3  ;;  %vm1228_vm2 = vcmp.gt.f32.partialorder %v1224_v1, 0.0 }
 0x66d   :  { %v2079_v28 = vadd.f32 -1.0, %v2445_v31 }
 0x66e   :  { %v2447_v5 = vpop.eup %2446  ;;  %2448 = vpow2.f32 %v1211_v42  ;;  %v1237_v62 = vmul.f32 1.442695, %v1232_v39 }
 0x66f   :  { %v1219_v7 = vsel %vm1199_vm14, %v1195_v6, %v2079_v28  ;;  %v2082_v9 = vadd.f32 -1.0, %v2447_v5 }
 0x670   :  { %v1223_v57 = vadd.f32 %v1219_v7, %v2999_v4  ;;  %2450 = vpow2.f32 %v1237_v62 }
 0x671   :  { %v1222_v13 = vsel %vm1202_vm15, %v1198_v50, %v2082_v9 }
 0x672   :  { %v1231_v18 = vmin.f32 %v1223_v57, 0.0  ;;  %v1226_v19 = vadd.f32 %v1222_v13, %v3008_v11  ;;  %vm1227_vm3 = vcmp.gt.f32.partialorder %v1223_v57, 0.0 }
 0x674   :  { %v2449_v20 = vpop.eup %2448  ;;  %v1235_v8 = vmul.f32 1.442695, %v1231_v18  ;;  %v1234_v22 = vmin.f32 %v1226_v19, 0.0  ;;  %vm1230_vm1 = vcmp.gt.f32.partialorder %v1226_v19, 0.0 }
 0x675   :  { %v2081_v25 = vadd.f32 -1.0, %v2449_v20 }
 0x676   :  { %2452 = vpow2.f32 %v1235_v8  ;;  %v1241_v27 = vmul.f32 1.442695, %v1234_v22  ;;  %v2451_v38 = vpop.eup %2450 }
 0x677   :  { %v1221_v32 = vsel %vm1201_vm0, %v1197_v47, %v2081_v25  ;;  %v2084_v29 = vadd.f32 -1.0, %v2451_v38 }
 0x678   :  { %2454 = vpow2.f32 %v1241_v27  ;;  %v1225_v34 = vadd.f32 %v1221_v32, %v2996_v2 }
 0x679   :  { %v3163_v44 = vsel %vm1228_vm2, %v1224_v1, %v2084_v29 }
 0x67a   :  { %v1233_v60 = vmin.f32 %v1225_v34, 0.0  ;;  %vm1229_vm9 = vcmp.gt.f32.partialorder %v1225_v34, 0.0 }
 0x67c   :  { %v2453_v4 = vpop.eup %2452  ;;  %v1239_v12 = vmul.f32 1.442695, %v1233_v60 }
 0x67d   :  { %v2083_v11 = vadd.f32 -1.0, %v2453_v4 }
 0x67e   :  { %v2455_v41 = vpop.eup %2454  ;;  %2456 = vpow2.f32 %v1239_v12 }
 0x67f   :  { %v2086_v43 = vadd.f32 -1.0, %v2455_v41  ;;  %v3169_v2 = vsel %vm1227_vm3, %v1223_v57, %v2083_v11 }
 0x680   :  { %v1317_v23 = vpack.c.bf16 %v3163_v44, %v3169_v2 }
 0x681   :  { %v3165_v46 = vsel %vm1230_vm1, %v1226_v19, %v2086_v43 }
 0x682   :  { %v2315_v59 = vpack.i.bf16 %v3165_v46, %v3163_v44  ;;  %v1351_v63 = vunpack.c.l.b16 %v1317_v23  ;;  %v1352_v45 = vunpack.c.h.b16 %v1317_v23 }
 0x684   :  { %v2457_v48 = vpop.eup %2456  ;;  %2316 = vrot.lane.b32.xlu2 %v2315_v59, %s2500_s10 }
 0x685   :  { %v2085_v49 = vadd.f32 -1.0, %v2457_v48 }
 0x687   :  { %v3174_v53 = vsel %vm1229_vm9, %v1225_v34, %v2085_v49 }
 0x688   :  { %v2330_v0 = vpack.i.bf16 %v3174_v53, %v3169_v2  ;;  %v1318_v21 = vpack.c.bf16 %v3165_v46, %v3174_v53 }
 0x68a   :  { %2331 = vrot.lane.b32.xlu0 %v2330_v0, %s2502_s23  ;;  %2321 = vrot.lane.b32.xlu1 %v2330_v0, %s2500_s10  ;;  %v1353_v40 = vunpack.c.l.b16 %v1318_v21  ;;  %v1354_v14 = vunpack.c.h.b16 %v1318_v21 }
 0x68c   :  { %2336 = vrot.lane.b32.xlu2 %v2330_v0, %s2503_s24  ;;  %v1355_v33 = vpack.c.b16 %v1353_v40, %v1351_v63  ;;  %v1356_v26 = vpack.c.b16 %v1354_v14, %v1352_v45 }
 0x68e   :  { %1371 = vmatpush.bf16.msra.mxu2 %v1355_v33  ;;  %1385 = vmatpush.bf16.msra.mxu1 %v1356_v26 }
 0x692   :  { %2341 = vrot.lane.b32.xlu0 %v2315_v59, %s2503_s24  ;;  %2326 = vrot.lane.b32.xlu1 %v2315_v59, %s2502_s23 }
 0x694   :  { %1402 = vperm.xlu2 %2346, %v1252_v36  }
 0x69a   :  { %1397 = vperm.xlu1 %2345, %v1251_v17   ;;  %1410 = vperm.xlu0 %2347, %v1251_v17  }
 0x69c   :  { %2381 = vset.pattern.permute.xlu2 %v2496_v55 }
 0x6a2   :  { %2348 = vset.pattern.permute.xlu1 %v2496_v55  ;;  %2379 = vset.pattern.permute.xlu0 %v2497_v61 }
 0x6a3   :  { %1414 = vperm.xlu1 %2348, %v1252_v36  }
 0x6ab   :  { %2380 = vset.pattern.permute.xlu1 %v2497_v61 }
 0x6de   :  { %v2317_v35 = vpop.permute.xlu2 %2316 }
 0x6df   :  { %v2319_v16 = vunpack.i.h.bf16 %v2317_v35  ;;  %v2318_v50 = vunpack.i.l.bf16 %v2317_v35 }
 0x6e6   :  { %v2337_v3 = vpop.permute.xlu2 %2336 }
 0x6e7   :  { %v2339_v9 = vunpack.i.h.bf16 %v2337_v3  ;;  %v2338_v62 = vunpack.i.l.bf16 %v2337_v3 }
 0x6fc   :  { %v2332_v6 = vpop.permute.xlu0 %2331  ;;  %v2322_v37 = vpop.permute.xlu1 %2321 }
 0x6fd   :  { %v2324_v51 = vunpack.i.h.bf16 %v2322_v37  ;;  %v2323_v30 = vunpack.i.l.bf16 %v2322_v37  ;;  %v2334_v22 = vunpack.i.h.bf16 %v2332_v6  ;;  %v2333_v25 = vunpack.i.l.bf16 %v2332_v6 }
 0x6ff   :  { %v1308_v52 = vsel %vm881_vm4, %v2324_v51, %v2319_v16  ;;  %v1310_v10 = vsel %vm881_vm4, %v2319_v16, %v2324_v51  ;;  %v1307_v54 = vsel %vm881_vm4, %v2323_v30, %v2318_v50  ;;  %v1309_v56 = vsel %vm881_vm4, %v2318_v50, %v2323_v30 }
 0x700   :  { %v1313_v58 = vsel %vm886_vm8, %v1310_v10, 0.0  ;;  %v1314_v47 = vsel %vm886_vm8, %v1308_v52, 0.0  ;;  %v1311_v15 = vsel %vm886_vm8, %v1309_v56, 0.0  ;;  %v1312_v1 = vsel %vm886_vm8, %v1307_v54, 0.0  ;;  %v2192_v54 = vld [vmem:[%s3448_s3 + $0x10] sm:$0xff] }
 0x701   :  { %v1315_v31 = vpack.c.bf16 %v1312_v1, %v1311_v15  ;;  %v1316_v39 = vpack.c.bf16 %v1314_v47, %v1313_v58 }
 0x703   :  { %v1341_v42 = vunpack.c.l.b16 %v1315_v31  ;;  %v1343_v28 = vunpack.c.l.b16 %v1316_v39  ;;  %v1342_v5 = vunpack.c.h.b16 %v1315_v31  ;;  %v1344_v7 = vunpack.c.h.b16 %v1316_v39  ;;  %v1403_v31 = vpop.permute.xlu2 %1402 }
 0x704   :  { %v2342_v57 = vpop.permute.xlu0 %2341  ;;  %v2327_v13 = vpop.permute.xlu1 %2326 }
 0x705   :  { %v2344_v18 = vunpack.i.h.bf16 %v2342_v57  ;;  %v2343_v19 = vunpack.i.l.bf16 %v2342_v57  ;;  %v2329_v20 = vunpack.i.h.bf16 %v2327_v13  ;;  %v2328_v8 = vunpack.i.l.bf16 %v2327_v13 }
 0x706   :  { %v1345_v27 = vpack.c.b16 %v1343_v28, %v1341_v42  ;;  %v1346_v32 = vpack.c.b16 %v1344_v7, %v1342_v5 }
 0x707   :  { %v1269_v34 = vsel %vm1267_vm10, %v2339_v9, %v2344_v18  ;;  %v1271_v38 = vsel %vm1267_vm10, %v2344_v18, %v2339_v9  ;;  %v1268_v60 = vsel %vm1267_vm10, %v2338_v62, %v2343_v19  ;;  %v1270_v4 = vsel %vm1267_vm10, %v2343_v19, %v2338_v62 }
 0x708   :  { %v1275_v12 = vsel %vm1272_vm11, %v1271_v38, 0.0  ;;  %v1276_v29 = vsel %vm1272_vm11, %v1269_v34, 0.0  ;;  %v1273_v41 = vsel %vm1272_vm11, %v1270_v4, 0.0  ;;  %v1274_v11 = vsel %vm1272_vm11, %v1268_v60, 0.0  ;;  %1372 = vmatpush.bf16.msra.mxu2 %v1345_v27  ;;  %1386 = vmatpush.bf16.msra.mxu1 %v1346_v32 }
 0x709   :  { %v1289_v43 = vsel %vm1287_vm12, %v2334_v22, %v2329_v20  ;;  %v1291_v59 = vsel %vm1287_vm12, %v2329_v20, %v2334_v22  ;;  %v1288_v48 = vsel %vm1287_vm12, %v2333_v25, %v2328_v8  ;;  %v1290_v49 = vsel %vm1287_vm12, %v2328_v8, %v2333_v25 }
 0x70a   :  { %v1295_v23 = vsel %vm1292_vm13, %v1291_v59, 0.0  ;;  %v1296_v0 = vsel %vm1292_vm13, %v1289_v43, 0.0  ;;  %v1293_v21 = vsel %vm1292_vm13, %v1290_v49, 0.0  ;;  %v1294_v63 = vsel %vm1292_vm13, %v1288_v48, 0.0 }
 0x70b   :  { %v1297_v40 = vpack.c.bf16 %v1294_v63, %v1293_v21  ;;  %v1298_v45 = vpack.c.bf16 %v1296_v0, %v1295_v23  ;;  %v1277_v14 = vpack.c.bf16 %v1274_v11, %v1273_v41  ;;  %v1278_v33 = vpack.c.bf16 %v1276_v29, %v1275_v12 }
 0x70c   :  { %v1398_v56 = vpop.permute.xlu1 %1397  ;;  %v1411_v47 = vpop.permute.xlu0 %1410 }
 0x70d   :  { %v1331_v26 = vunpack.c.l.b16 %v1297_v40  ;;  %v1333_v35 = vunpack.c.l.b16 %v1298_v45  ;;  %v1332_v17 = vunpack.c.h.b16 %v1297_v40  ;;  %v1334_v36 = vunpack.c.h.b16 %v1298_v45 }
 0x70e   :  { %v1321_v6 = vunpack.c.l.b16 %v1277_v14  ;;  %v1323_v37 = vunpack.c.l.b16 %v1278_v33  ;;  %v1322_v51 = vunpack.c.h.b16 %v1277_v14  ;;  %v1324_v30 = vunpack.c.h.b16 %v1278_v33 }
 0x70f   :  { %v1335_v16 = vpack.c.b16 %v1333_v35, %v1331_v26  ;;  %v1336_v50 = vpack.c.b16 %v1334_v36, %v1332_v17  ;;  %v1253_v36 = vld [vmem:[%s3444_s6 + $0x80] sm:$0xff] }
 0x710   :  { %v1325_v52 = vpack.c.b16 %v1323_v37, %v1321_v6  ;;  %v1326_v10 = vpack.c.b16 %v1324_v30, %v1322_v51  ;;  %v1254_v6 = vld [vmem:[%s3444_s6 + $0x88] sm:$0xff] }
 0x711   :  { %1373 = vmatpush.bf16.msra.mxu2 %v1335_v16  ;;  %1387 = vmatpush.bf16.msra.mxu1 %v1336_v50 }
 0x715   :  { %1374 = vmatpush.bf16.msra.mxu2 %v1325_v52  ;;  %1388 = vmatpush.bf16.msra.mxu1 %v1326_v10  ;;  %v1415_v5 = vpop.permute.xlu1 %1414 }
 0x718   :  { %2092 = vmatmul.msk.bf16.vlgmr.msra.gmra.mxu1 %vm647_vm7, %v2192_v54  ;;  %2091 = vmatmul.msk.bf16.vlgmr.msra.gmra.mxu2 %vm647_vm7, %v2192_v54 }
 0x795   :  { %v1390_v58 = vpop.f32.mrf.mxu1 }
 0x796   :  { %v1406_v15 = vmul.f32 %v1398_v56, %v1390_v58 }
 0x798   :  { %v1418_v1 = vadd.f32 %v1411_v47, %v1406_v15 }
 0x79a   :  { %v1426_v3 = vmin.f32 %v1418_v1, 0.0  ;;  %vm1422_vm14 = vcmp.gt.f32.partialorder %v1418_v1, 0.0 }
 0x79b   :  { %v1376_v39 = vpop.f32.mrf.mxu2 }
 0x79c   :  { %v1405_v42 = vmul.f32 %v1398_v56, %v1376_v39  ;;  %v1431_v62 = vmul.f32 1.442695, %v1426_v3 }
 0x79d   :  { %v1392_v28 = vpop.f32.mrf.mxu1 }
 0x79e   :  { %v1408_v7 = vmul.f32 %v1403_v31, %v1392_v28  ;;  %v1417_v9 = vadd.f32 %v1411_v47, %v1405_v42  ;;  %2458 = vpow2.f32 %v1431_v62 }
 0x7a0   :  { %v1425_v57 = vmin.f32 %v1417_v9, 0.0  ;;  %v1420_v13 = vadd.f32 %v1415_v5, %v1408_v7  ;;  %vm1421_vm0 = vcmp.gt.f32.partialorder %v1417_v9, 0.0 }
 0x7a2   :  { %v1429_v18 = vmul.f32 1.442695, %v1425_v57  ;;  %v1428_v19 = vmin.f32 %v1420_v13, 0.0  ;;  %vm1424_vm15 = vcmp.gt.f32.partialorder %v1420_v13, 0.0 }
 0x7a3   :  { %v1378_v20 = vpop.f32.mrf.mxu2 }
 0x7a4   :  { %2460 = vpow2.f32 %v1429_v18  ;;  %v1435_v8 = vmul.f32 1.442695, %v1428_v19  ;;  %v1407_v22 = vmul.f32 %v1403_v31, %v1378_v20  ;;  %v2459_v27 = vpop.eup %2458 }
 0x7a5   :  { %v2094_v60 = vadd.f32 -1.0, %v2459_v27 }
 0x7a6   :  { %2462 = vpow2.f32 %v1435_v8  ;;  %v1419_v25 = vadd.f32 %v1415_v5, %v1407_v22 }
 0x7a7   :  { %v1442_v41 = vsel %vm1422_vm14, %v1418_v1, %v2094_v60  ;;  %vm1880_vm14 = vcmask 1043459  }
 0x7a8   :  { %v1427_v32 = vmin.f32 %v1419_v25, 0.0  ;;  %vm1423_vm1 = vcmp.gt.f32.partialorder %v1419_v25, 0.0 }
 0x7aa   :  { %v2461_v34 = vpop.eup %2460  ;;  %v1433_v38 = vmul.f32 1.442695, %v1427_v32 }
 0x7ab   :  { %v2093_v12 = vadd.f32 -1.0, %v2461_v34 }
 0x7ac   :  { %v2463_v4 = vpop.eup %2462  ;;  %2464 = vpow2.f32 %v1433_v38 }
 0x7ad   :  { %v2096_v29 = vadd.f32 -1.0, %v2463_v4  ;;  %v1441_v43 = vsel %vm1421_vm0, %v1417_v9, %v2093_v12  ;;  %vm1961_vm0 = vcmask 11264  }
 0x7ae   :  { %v1499_v49 = vpack.c.bf16 %v1442_v41, %v1441_v43 }
 0x7af   :  { %v1444_v11 = vsel %vm1424_vm15, %v1420_v13, %v2096_v29  ;;  %vm1883_vm15 = vcmask 125952  }
 0x7b0   :  { %v2349_v59 = vpack.i.bf16 %v1444_v11, %v1442_v41  ;;  %v1533_v40 = vunpack.c.l.b16 %v1499_v49  ;;  %v1534_v14 = vunpack.c.h.b16 %v1499_v49 }
 0x7b2   :  { %v2465_v48 = vpop.eup %2464  ;;  %2350 = vrot.lane.b32.xlu1 %v2349_v59, %s2500_s10  ;;  %2355 = vrot.lane.b32.xlu0 %v2349_v59, %s2502_s23 }
 0x7b3   :  { %v2095_v23 = vadd.f32 -1.0, %v2465_v48 }
 0x7b5   :  { %v1443_v0 = vsel %vm1423_vm1, %v1419_v25, %v2095_v23 }
 0x7b6   :  { %v1500_v21 = vpack.c.bf16 %v1444_v11, %v1443_v0  ;;  %v2359_v63 = vpack.i.bf16 %v1443_v0, %v1441_v43 }
 0x7b8   :  { %2360 = vrot.lane.b32.xlu2 %v2359_v63, %s2500_s10  ;;  %v1535_v45 = vunpack.c.l.b16 %v1500_v21  ;;  %v1536_v33 = vunpack.c.h.b16 %v1500_v21 }
 0x7ba   :  { %2370 = vrot.lane.b32.xlu1 %v2359_v63, %s2503_s24  ;;  %v1537_v26 = vpack.c.b16 %v1535_v45, %v1533_v40  ;;  %v1538_v35 = vpack.c.b16 %v1536_v33, %v1534_v14  ;;  %1579 = vperm.xlu0 %2379, %v1253_v36  }
 0x7bc   :  { %1553 = vmatpush.bf16.msra.mxu3 %v1537_v26  ;;  %1567 = vmatpush.bf16.msrb.mxu0 %v1538_v35 }
 0x7c0   :  { %2365 = vrot.lane.b32.xlu2 %v2359_v63, %s2502_s23 }
 0x7c2   :  { %1584 = vperm.xlu1 %2380, %v1254_v6  }
 0x7c8   :  { %2375 = vrot.lane.b32.xlu2 %v2349_v59, %s2503_s24 }
 0x7ca   :  { %2382 = vset.pattern.permute.xlu1 %v2496_v55 }
 0x7cb   :  { %1596 = vperm.xlu1 %2382, %v1254_v6  }
 0x7d0   :  { %1592 = vperm.xlu2 %2381, %v1253_v36  }
 0x7d3   :  { %2383 = vset.pattern.permute.xlu1 %v2497_v61  ;;  %v2193_v61 = vld [vmem:[%s3448_s3 + $0x18] sm:$0xff] }
 0x812   :  { %v2361_v17 = vpop.permute.xlu2 %2360 }
 0x813   :  { %v2363_v16 = vunpack.i.h.bf16 %v2361_v17  ;;  %v2362_v50 = vunpack.i.l.bf16 %v2361_v17 }
 0x81a   :  { %v2366_v37 = vpop.permute.xlu2 %2365 }
 0x81b   :  { %v2368_v58 = vunpack.i.h.bf16 %v2366_v37  ;;  %v2367_v47 = vunpack.i.l.bf16 %v2366_v37 }
 0x822   :  { %v2376_v57 = vpop.permute.xlu2 %2375 }
 0x823   :  { %v2378_v32 = vunpack.i.h.bf16 %v2376_v57  ;;  %v2377_v34 = vunpack.i.l.bf16 %v2376_v57 }
 0x824   :  { %v2351_v51 = vpop.permute.xlu1 %2350  ;;  %v2356_v30 = vpop.permute.xlu0 %2355 }
 0x825   :  { %v2353_v52 = vunpack.i.h.bf16 %v2351_v51  ;;  %v2352_v10 = vunpack.i.l.bf16 %v2351_v51  ;;  %v2358_v54 = vunpack.i.h.bf16 %v2356_v30  ;;  %v2357_v56 = vunpack.i.l.bf16 %v2356_v30 }
 0x827   :  { %v1489_v15 = vsel %vm881_vm4, %v2362_v50, %v2352_v10  ;;  %v1490_v1 = vsel %vm881_vm4, %v2363_v16, %v2353_v52  ;;  %v1491_v3 = vsel %vm881_vm4, %v2352_v10, %v2362_v50  ;;  %v1492_v31 = vsel %vm881_vm4, %v2353_v52, %v2363_v16 }
 0x828   :  { %v1493_v39 = vsel %vm886_vm8, %v1491_v3, 0.0  ;;  %v1494_v42 = vsel %vm886_vm8, %v1489_v15, 0.0  ;;  %v1495_v28 = vsel %vm886_vm8, %v1492_v31, 0.0  ;;  %v1496_v5 = vsel %vm886_vm8, %v1490_v1, 0.0  ;;  %v2200_v15 = vld [vmem:[%s3449_s7 + $0x30] sm:$0xff]  ;;  %v2206_v1 = vld [vmem:[%s3449_s7 + $0x60] sm:$0xff] }
 0x829   :  { %v1471_v7 = vsel %vm1287_vm12, %v2367_v47, %v2357_v56  ;;  %v1472_v9 = vsel %vm1287_vm12, %v2368_v58, %v2358_v54  ;;  %v1473_v55 = vsel %vm1287_vm12, %v2357_v56, %v2367_v47  ;;  %v1474_v62 = vsel %vm1287_vm12, %v2358_v54, %v2368_v58  ;;  %v2209_v54 = vld [vmem:[%s3449_s7 + $0x78] sm:$0xff]  ;;  %v2208_v56 = vld [vmem:[%s3449_s7 + $0x70] sm:$0xff]  ;;  %v2207_v47 = vld [vmem:[%s3449_s7 + $0x68] sm:$0xff] }
 0x82a   :  { %v1475_v13 = vsel %vm1292_vm13, %v1473_v55, 0.0  ;;  %v1476_v18 = vsel %vm1292_vm13, %v1471_v7, 0.0  ;;  %v1477_v19 = vsel %vm1292_vm13, %v1474_v62, 0.0  ;;  %v1478_v20 = vsel %vm1292_vm13, %v1472_v9, 0.0  ;;  %1799 = vmatpush.bf16.msrb.mxu1 %v2209_v54  ;;  %v2201_v58 = vld [vmem:[%s3449_s7 + $0x38] sm:$0xff]  ;;  %v2199_v3 = vld [vmem:[%s3449_s7 + $0x28] sm:$0xff] }
 0x82b   :  { %v1497_v8 = vpack.c.bf16 %v1494_v42, %v1493_v39  ;;  %v1498_v22 = vpack.c.bf16 %v1496_v5, %v1495_v28  ;;  %v1479_v25 = vpack.c.bf16 %v1476_v18, %v1475_v13  ;;  %v1480_v38 = vpack.c.bf16 %v1478_v20, %v1477_v19  ;;  %1785 = vmatpush.bf16.msrb.mxu2 %v2201_v58  ;;  %v2205_v42 = vld [vmem:[%s3449_s7 + $0x58] sm:$0xff]  ;;  %v1593_v5 = vpop.permute.xlu2 %1592  ;;  %v2198_v9 = vld [vmem:[%s3449_s7 + $0x20] sm:$0xff]  ;;  %v2204_v62 = vld [vmem:[%s3449_s7 + $0x50] sm:$0xff] }
 0x82c   :  { %v2371_v27 = vpop.permute.xlu1 %2370  ;;  %v1580_v31 = vpop.permute.xlu0 %1579  ;;  %v2197_v13 = vld [vmem:[%s3449_s7 + $0x18] sm:$0xff]  ;;  %vm1876_vm12 = vcmask 1041409   ;;  %vm1878_vm13 = vcmask 1042434  }
 0x82d   :  { %v2373_v60 = vunpack.i.h.bf16 %v2371_v27  ;;  %v2372_v4 = vunpack.i.l.bf16 %v2371_v27  ;;  %v1523_v12 = vunpack.c.l.b16 %v1497_v8  ;;  %v1525_v29 = vunpack.c.l.b16 %v1498_v22 }
 0x82e   :  { %v1524_v41 = vunpack.c.h.b16 %v1497_v8  ;;  %v1526_v11 = vunpack.c.h.b16 %v1498_v22  ;;  %v1513_v43 = vunpack.c.l.b16 %v1479_v25  ;;  %v1515_v33 = vunpack.c.l.b16 %v1480_v38  ;;  %1800 = vmatpush.bf16.msrb.mxu1 %v2208_v56  ;;  %v2203_v8 = vld [vmem:[%s3449_s7 + $0x48] sm:$0xff]  ;;  %v2196_v22 = vld [vmem:[%s3449_s7 + $0x10] sm:$0xff] }
 0x82f   :  { %v1454_v59 = vsel %vm1267_vm10, %v2373_v60, %v2378_v32  ;;  %v1456_v48 = vsel %vm1267_vm10, %v2378_v32, %v2373_v60  ;;  %v1453_v49 = vsel %vm1267_vm10, %v2372_v4, %v2377_v34  ;;  %v1455_v23 = vsel %vm1267_vm10, %v2377_v34, %v2372_v4  ;;  %1786 = vmatpush.bf16.msrb.mxu2 %v2200_v15 }
 0x830   :  { %v1459_v0 = vsel %vm1272_vm11, %v1456_v48, 0.0  ;;  %v1460_v21 = vsel %vm1272_vm11, %v1454_v59, 0.0  ;;  %v1457_v63 = vsel %vm1272_vm11, %v1455_v23, 0.0  ;;  %v1458_v40 = vsel %vm1272_vm11, %v1453_v49, 0.0  ;;  %v2194_v49 = vld [vmem:[%s3449_s7] sm:$0xff] }
 0x831   :  { %v1527_v45 = vpack.c.b16 %v1525_v29, %v1523_v12  ;;  %v1528_v14 = vpack.c.b16 %v1526_v11, %v1524_v41  ;;  %v1514_v26 = vunpack.c.h.b16 %v1479_v25  ;;  %v1516_v35 = vunpack.c.h.b16 %v1480_v38  ;;  %v2202_v38 = vld [vmem:[%s3449_s7 + $0x40] sm:$0xff]  ;;  %v2195_v12 = vld [vmem:[%s3449_s7 + $0x8] sm:$0xff] }
 0x832   :  { %v1461_v17 = vpack.c.bf16 %v1458_v40, %v1457_v63  ;;  %v1462_v36 = vpack.c.bf16 %v1460_v21, %v1459_v0  ;;  %v1517_v50 = vpack.c.b16 %v1515_v33, %v1513_v43  ;;  %1801 = vmatpush.bf16.msrb.mxu1 %v2207_v47 }
 0x833   :  { %1554 = vmatpush.bf16.msra.mxu3 %v1527_v45  ;;  %1568 = vmatpush.bf16.msrb.mxu0 %v1528_v14  ;;  %v1518_v51 = vpack.c.b16 %v1516_v35, %v1514_v26 }
 0x834   :  { %v1503_v6 = vunpack.c.l.b16 %v1461_v17  ;;  %v1505_v37 = vunpack.c.l.b16 %v1462_v36  ;;  %v1504_v16 = vunpack.c.h.b16 %v1461_v17  ;;  %v1506_v30 = vunpack.c.h.b16 %v1462_v36  ;;  %v1585_v39 = vpop.permute.xlu1 %1584  ;;  %1787 = vmatpush.bf16.msrb.mxu2 %v2199_v3 }
 0x836   :  { %v1507_v52 = vpack.c.b16 %v1505_v37, %v1503_v6  ;;  %v1508_v10 = vpack.c.b16 %v1506_v30, %v1504_v16  ;;  %1802 = vmatpush.bf16.msrb.mxu1 %v2206_v1 }
 0x837   :  { %1555 = vmatpush.bf16.msra.mxu3 %v1517_v50  ;;  %1569 = vmatpush.bf16.msrb.mxu0 %v1518_v51 }
 0x838   :  { %1788 = vmatpush.bf16.msrb.mxu2 %v2198_v9 }
 0x83a   :  { %1803 = vmatpush.bf16.msrb.mxu1 %v2205_v42 }
 0x83b   :  { %1556 = vmatpush.bf16.msra.mxu3 %v1507_v52  ;;  %1570 = vmatpush.bf16.msrb.mxu0 %v1508_v10 }
 0x83c   :  { %1789 = vmatpush.bf16.msrb.mxu2 %v2197_v13  ;;  %v1816_v13 = vld [vmem:[%s3450_s5 + $0x10] sm:$0xff] }
 0x83d   :  { %v1597_v27 = vpop.permute.xlu1 %1596 }
 0x83e   :  { %2101 = vmatmul.msk.bf16.vlgmr.msra.gmra.mxu3 %vm647_vm7, %v2193_v61  ;;  %2102 = vmatmul.msk.bf16.vlgmr.msrb.gmra.mxu0 %vm647_vm7, %v2193_v61 }
 0x83f   :  { %1804 = vmatpush.bf16.msrb.mxu1 %v2204_v62 }
 0x840   :  { %1790 = vmatpush.bf16.msrb.mxu2 %v2196_v22 }
 0x843   :  { %1805 = vmatpush.bf16.msrb.mxu1 %v2203_v8 }
 0x844   :  { %1791 = vmatpush.bf16.msrb.mxu2 %v2195_v12 }
 0x847   :  { %1806 = vmatpush.bf16.msrb.mxu1 %v2202_v38  ;;  %v1821_v38 = vld [vmem:[%s3450_s5 + $0x38] sm:$0xff] }
 0x848   :  { %1792 = vmatpush.bf16.msrb.mxu2 %v2194_v49 }
 0x8bb   :  { %v1572_v28 = vpop.f32.mrf.mxu0 }
 0x8bc   :  { %v1588_v7 = vmul.f32 %v1580_v31, %v1572_v28 }
 0x8be   :  { %v1600_v55 = vadd.f32 %v1593_v5, %v1588_v7 }
 0x8c0   :  { %v1608_v57 = vmin.f32 %v1600_v55, 0.0  ;;  %vm1604_vm7 = vcmp.gt.f32.partialorder %v1600_v55, 0.0 }
 0x8c1   :  { %v1558_v18 = vpop.f32.mrf.mxu3 }
 0x8c2   :  { %v1613_v19 = vmul.f32 1.442695, %v1608_v57  ;;  %v1587_v20 = vmul.f32 %v1580_v31, %v1558_v18  ;;  %v1814_v18 = vld [vmem:[%s3450_s5] sm:$0xff] }
 0x8c3   :  { %v1574_v25 = vpop.f32.mrf.mxu0 }
 0x8c4   :  { %2466 = vpow2.f32 %v1613_v19  ;;  %v1599_v32 = vadd.f32 %v1593_v5, %v1587_v20  ;;  %v1590_v34 = vmul.f32 %v1585_v39, %v1574_v25 }
 0x8c6   :  { %v1607_v60 = vmin.f32 %v1599_v32, 0.0  ;;  %v1602_v4 = vadd.f32 %v1597_v27, %v1590_v34  ;;  %vm1603_vm4 = vcmp.gt.f32.partialorder %v1599_v32, 0.0 }
 0x8c8   :  { %v1611_v29 = vmul.f32 1.442695, %v1607_v60  ;;  %v1610_v41 = vmin.f32 %v1602_v4, 0.0  ;;  %vm1606_vm8 = vcmp.gt.f32.partialorder %v1602_v4, 0.0 }
 0x8c9   :  { %v1560_v11 = vpop.f32.mrf.mxu3 }
 0x8ca   :  { %v2467_v43 = vpop.eup %2466  ;;  %2468 = vpow2.f32 %v1611_v29  ;;  %v1617_v59 = vmul.f32 1.442695, %v1610_v41  ;;  %v1589_v48 = vmul.f32 %v1585_v39, %v1560_v11  ;;  %v1817_v41 = vld [vmem:[%s3450_s5 + $0x18] sm:$0xff] }
 0x8cb   :  { %v2104_v23 = vadd.f32 -1.0, %v2467_v43 }
 0x8cc   :  { %2470 = vpow2.f32 %v1617_v59  ;;  %v1601_v0 = vadd.f32 %v1597_v27, %v1589_v48  ;;  %v1820_v27 = vld [vmem:[%s3450_s5 + $0x30] sm:$0xff]  ;;  %v1819_v59 = vld [vmem:[%s3450_s5 + $0x28] sm:$0xff] }
 0x8cd   :  { %v1624_v21 = vsel %vm1604_vm7, %v1600_v55, %v2104_v23  ;;  %v1815_v23 = vld [vmem:[%s3450_s5 + $0x8] sm:$0xff] }
 0x8ce   :  { %v1628_v63 = vadd.f32 %v1624_v21, %v3163_v44  ;;  %v1609_v40 = vmin.f32 %v1601_v0, 0.0  ;;  %vm1605_vm2 = vcmp.gt.f32.partialorder %v1601_v0, 0.0 }
 0x8d0   :  { %v2469_v45 = vpop.eup %2468  ;;  %v1636_v14 = vmin.f32 %v1628_v63, 0.0  ;;  %v1615_v33 = vmul.f32 1.442695, %v1609_v40  ;;  %vm1632_vm3 = vcmp.gt.f32.partialorder %v1628_v63, 0.0 }
 0x8d1   :  { %v2103_v26 = vadd.f32 -1.0, %v2469_v45 }
 0x8d2   :  { %v2471_v35 = vpop.eup %2470  ;;  %2472 = vpow2.f32 %v1615_v33  ;;  %v1641_v6 = vmul.f32 1.442695, %v1636_v14 }
 0x8d3   :  { %v1623_v17 = vsel %vm1603_vm4, %v1599_v32, %v2103_v26  ;;  %v2106_v36 = vadd.f32 -1.0, %v2471_v35 }
 0x8d4   :  { %v1627_v37 = vadd.f32 %v1623_v17, %v3169_v2  ;;  %2474 = vpow2.f32 %v1641_v6 }
 0x8d5   :  { %v1626_v16 = vsel %vm1606_vm8, %v1602_v4, %v2106_v36 }
 0x8d6   :  { %v1635_v50 = vmin.f32 %v1627_v37, 0.0  ;;  %v1630_v51 = vadd.f32 %v1626_v16, %v3165_v46  ;;  %vm1631_vm10 = vcmp.gt.f32.partialorder %v1627_v37, 0.0 }
 0x8d8   :  { %v2473_v44 = vpop.eup %2472  ;;  %v1638_v30 = vmin.f32 %v1630_v51, 0.0  ;;  %v1639_v10 = vmul.f32 1.442695, %v1635_v50  ;;  %vm1634_vm9 = vcmp.gt.f32.partialorder %v1630_v51, 0.0 }
 0x8d9   :  { %v2105_v52 = vadd.f32 -1.0, %v2473_v44 }
 0x8da   :  { %v1645_v61 = vmul.f32 1.442695, %v1638_v30  ;;  %v2475_v58 = vpop.eup %2474 }
 0x8db   :  { %v1625_v54 = vsel %vm1605_vm2, %v1601_v0, %v2105_v52  ;;  %v2108_v15 = vadd.f32 -1.0, %v2475_v58 }
 0x8dc   :  { %2476 = vpow2.f32 %v1645_v61  ;;  %v1629_v56 = vadd.f32 %v1625_v54, %v3174_v53 }
 0x8dd   :  { %2478 = vpow2.f32 %v1639_v10  ;;  %v1652_v31 = vsel %vm1632_vm3, %v1628_v63, %v2108_v15  ;;  %v1818_v63 = vld [vmem:[%s3450_s5 + $0x20] sm:$0xff] }
 0x8de   :  { %v1637_v47 = vmin.f32 %v1629_v56, 0.0  ;;  %vm1633_vm11 = vcmp.gt.f32.partialorder %v1629_v56, 0.0 }
 0x8e0   :  { %v1643_v2 = vmul.f32 1.442695, %v1637_v47 }
 0x8e2   :  { %v2477_v1 = vpop.eup %2476  ;;  %2480 = vpow2.f32 %v1643_v2 }
 0x8e3   :  { %v2110_v3 = vadd.f32 -1.0, %v2477_v1  ;;  %v2479_v46 = vpop.eup %2478 }
 0x8e4   :  { %v2107_v28 = vadd.f32 -1.0, %v2479_v46 }
 0x8e5   :  { %v1654_v39 = vsel %vm1634_vm9, %v1630_v51, %v2110_v3 }
 0x8e6   :  { %v1656_v42 = vpack.c.bf16 %v1654_v39, %v1652_v31  ;;  %v1651_v53 = vsel %vm1631_vm10, %v1627_v37, %v2107_v28  ;;  %v1813_v31 = vld [vmem:[%s3444_s6 + $0x90] sm:$0xf] }
 0x8e8   :  { %v2481_v5 = vpop.eup %2480  ;;  %1807 = vmatmul.bf16.vlgmr.msrb.gmra.mxu1 %v1656_v42 }
 0x8e9   :  { %v2109_v7 = vadd.f32 -1.0, %v2481_v5 }
 0x8eb   :  { %v1653_v9 = vsel %vm1633_vm11, %v1629_v56, %v2109_v7 }
 0x8ec   :  { %v1655_v55 = vpack.c.bf16 %v1653_v9, %v1651_v53  ;;  %v1863_v53 = vadd.s32 4294967288, %v3029_v24 }
 0x8ee   :  { %1793 = vmatmul.bf16.vlgmr.msrb.gmra.mxu2 %v1655_v55 }
 0x965   :  { %v1808_v62 = vpop.f32.mrf.mxu1 }
 0x96d   :  { %v1810_v32 = vpop.f32.mrf.mxu1 }
 0x971   :  { %v1794_v57 = vpop.f32.mrf.mxu2 }
 0x972   :  { %v1809_v19 = vadd.f32 %v1808_v62, %v1794_v57 }
 0x974   :  { %1889 = vrot.lane.b32.xlu2 %v1809_v19, %s2504_s18  ;;  %v1824_v20 = vmul.f32 %v1816_v13, %v1809_v19  ;;  %v1822_v8 = vmul.f32 %v1814_v18, %v1809_v19  ;;  %v1828_v4 = vmul.f32 %v1820_v27, %v1809_v19  ;;  %v1826_v40 = vmul.f32 %v1818_v63, %v1809_v19 }
 0x976   :  { %v1836_v22 = vsel %vm753_vm6, %v1824_v20, 0.0  ;;  %v1830_v25 = vsel %vm753_vm6, %v1822_v8, 0.0  ;;  %v1848_v29 = vsel %vm753_vm6, %v1828_v4, 0.0  ;;  %v1842_v45 = vsel %vm753_vm6, %v1826_v40, 0.0 }
 0x977   :  { %1837 = vadd.xlane.f32.xlu0 %v1836_v22  ;;  %1831 = vadd.xlane.f32.xlu1 %v1830_v25 }
 0x979   :  { %v1796_v34 = vpop.f32.mrf.mxu2 }
 0x97a   :  { %v1811_v60 = vadd.f32 %v1810_v32, %v1796_v34 }
 0x97c   :  { %v1829_v12 = vmul.f32 %v1821_v38, %v1811_v60  ;;  %v1825_v11 = vmul.f32 %v1817_v41, %v1811_v60  ;;  %v1827_v48 = vmul.f32 %v1819_v59, %v1811_v60  ;;  %v1823_v0 = vmul.f32 %v1815_v23, %v1811_v60 }
 0x97e   :  { %v1839_v43 = vsel %vm753_vm6, %v1825_v11, 0.0  ;;  %v1845_v49 = vsel %vm753_vm6, %v1827_v48, 0.0  ;;  %v1833_v21 = vsel %vm753_vm6, %v1823_v0, 0.0  ;;  %v1851_v56 = vsel %vm753_vm6, %v1829_v12, 0.0 }
 0x97f   :  { %1849 = vadd.xlane.f32.xlu1 %v1848_v29 }
 0x987   :  { %1840 = vadd.xlane.f32.xlu1 %v1839_v43 }
 0x98b   :  { %1891 = vrot.lane.b32.xlu0 %v1811_v60, %s2504_s18 }
 0x98f   :  { %1846 = vadd.xlane.f32.xlu1 %v1845_v49 }
 0x99d   :  { %1834 = vadd.xlane.f32.xlu2 %v1833_v21 }
 0x9b5   :  { %1843 = vadd.xlane.f32.xlu0 %v1842_v45 }
 0x9ce   :  { %v1890_v14 = vpop.permute.xlu2 %1889 }
 0x9cf   :  { %v1897_v33 = vmul.f32 %v1890_v14, %v1816_v13  ;;  %v1895_v26 = vmul.f32 %v1890_v14, %v1814_v18  ;;  %v1899_v36 = vmul.f32 %v1890_v14, %v1818_v63  ;;  %v1901_v58 = vmul.f32 %v1890_v14, %v1820_v27 }
 0x9d1   :  { %v1909_v35 = vsel %vm753_vm6, %v1897_v33, 0.0  ;;  %v1903_v17 = vsel %vm753_vm6, %v1895_v26, 0.0  ;;  %v1915_v6 = vsel %vm753_vm6, %v1899_v36, 0.0  ;;  %v1921_v47 = vsel %vm753_vm6, %v1901_v58, 0.0 }
 0x9d2   :  { %1910 = vadd.xlane.f32.xlu1 %v1909_v35  ;;  %1904 = vadd.xlane.f32.xlu2 %v1903_v17 }
 0x9da   :  { %1916 = vadd.xlane.f32.xlu2 %v1915_v6 }
 0x9ea   :  { %v1838_v37 = vpop.xlane.xlu0 %1837  ;;  %v1832_v2 = vpop.xlane.xlu1 %1831 }
 0x9eb   :  { %v1862_v62 = vperm.slane %v1832_v2, %v3029_v24  ;;  %v1867_v19 = vperm.slane %v1838_v37, %v3029_v24 }
 0x9f2   :  { %v1850_v1 = vpop.xlane.xlu1 %1849 }
 0x9f3   :  { %v1873_v27 = vperm.slane %v1850_v1, %v3029_v24 }
 0x9fa   :  { %v1841_v46 = vpop.xlane.xlu1 %1840 }
 0x9fb   :  { %v1868_v57 = vperm.slane %v1841_v46, %v1863_v53 }
 0x9fd   :  { %v1892_v16 = vpop.permute.xlu0 %1891 }
 0x9fe   :  { %v1896_v50 = vmul.f32 %v1892_v16, %v1815_v23  ;;  %v1902_v51 = vmul.f32 %v1892_v16, %v1821_v38  ;;  %v1898_v44 = vmul.f32 %v1892_v16, %v1817_v41  ;;  %v1900_v61 = vmul.f32 %v1892_v16, %v1819_v59 }
 0xa00   :  { %v1906_v30 = vsel %vm753_vm6, %v1896_v50, 0.0  ;;  %v1924_v52 = vsel %vm753_vm6, %v1902_v51, 0.0  ;;  %v1912_v10 = vsel %vm753_vm6, %v1898_v44, 0.0  ;;  %v1918_v54 = vsel %vm753_vm6, %v1900_v61, 0.0 }
 0xa01   :  { %1907 = vadd.xlane.f32.xlu0 %v1906_v30  ;;  %1925 = vadd.xlane.f32.xlu1 %v1924_v52  ;;  %vm1865_vm6 = vcmask 130112  }
 0xa02   :  { %1913 = vadd.xlane.f32.xlu2 %v1912_v10  ;;  %v1847_v28 = vpop.xlane.xlu1 %1846  ;;  %v1869_v32 = vsel %vm1865_vm6, %v1868_v57, %v1867_v19 }
 0xa03   :  { %v1871_v18 = vperm.slane %v1847_v28, %v1863_v53 }
 0xa09   :  { %1919 = vadd.xlane.f32.xlu0 %v1918_v54 }
 0xa0a   :  { %1852 = vadd.xlane.f32.xlu2 %v1851_v56 }
 0xa10   :  { %v1835_v15 = vpop.xlane.xlu2 %1834 }
 0xa11   :  { %1922 = vadd.xlane.f32.xlu0 %v1921_v47  ;;  %v1864_v9 = vperm.slane %v1835_v15, %v1863_v53 }
 0xa13   :  { %v1866_v20 = vsel %vm1865_vm6, %v1864_v9, %v1862_v62 }
 0xa14   :  { %v1877_v4 = vsel %vm1876_vm12, %v1869_v32, %v1866_v20 }
 0xa1a   :  { %1957 = vperm.xlu1 %2383, %v1813_v31  }
 0xa28   :  { %v1844_v39 = vpop.xlane.xlu0 %1843 }
 0xa29   :  { %v1870_v55 = vperm.slane %v1844_v39, %v3029_v24 }
 0xa2b   :  { %v1872_v22 = vsel %vm1865_vm6, %v1871_v18, %v1870_v55 }
 0xa2c   :  { %v1879_v41 = vsel %vm1878_vm13, %v1872_v22, %v1877_v4 }
 0xa45   :  { %v1905_v3 = vpop.xlane.xlu2 %1904  ;;  %v1911_v13 = vpop.xlane.xlu1 %1910 }
 0xa46   :  { %v1938_v11 = vperm.slane %v1911_v13, %v3029_v24  ;;  %v1935_v43 = vperm.slane %v1905_v3, %v3029_v24 }
 0xa4d   :  { %v1917_v42 = vpop.xlane.xlu2 %1916 }
 0xa4e   :  { %v1941_v48 = vperm.slane %v1917_v42, %v3029_v24 }
 0xa74   :  { %v1908_v5 = vpop.xlane.xlu0 %1907  ;;  %v1926_v49 = vpop.xlane.xlu1 %1925 }
 0xa75   :  { %v1914_v7 = vpop.xlane.xlu2 %1913  ;;  %v1936_v38 = vperm.slane %v1908_v5, %v1863_v53  ;;  %v1945_v45 = vperm.slane %v1926_v49, %v1863_v53 }
 0xa76   :  { %v1939_v60 = vperm.slane %v1914_v7, %v1863_v53 }
 0xa77   :  { %v1937_v0 = vsel %vm1865_vm6, %v1936_v38, %v1935_v43 }
 0xa78   :  { %v1940_v21 = vsel %vm1865_vm6, %v1939_v60, %v1938_v11 }
 0xa79   :  { %v1947_v33 = vsel %vm1876_vm12, %v1940_v21, %v1937_v0 }
 0xa7c   :  { %v1920_v8 = vpop.xlane.xlu0 %1919 }
 0xa7d   :  { %v1853_v25 = vpop.xlane.xlu2 %1852  ;;  %v1942_v12 = vperm.slane %v1920_v8, %v1863_v53 }
 0xa7e   :  { %v1874_v34 = vperm.slane %v1853_v25, %v1863_v53 }
 0xa7f   :  { %v1943_v63 = vsel %vm1865_vm6, %v1942_v12, %v1941_v48 }
 0xa80   :  { %v1875_v29 = vsel %vm1865_vm6, %v1874_v34, %v1873_v27  ;;  %v1948_v35 = vsel %vm1878_vm13, %v1943_v63, %v1947_v33 }
 0xa81   :  { %v1881_v59 = vsel %vm1880_vm14, %v1875_v29, %v1879_v41 }
 0xa82   :  { %v1884_v23 = vsel %vm1883_vm15, %v1881_v59, 0.0 }
 0xa83   :  { %1885 = vadd.xlane.f32.xlu2 %v1884_v23 }
 0xa84   :  { %v1923_v40 = vpop.xlane.xlu0 %1922 }
 0xa85   :  { %v1944_v14 = vperm.slane %v1923_v40, %v3029_v24 }
 0xa87   :  { %v1946_v26 = vsel %vm1865_vm6, %v1945_v45, %v1944_v14 }
 0xa88   :  { %v1949_v17 = vsel %vm1880_vm14, %v1946_v26, %v1948_v35 }
 0xa89   :  { %v1951_v36 = vsel %vm1883_vm15, %v1949_v17, 0.0 }
 0xa8a   :  { %1952 = vadd.xlane.f32.xlu0 %v1951_v36 }
 0xa8c   :  { %v1958_v6 = vpop.permute.xlu1 %1957 }
 0xaf6   :  { %v1886_v37 = vpop.xlane.xlu2 %1885 }
 0xafd   :  { %v1953_v16 = vpop.xlane.xlu0 %1952 }
 0xafe   :  { %v1954_v50 = vsel %vm748_vm5, %v1886_v37, %v1953_v16 }
 0xaff   :  { %v1960_v51 = vadd.f32 %v1958_v6, %v1954_v50 }
 0xb01   :  { %1962 = vst.msk [vmem:[%s3451_s8] sm:$0xf] %vm1961_vm0, %v1960_v51 }

</bundles_post_ra>
